<compile_context>
chip_gen: v7x
topology: tpu7x:2x2x1
jax: 0.10.0
libtpu: 0.0.40
codegen_flags: <defaults>
</compile_context>

<pallas_src>
import numpy as np
import jax
import jax.numpy as jnp
from jax import lax
from jax.experimental import pallas as pl
from jax.experimental.pallas import tpu as pltpu

# ----------------------------- model sizes ---------------------------------
TARGET_SEQ_LEN = 8      # T
BATCH          = 2      # B
DEC_SIZE       = 32     # decoder GRU hidden
ENC_SIZE       = 32     # encoder GRU hidden
K              = 8      # latent size
N_PSI_HIDDEN   = 32
N_PSI_LOWRANK  = 16
HUMAN_SIZE     = 16     # output_dim
INPUT_DIM      = 8      # input_dim  (< HUMAN_SIZE, residual_output=True)

C_SIZE     = DEC_SIZE * HUMAN_SIZE
D_SIZE     = INPUT_DIM * (HUMAN_SIZE - INPUT_DIM)
N_PSI_PARS = C_SIZE + D_SIZE

F32 = jnp.float32
_DOT = dict(preferred_element_type=jnp.float32)   # default MXU precision (no HIGHEST)


# ------------------------------- kernel --------------------------------------
def _gru_step(gi_t, h, whh, bhh, H):
    """One batched nn.GRU step (gate order r, z, n). gi_t already holds x@W_ih + b_ih."""
    gh = jnp.dot(h, whh, **_DOT) + bhh                      # (B, 3H) -- the serial chain op
    r = jax.nn.sigmoid(gi_t[:, 0:H] + gh[:, 0:H])
    z = jax.nn.sigmoid(gi_t[:, H:2 * H] + gh[:, H:2 * H])
    n = jnp.tanh(gi_t[:, 2 * H:3 * H] + r * gh[:, 2 * H:3 * H])
    return (1.0 - z) * n + z * h


def fused_kernel(inp_ref, outp_ref, eps_ref,
                 enc_wih_ref, enc_whh_ref, enc_bih_ref, enc_bhh_ref,
                 wmu_ref, wls_ref, bls_ref,
                 w1_ref, b1_ref, w2_ref, b2_ref,
                 w3c_ref, w3d_ref, b3c_ref, b3d_ref,
                 dec_wih_ref, dec_whh_ref, dec_bih_ref, dec_bhh_ref,
                 y_ref, mu_ref, ls_ref):
    """Entire DynamicsDict forward (state=None, init_state_noise=False) in one kernel."""
    B, T, _ = inp_ref.shape
    ENC = enc_whh_ref.shape[0]
    DEC = dec_whh_ref.shape[0]
    L = w3c_ref.shape[0]

    # hoist all weight loads out of the unrolled recurrence
    enc_wih = enc_wih_ref[...]
    enc_whh = enc_whh_ref[...]
    enc_bih = enc_bih_ref[...]
    enc_bhh = enc_bhh_ref[...]
    dec_wih = dec_wih_ref[...]
    dec_whh = dec_whh_ref[...]
    dec_bih = dec_bih_ref[...]
    dec_bhh = dec_bhh_ref[...]

    # Hoisted input->gate projections: one (T, Din)x(Din, 3H) matmul per batch per GRU,
    # completely off the recurrent dependency chain.
    gi_e = [jnp.dot(outp_ref[b], enc_wih, **_DOT) + enc_bih for b in range(B)]  # each (T, 3*ENC)
    gi_d = [jnp.dot(inp_ref[b], dec_wih, **_DOT) + dec_bih for b in range(B)]   # each (T, 3*DEC)

    # Batched recurrences: one h@Whh push per GRU per timestep (the critical path).
    h_e = jnp.zeros((B, ENC), F32)
    h_d = jnp.zeros((B, DEC), F32)
    dec_steps = []                                   # decoder hidden seq kept in registers
    for t in range(T):                               # fully unrolled (T=8)
        gie_t = jnp.concatenate([g[t:t + 1, :] for g in gi_e], axis=0)   # (B, 3*ENC), off-chain
        gid_t = jnp.concatenate([g[t:t + 1, :] for g in gi_d], axis=0)   # (B, 3*DEC), off-chain
        h_e = _gru_step(gie_t, h_e, enc_whh, enc_bhh, ENC)
        h_d = _gru_step(gid_t, h_d, dec_whh, dec_bhh, DEC)
        dec_steps.append(h_d)

    # Latent heads + reparameterization + psi MLP (h_e feeds the heads directly; no scratch).
    mu = jnp.dot(h_e, wmu_ref[...], **_DOT)                          # (B, K)
    ls = jnp.dot(h_e, wls_ref[...], **_DOT) + bls_ref[...]           # (B, K)
    mu_ref[...] = mu
    ls_ref[...] = ls
    z = mu + eps_ref[...] * jnp.exp(ls)                              # (B, K)
    h1 = jnp.tanh(jnp.dot(z, w1_ref[...], **_DOT) + b1_ref[...])     # (B, N_PSI_HIDDEN)
    h2 = jnp.dot(h1, w2_ref[...], **_DOT) + b2_ref[...]              # (B, N_PSI_LOWRANK)

    # C[b], D[b] via AXPYs over the low-rank dim (no in-kernel (B,512)->(B,32,16) reshape).
    b3c = b3c_ref[...]                                               # (DEC, HUMAN)
    b3d = b3d_ref[...]                                               # (IN, HUMAN-IN)
    C_acc = [b3c for _ in range(B)]
    D_acc = [b3d for _ in range(B)]
    for l in range(L):
        w3c_l = w3c_ref[l]                                           # (DEC, HUMAN)
        w3d_l = w3d_ref[l]                                           # (IN, HUMAN-IN)
        for b in range(B):
            coef = h2[b:b + 1, l:l + 1]                              # (1,1) -> broadcast
            C_acc[b] = C_acc[b] + coef * w3c_l
            D_acc[b] = D_acc[b] + coef * w3d_l

    # Fused residual readout: yhat[b] = dec[b] @ C[b] + cat(inputs[b], inputs[b] @ D[b]).
    for b in range(B):
        dec_b = jnp.concatenate([s[b:b + 1, :] for s in dec_steps], axis=0)   # (T, DEC)
        inp_b = inp_ref[b]                                                     # (T, IN)
        base = jnp.dot(dec_b, C_acc[b], **_DOT)                                # (T, HUMAN)
        hi = jnp.dot(inp_b, D_acc[b], **_DOT)                                  # (T, HUMAN-IN)
        y_ref[b] = base + jnp.concatenate([inp_b, hi], axis=1)                 # (T, HUMAN)


# ------------------------------ pallas wrapper -------------------------------
def forward(params, inputs, outputs, eps):
    """DynamicsDict.forward with state=None, init_state_noise=False.

    inputs:  (B, T, INPUT_DIM)    outputs: (B, T, HUMAN_SIZE)
    eps:     (B, K) reparameterization noise (torch.randn_like(logstd) analogue)
    Returns (yhats, mu, logstd, None).
    """
    B, T, _ = inputs.shape
    yhats, mu, logstd = pl.pallas_call(
        fused_kernel,
        out_shape=(jax.ShapeDtypeStruct((B, T, HUMAN_SIZE), F32),   # yhats
                   jax.ShapeDtypeStruct((B, K), F32),               # mu
                   jax.ShapeDtypeStruct((B, K), F32)),              # logstd
    )(inputs, outputs, eps,
      params["enc_wih"], params["enc_whh"], params["enc_bih"], params["enc_bhh"],
      params["to_mu"], params["to_lsigma"], params["to_lsigma_bias"],
      params["psi_w1"], params["psi_b1"], params["psi_w2"], params["psi_b2"],
      params["psi_w3C"], params["psi_w3D"], params["psi_b3C"], params["psi_b3D"],
      params["dec_wih"], params["dec_whh"], params["dec_bih"], params["dec_bhh"])
    return yhats, mu, logstd, None            # states is None, as in the reference


# ------------------------------ parameters ----------------------------------
def _xavier(key, shape):
    lim = np.sqrt(6.0 / (shape[0] + shape[1]))
    return jax.random.uniform(key, shape, F32, -lim, lim)


def _gru_uniform(key, shape, hidden):
    lim = 1.0 / np.sqrt(hidden)
    return jax.random.uniform(key, shape, F32, -lim, lim)


def init_params(key):
    ks = jax.random.split(key, 20)
    p = {}
    # encoder GRU (input = HUMAN_SIZE, hidden = ENC_SIZE); weights stored as (in, 3H)
    p["enc_wih"] = _gru_uniform(ks[0], (HUMAN_SIZE, 3 * ENC_SIZE), ENC_SIZE)
    p["enc_whh"] = _gru_uniform(ks[1], (ENC_SIZE, 3 * ENC_SIZE), ENC_SIZE)
    p["enc_bih"] = _gru_uniform(ks[2], (1, 3 * ENC_SIZE), ENC_SIZE)
    p["enc_bhh"] = _gru_uniform(ks[3], (1, 3 * ENC_SIZE), ENC_SIZE)
    # latent heads
    p["to_mu"] = _xavier(ks[4], (ENC_SIZE, K))
    p["to_lsigma"] = _xavier(ks[5], (ENC_SIZE, K))
    p["to_lsigma_bias"] = -0.5 * jnp.ones((1, K), F32)
    # psi decoder MLP
    p["psi_w1"] = _xavier(ks[6], (K, N_PSI_HIDDEN))
    p["psi_b1"] = jnp.zeros((1, N_PSI_HIDDEN), F32)
    p["psi_w2"] = _xavier(ks[7], (N_PSI_HIDDEN, N_PSI_LOWRANK))
    p["psi_b2"] = jnp.zeros((1, N_PSI_LOWRANK), F32)
    p["psi_w3"] = _xavier(ks[8], (N_PSI_LOWRANK, N_PSI_PARS))
    p["psi_b3"] = jnp.zeros((1, N_PSI_PARS), F32)
    # host-side pre-reshape of the psi->C/D projection (avoids any in-kernel relayout)
    p["psi_w3C"] = p["psi_w3"][:, :C_SIZE].reshape(N_PSI_LOWRANK, DEC_SIZE, HUMAN_SIZE)
    p["psi_w3D"] = p["psi_w3"][:, C_SIZE:].reshape(N_PSI_LOWRANK, INPUT_DIM,
                                                   HUMAN_SIZE - INPUT_DIM)
    p["psi_b3C"] = p["psi_b3"][0, :C_SIZE].reshape(DEC_SIZE, HUMAN_SIZE)
    p["psi_b3D"] = p["psi_b3"][0, C_SIZE:].reshape(INPUT_DIM, HUMAN_SIZE - INPUT_DIM)
    # decoder GRU (input = INPUT_DIM, hidden = DEC_SIZE)
    p["dec_wih"] = _gru_uniform(ks[9], (INPUT_DIM, 3 * DEC_SIZE), DEC_SIZE)
    p["dec_whh"] = _gru_uniform(ks[10], (DEC_SIZE, 3 * DEC_SIZE), DEC_SIZE)
    p["dec_bih"] = _gru_uniform(ks[11], (1, 3 * DEC_SIZE), DEC_SIZE)
    p["dec_bhh"] = _gru_uniform(ks[12], (1, 3 * DEC_SIZE), DEC_SIZE)
    return p


# ------------------------------ pure-JAX reference ---------------------------
def _gru_ref(x_bm, h0, wih, whh, bih, bhh):
    H = h0.shape[1]

    def step(h, x_t):
        gi = x_t @ wih + bih[0]
        gh = h @ whh + bhh[0]
        r = jax.nn.sigmoid(gi[:, :H] + gh[:, :H])
        zg = jax.nn.sigmoid(gi[:, H:2 * H] + gh[:, H:2 * H])
        n = jnp.tanh(gi[:, 2 * H:] + r * gh[:, 2 * H:])
        h_new = (1.0 - zg) * n + zg * h
        return h_new, h_new

    hlast, hseq = lax.scan(step, h0, jnp.transpose(x_bm, (1, 0, 2)))
    return jnp.transpose(hseq, (1, 0, 2)), hlast


def forward_ref(params, inputs, outputs, eps):
    B = inputs.shape[0]
    _, enc_last = _gru_ref(outputs, jnp.zeros((B, ENC_SIZE), F32),
                           params["enc_wih"], params["enc_whh"],
                           params["enc_bih"], params["enc_bhh"])
    mu = enc_last @ params["to_mu"]
    logstd = enc_last @ params["to_lsigma"] + params["to_lsigma_bias"][0]
    z = mu + eps * jnp.exp(logstd)
    h1 = jnp.tanh(z @ params["psi_w1"] + params["psi_b1"][0])
    h2 = h1 @ params["psi_w2"] + params["psi_b2"][0]
    psi = h2 @ params["psi_w3"] + params["psi_b3"][0]
    C = psi[:, :C_SIZE].reshape(B, DEC_SIZE, HUMAN_SIZE)
    D = psi[:, C_SIZE:].reshape(B, INPUT_DIM, HUMAN_SIZE - INPUT_DIM)
    dec, _ = _gru_ref(inputs, jnp.zeros((B, DEC_SIZE), F32),
                      params["dec_wih"], params["dec_whh"],
                      params["dec_bih"], params["dec_bhh"])
    yhats = []
    for bb in range(B):
        resid = jnp.concatenate([inputs[bb, :, :HUMAN_SIZE], inputs[bb] @ D[bb]], axis=1)
        yhats.append(dec[bb] @ C[bb] + resid)
    return jnp.stack(yhats, 0), mu, logstd, None


# ----------------------------------- main ------------------------------------
if __name__ == "__main__":
    key = jax.random.PRNGKey(0)
    k_par, k_in, k_out, k_eps = jax.random.split(key, 4)

    params = init_params(k_par)
    inputs = jax.random.normal(k_in, (BATCH, TARGET_SEQ_LEN, INPUT_DIM), F32)
    outputs = jax.random.normal(k_out, (BATCH, TARGET_SEQ_LEN, HUMAN_SIZE), F32)
    eps = jax.random.normal(k_eps, (BATCH, K), F32)

    fwd = jax.jit(forward)
    yhats, mu, logstd, states = fwd(params, inputs, outputs, eps)
    jax.block_until_ready((yhats, mu, logstd))

    # sanity check against a pure-JAX reference of the same math
    y_ref, mu_ref, ls_ref, _ = jax.jit(forward_ref)(params, inputs, outputs, eps)
    np.testing.assert_allclose(np.asarray(mu), np.asarray(mu_ref), rtol=5e-3, atol=5e-3)
    np.testing.assert_allclose(np.asarray(logstd), np.asarray(ls_ref), rtol=5e-3, atol=5e-3)
    np.testing.assert_allclose(np.asarray(yhats), np.asarray(y_ref), rtol=1e-2, atol=1e-2)

    assert yhats.shape == (BATCH, TARGET_SEQ_LEN, HUMAN_SIZE)
    assert mu.shape == (BATCH, K) and logstd.shape == (BATCH, K)
    assert states is None
    print("KERNEL_OK")
</pallas_src>

<mosaic_0001>
module attributes {stable_mosaic.version = 11 : i64} {
  func.func @fused_kernel(%arg0: memref<2x8x8xf32, #tpu.memory_space<vmem>>, %arg1: memref<2x8x16xf32, #tpu.memory_space<vmem>>, %arg2: memref<2x8xf32, #tpu.memory_space<vmem>>, %arg3: memref<16x96xf32, #tpu.memory_space<vmem>>, %arg4: memref<32x96xf32, #tpu.memory_space<vmem>>, %arg5: memref<1x96xf32, #tpu.memory_space<vmem>>, %arg6: memref<1x96xf32, #tpu.memory_space<vmem>>, %arg7: memref<32x8xf32, #tpu.memory_space<vmem>>, %arg8: memref<32x8xf32, #tpu.memory_space<vmem>>, %arg9: memref<1x8xf32, #tpu.memory_space<vmem>>, %arg10: memref<8x32xf32, #tpu.memory_space<vmem>>, %arg11: memref<1x32xf32, #tpu.memory_space<vmem>>, %arg12: memref<32x16xf32, #tpu.memory_space<vmem>>, %arg13: memref<1x16xf32, #tpu.memory_space<vmem>>, %arg14: memref<16x32x16xf32, #tpu.memory_space<vmem>>, %arg15: memref<16x8x8xf32, #tpu.memory_space<vmem>>, %arg16: memref<32x16xf32, #tpu.memory_space<vmem>>, %arg17: memref<8x8xf32, #tpu.memory_space<vmem>>, %arg18: memref<8x96xf32, #tpu.memory_space<vmem>>, %arg19: memref<32x96xf32, #tpu.memory_space<vmem>>, %arg20: memref<1x96xf32, #tpu.memory_space<vmem>>, %arg21: memref<1x96xf32, #tpu.memory_space<vmem>>, %arg22: memref<2x8x16xf32, #tpu.memory_space<vmem>>, %arg23: memref<2x8xf32, #tpu.memory_space<vmem>>, %arg24: memref<2x8xf32, #tpu.memory_space<vmem>>) attributes {dimension_semantics = [], scalar_prefetch = 0 : i64, scratch_operands = 0 : i64, tpu.core_type = #tpu.core_type<tc>} {
    %c0 = arith.constant 0 : index
    %c0_0 = arith.constant 0 : index
    %0 = vector.load %arg3[%c0, %c0_0] : memref<16x96xf32, #tpu.memory_space<vmem>>, vector<16x96xf32>
    %c0_1 = arith.constant 0 : index
    %c0_2 = arith.constant 0 : index
    %1 = vector.load %arg4[%c0_1, %c0_2] : memref<32x96xf32, #tpu.memory_space<vmem>>, vector<32x96xf32>
    %c0_3 = arith.constant 0 : index
    %c0_4 = arith.constant 0 : index
    %2 = vector.load %arg5[%c0_3, %c0_4] : memref<1x96xf32, #tpu.memory_space<vmem>>, vector<1x96xf32>
    %c0_5 = arith.constant 0 : index
    %c0_6 = arith.constant 0 : index
    %3 = vector.load %arg6[%c0_5, %c0_6] : memref<1x96xf32, #tpu.memory_space<vmem>>, vector<1x96xf32>
    %c0_7 = arith.constant 0 : index
    %c0_8 = arith.constant 0 : index
    %4 = vector.load %arg18[%c0_7, %c0_8] : memref<8x96xf32, #tpu.memory_space<vmem>>, vector<8x96xf32>
    %c0_9 = arith.constant 0 : index
    %c0_10 = arith.constant 0 : index
    %5 = vector.load %arg19[%c0_9, %c0_10] : memref<32x96xf32, #tpu.memory_space<vmem>>, vector<32x96xf32>
    %c0_11 = arith.constant 0 : index
    %c0_12 = arith.constant 0 : index
    %6 = vector.load %arg20[%c0_11, %c0_12] : memref<1x96xf32, #tpu.memory_space<vmem>>, vector<1x96xf32>
    %c0_13 = arith.constant 0 : index
    %c0_14 = arith.constant 0 : index
    %7 = vector.load %arg21[%c0_13, %c0_14] : memref<1x96xf32, #tpu.memory_space<vmem>>, vector<1x96xf32>
    %c0_15 = arith.constant 0 : index
    %c0_16 = arith.constant 0 : index
    %c0_17 = arith.constant 0 : index
    %8 = vector.load %arg1[%c0_15, %c0_16, %c0_17] : memref<2x8x16xf32, #tpu.memory_space<vmem>>, vector<1x8x16xf32>
    %9 = vector.shape_cast %8 : vector<1x8x16xf32> to vector<8x16xf32>
    %cst = arith.constant dense<0.000000e+00> : vector<8x96xf32>
    %10 = tpu.matmul %9, %0, %cst {dimension_numbers = #tpu.dot_dimension_numbers<[1], [0], [0], [1], [0, 0, 1, 1], [], []>} : vector<8x16xf32>, vector<16x96xf32>, vector<8x96xf32> -> vector<8x96xf32>
    %11 = vector.broadcast %2 : vector<1x96xf32> to vector<8x96xf32>
    %12 = arith.addf %10, %11 : vector<8x96xf32>
    %c1 = arith.constant 1 : index
    %c0_18 = arith.constant 0 : index
    %c0_19 = arith.constant 0 : index
    %13 = vector.load %arg1[%c1, %c0_18, %c0_19] : memref<2x8x16xf32, #tpu.memory_space<vmem>>, vector<1x8x16xf32>
    %14 = vector.shape_cast %13 : vector<1x8x16xf32> to vector<8x16xf32>
    %cst_20 = arith.constant dense<0.000000e+00> : vector<8x96xf32>
    %15 = tpu.matmul %14, %0, %cst_20 {dimension_numbers = #tpu.dot_dimension_numbers<[1], [0], [0], [1], [0, 0, 1, 1], [], []>} : vector<8x16xf32>, vector<16x96xf32>, vector<8x96xf32> -> vector<8x96xf32>
    %16 = vector.broadcast %2 : vector<1x96xf32> to vector<8x96xf32>
    %17 = arith.addf %15, %16 : vector<8x96xf32>
    %c0_21 = arith.constant 0 : index
    %c0_22 = arith.constant 0 : index
    %c0_23 = arith.constant 0 : index
    %18 = vector.load %arg0[%c0_21, %c0_22, %c0_23] : memref<2x8x8xf32, #tpu.memory_space<vmem>>, vector<1x8x8xf32>
    %19 = vector.shape_cast %18 : vector<1x8x8xf32> to vector<8x8xf32>
    %cst_24 = arith.constant dense<0.000000e+00> : vector<8x96xf32>
    %20 = tpu.matmul %19, %4, %cst_24 {dimension_numbers = #tpu.dot_dimension_numbers<[1], [0], [0], [1], [0, 0, 1, 1], [], []>} : vector<8x8xf32>, vector<8x96xf32>, vector<8x96xf32> -> vector<8x96xf32>
    %21 = vector.broadcast %6 : vector<1x96xf32> to vector<8x96xf32>
    %22 = arith.addf %20, %21 : vector<8x96xf32>
    %c1_25 = arith.constant 1 : index
    %c0_26 = arith.constant 0 : index
    %c0_27 = arith.constant 0 : index
    %23 = vector.load %arg0[%c1_25, %c0_26, %c0_27] : memref<2x8x8xf32, #tpu.memory_space<vmem>>, vector<1x8x8xf32>
    %24 = vector.shape_cast %23 : vector<1x8x8xf32> to vector<8x8xf32>
    %cst_28 = arith.constant dense<0.000000e+00> : vector<8x96xf32>
    %25 = tpu.matmul %24, %4, %cst_28 {dimension_numbers = #tpu.dot_dimension_numbers<[1], [0], [0], [1], [0, 0, 1, 1], [], []>} : vector<8x8xf32>, vector<8x96xf32>, vector<8x96xf32> -> vector<8x96xf32>
    %26 = vector.broadcast %6 : vector<1x96xf32> to vector<8x96xf32>
    %27 = arith.addf %25, %26 : vector<8x96xf32>
    %cst_29 = arith.constant 0.000000e+00 : f32
    %28 = vector.broadcast %cst_29 : f32 to vector<2x32xf32>
    %cst_30 = arith.constant 0.000000e+00 : f32
    %29 = vector.broadcast %cst_30 : f32 to vector<2x32xf32>
    %30 = vector.extract_strided_slice %12 {offsets = [0, 0], sizes = [1, 96], strides = [1, 1]} : vector<8x96xf32> to vector<1x96xf32>
    %31 = vector.extract_strided_slice %17 {offsets = [0, 0], sizes = [1, 96], strides = [1, 1]} : vector<8x96xf32> to vector<1x96xf32>
    %32 = tpu.concatenate %30, %31 in 0 : vector<1x96xf32>, vector<1x96xf32> -> vector<2x96xf32>
    %33 = vector.extract_strided_slice %22 {offsets = [0, 0], sizes = [1, 96], strides = [1, 1]} : vector<8x96xf32> to vector<1x96xf32>
    %34 = vector.extract_strided_slice %27 {offsets = [0, 0], sizes = [1, 96], strides = [1, 1]} : vector<8x96xf32> to vector<1x96xf32>
    %35 = tpu.concatenate %33, %34 in 0 : vector<1x96xf32>, vector<1x96xf32> -> vector<2x96xf32>
    %cst_31 = arith.constant dense<0.000000e+00> : vector<2x96xf32>
    %36 = tpu.matmul %28, %1, %cst_31 {dimension_numbers = #tpu.dot_dimension_numbers<[1], [0], [0], [1], [0, 0, 1, 1], [], []>} : vector<2x32xf32>, vector<32x96xf32>, vector<2x96xf32> -> vector<2x96xf32>
    %37 = vector.broadcast %3 : vector<1x96xf32> to vector<2x96xf32>
    %38 = arith.addf %36, %37 : vector<2x96xf32>
    %39 = vector.extract_strided_slice %32 {offsets = [0, 0], sizes = [2, 32], strides = [1, 1]} : vector<2x96xf32> to vector<2x32xf32>
    %40 = vector.extract_strided_slice %38 {offsets = [0, 0], sizes = [2, 32], strides = [1, 1]} : vector<2x96xf32> to vector<2x32xf32>
    %41 = arith.addf %39, %40 : vector<2x32xf32>
    %42 = arith.negf %41 : vector<2x32xf32>
    %43 = math.exp %42 : vector<2x32xf32>
    %cst_32 = arith.constant 1.000000e+00 : f32
    %44 = vector.broadcast %cst_32 : f32 to vector<2x32xf32>
    %45 = arith.addf %44, %43 : vector<2x32xf32>
    %46 = arith.divf %44, %45 : vector<2x32xf32>
    %47 = vector.extract_strided_slice %32 {offsets = [0, 32], sizes = [2, 32], strides = [1, 1]} : vector<2x96xf32> to vector<2x32xf32>
    %48 = vector.extract_strided_slice %38 {offsets = [0, 32], sizes = [2, 32], strides = [1, 1]} : vector<2x96xf32> to vector<2x32xf32>
    %49 = arith.addf %47, %48 : vector<2x32xf32>
    %50 = arith.negf %49 : vector<2x32xf32>
    %51 = math.exp %50 : vector<2x32xf32>
    %cst_33 = arith.constant 1.000000e+00 : f32
    %52 = vector.broadcast %cst_33 : f32 to vector<2x32xf32>
    %53 = arith.addf %52, %51 : vector<2x32xf32>
    %54 = arith.divf %52, %53 : vector<2x32xf32>
    %55 = vector.extract_strided_slice %32 {offsets = [0, 64], sizes = [2, 32], strides = [1, 1]} : vector<2x96xf32> to vector<2x32xf32>
    %56 = vector.extract_strided_slice %38 {offsets = [0, 64], sizes = [2, 32], strides = [1, 1]} : vector<2x96xf32> to vector<2x32xf32>
    %57 = arith.mulf %46, %56 : vector<2x32xf32>
    %58 = arith.addf %55, %57 : vector<2x32xf32>
    %59 = math.tanh %58 : vector<2x32xf32>
    %cst_34 = arith.constant 1.000000e+00 : f32
    %60 = vector.broadcast %cst_34 : f32 to vector<2x32xf32>
    %61 = arith.subf %60, %54 : vector<2x32xf32>
    %62 = arith.mulf %61, %59 : vector<2x32xf32>
    %63 = arith.mulf %54, %28 : vector<2x32xf32>
    %64 = arith.addf %62, %63 : vector<2x32xf32>
    %cst_35 = arith.constant dense<0.000000e+00> : vector<2x96xf32>
    %65 = tpu.matmul %29, %5, %cst_35 {dimension_numbers = #tpu.dot_dimension_numbers<[1], [0], [0], [1], [0, 0, 1, 1], [], []>} : vector<2x32xf32>, vector<32x96xf32>, vector<2x96xf32> -> vector<2x96xf32>
    %66 = vector.broadcast %7 : vector<1x96xf32> to vector<2x96xf32>
    %67 = arith.addf %65, %66 : vector<2x96xf32>
    %68 = vector.extract_strided_slice %35 {offsets = [0, 0], sizes = [2, 32], strides = [1, 1]} : vector<2x96xf32> to vector<2x32xf32>
    %69 = vector.extract_strided_slice %67 {offsets = [0, 0], sizes = [2, 32], strides = [1, 1]} : vector<2x96xf32> to vector<2x32xf32>
    %70 = arith.addf %68, %69 : vector<2x32xf32>
    %71 = arith.negf %70 : vector<2x32xf32>
    %72 = math.exp %71 : vector<2x32xf32>
    %cst_36 = arith.constant 1.000000e+00 : f32
    %73 = vector.broadcast %cst_36 : f32 to vector<2x32xf32>
    %74 = arith.addf %73, %72 : vector<2x32xf32>
    %75 = arith.divf %73, %74 : vector<2x32xf32>
    %76 = vector.extract_strided_slice %35 {offsets = [0, 32], sizes = [2, 32], strides = [1, 1]} : vector<2x96xf32> to vector<2x32xf32>
    %77 = vector.extract_strided_slice %67 {offsets = [0, 32], sizes = [2, 32], strides = [1, 1]} : vector<2x96xf32> to vector<2x32xf32>
    %78 = arith.addf %76, %77 : vector<2x32xf32>
    %79 = arith.negf %78 : vector<2x32xf32>
    %80 = math.exp %79 : vector<2x32xf32>
    %cst_37 = arith.constant 1.000000e+00 : f32
    %81 = vector.broadcast %cst_37 : f32 to vector<2x32xf32>
    %82 = arith.addf %81, %80 : vector<2x32xf32>
    %83 = arith.divf %81, %82 : vector<2x32xf32>
    %84 = vector.extract_strided_slice %35 {offsets = [0, 64], sizes = [2, 32], strides = [1, 1]} : vector<2x96xf32> to vector<2x32xf32>
    %85 = vector.extract_strided_slice %67 {offsets = [0, 64], sizes = [2, 32], strides = [1, 1]} : vector<2x96xf32> to vector<2x32xf32>
    %86 = arith.mulf %75, %85 : vector<2x32xf32>
    %87 = arith.addf %84, %86 : vector<2x32xf32>
    %88 = math.tanh %87 : vector<2x32xf32>
    %cst_38 = arith.constant 1.000000e+00 : f32
    %89 = vector.broadcast %cst_38 : f32 to vector<2x32xf32>
    %90 = arith.subf %89, %83 : vector<2x32xf32>
    %91 = arith.mulf %90, %88 : vector<2x32xf32>
    %92 = arith.mulf %83, %29 : vector<2x32xf32>
    %93 = arith.addf %91, %92 : vector<2x32xf32>
    %94 = vector.extract_strided_slice %12 {offsets = [1, 0], sizes = [1, 96], strides = [1, 1]} : vector<8x96xf32> to vector<1x96xf32>
    %95 = vector.extract_strided_slice %17 {offsets = [1, 0], sizes = [1, 96], strides = [1, 1]} : vector<8x96xf32> to vector<1x96xf32>
    %96 = tpu.concatenate %94, %95 in 0 : vector<1x96xf32>, vector<1x96xf32> -> vector<2x96xf32>
    %97 = vector.extract_strided_slice %22 {offsets = [1, 0], sizes = [1, 96], strides = [1, 1]} : vector<8x96xf32> to vector<1x96xf32>
    %98 = vector.extract_strided_slice %27 {offsets = [1, 0], sizes = [1, 96], strides = [1, 1]} : vector<8x96xf32> to vector<1x96xf32>
    %99 = tpu.concatenate %97, %98 in 0 : vector<1x96xf32>, vector<1x96xf32> -> vector<2x96xf32>
    %cst_39 = arith.constant dense<0.000000e+00> : vector<2x96xf32>
    %100 = tpu.matmul %64, %1, %cst_39 {dimension_numbers = #tpu.dot_dimension_numbers<[1], [0], [0], [1], [0, 0, 1, 1], [], []>} : vector<2x32xf32>, vector<32x96xf32>, vector<2x96xf32> -> vector<2x96xf32>
    %101 = vector.broadcast %3 : vector<1x96xf32> to vector<2x96xf32>
    %102 = arith.addf %100, %101 : vector<2x96xf32>
    %103 = vector.extract_strided_slice %96 {offsets = [0, 0], sizes = [2, 32], strides = [1, 1]} : vector<2x96xf32> to vector<2x32xf32>
    %104 = vector.extract_strided_slice %102 {offsets = [0, 0], sizes = [2, 32], strides = [1, 1]} : vector<2x96xf32> to vector<2x32xf32>
    %105 = arith.addf %103, %104 : vector<2x32xf32>
    %106 = arith.negf %105 : vector<2x32xf32>
    %107 = math.exp %106 : vector<2x32xf32>
    %cst_40 = arith.constant 1.000000e+00 : f32
    %108 = vector.broadcast %cst_40 : f32 to vector<2x32xf32>
    %109 = arith.addf %108, %107 : vector<2x32xf32>
    %110 = arith.divf %108, %109 : vector<2x32xf32>
    %111 = vector.extract_strided_slice %96 {offsets = [0, 32], sizes = [2, 32], strides = [1, 1]} : vector<2x96xf32> to vector<2x32xf32>
    %112 = vector.extract_strided_slice %102 {offsets = [0, 32], sizes = [2, 32], strides = [1, 1]} : vector<2x96xf32> to vector<2x32xf32>
    %113 = arith.addf %111, %112 : vector<2x32xf32>
    %114 = arith.negf %113 : vector<2x32xf32>
    %115 = math.exp %114 : vector<2x32xf32>
    %cst_41 = arith.constant 1.000000e+00 : f32
    %116 = vector.broadcast %cst_41 : f32 to vector<2x32xf32>
    %117 = arith.addf %116, %115 : vector<2x32xf32>
    %118 = arith.divf %116, %117 : vector<2x32xf32>
    %119 = vector.extract_strided_slice %96 {offsets = [0, 64], sizes = [2, 32], strides = [1, 1]} : vector<2x96xf32> to vector<2x32xf32>
    %120 = vector.extract_strided_slice %102 {offsets = [0, 64], sizes = [2, 32], strides = [1, 1]} : vector<2x96xf32> to vector<2x32xf32>
    %121 = arith.mulf %110, %120 : vector<2x32xf32>
    %122 = arith.addf %119, %121 : vector<2x32xf32>
    %123 = math.tanh %122 : vector<2x32xf32>
    %cst_42 = arith.constant 1.000000e+00 : f32
    %124 = vector.broadcast %cst_42 : f32 to vector<2x32xf32>
    %125 = arith.subf %124, %118 : vector<2x32xf32>
    %126 = arith.mulf %125, %123 : vector<2x32xf32>
    %127 = arith.mulf %118, %64 : vector<2x32xf32>
    %128 = arith.addf %126, %127 : vector<2x32xf32>
    %cst_43 = arith.constant dense<0.000000e+00> : vector<2x96xf32>
    %129 = tpu.matmul %93, %5, %cst_43 {dimension_numbers = #tpu.dot_dimension_numbers<[1], [0], [0], [1], [0, 0, 1, 1], [], []>} : vector<2x32xf32>, vector<32x96xf32>, vector<2x96xf32> -> vector<2x96xf32>
    %130 = vector.broadcast %7 : vector<1x96xf32> to vector<2x96xf32>
    %131 = arith.addf %129, %130 : vector<2x96xf32>
    %132 = vector.extract_strided_slice %99 {offsets = [0, 0], sizes = [2, 32], strides = [1, 1]} : vector<2x96xf32> to vector<2x32xf32>
    %133 = vector.extract_strided_slice %131 {offsets = [0, 0], sizes = [2, 32], strides = [1, 1]} : vector<2x96xf32> to vector<2x32xf32>
    %134 = arith.addf %132, %133 : vector<2x32xf32>
    %135 = arith.negf %134 : vector<2x32xf32>
    %136 = math.exp %135 : vector<2x32xf32>
    %cst_44 = arith.constant 1.000000e+00 : f32
    %137 = vector.broadcast %cst_44 : f32 to vector<2x32xf32>
    %138 = arith.addf %137, %136 : vector<2x32xf32>
    %139 = arith.divf %137, %138 : vector<2x32xf32>
    %140 = vector.extract_strided_slice %99 {offsets = [0, 32], sizes = [2, 32], strides = [1, 1]} : vector<2x96xf32> to vector<2x32xf32>
    %141 = vector.extract_strided_slice %131 {offsets = [0, 32], sizes = [2, 32], strides = [1, 1]} : vector<2x96xf32> to vector<2x32xf32>
    %142 = arith.addf %140, %141 : vector<2x32xf32>
    %143 = arith.negf %142 : vector<2x32xf32>
    %144 = math.exp %143 : vector<2x32xf32>
    %cst_45 = arith.constant 1.000000e+00 : f32
    %145 = vector.broadcast %cst_45 : f32 to vector<2x32xf32>
    %146 = arith.addf %145, %144 : vector<2x32xf32>
    %147 = arith.divf %145, %146 : vector<2x32xf32>
    %148 = vector.extract_strided_slice %99 {offsets = [0, 64], sizes = [2, 32], strides = [1, 1]} : vector<2x96xf32> to vector<2x32xf32>
    %149 = vector.extract_strided_slice %131 {offsets = [0, 64], sizes = [2, 32], strides = [1, 1]} : vector<2x96xf32> to vector<2x32xf32>
    %150 = arith.mulf %139, %149 : vector<2x32xf32>
    %151 = arith.addf %148, %150 : vector<2x32xf32>
    %152 = math.tanh %151 : vector<2x32xf32>
    %cst_46 = arith.constant 1.000000e+00 : f32
    %153 = vector.broadcast %cst_46 : f32 to vector<2x32xf32>
    %154 = arith.subf %153, %147 : vector<2x32xf32>
    %155 = arith.mulf %154, %152 : vector<2x32xf32>
    %156 = arith.mulf %147, %93 : vector<2x32xf32>
    %157 = arith.addf %155, %156 : vector<2x32xf32>
    %158 = vector.extract_strided_slice %12 {offsets = [2, 0], sizes = [1, 96], strides = [1, 1]} : vector<8x96xf32> to vector<1x96xf32>
    %159 = vector.extract_strided_slice %17 {offsets = [2, 0], sizes = [1, 96], strides = [1, 1]} : vector<8x96xf32> to vector<1x96xf32>
    %160 = tpu.concatenate %158, %159 in 0 : vector<1x96xf32>, vector<1x96xf32> -> vector<2x96xf32>
    %161 = vector.extract_strided_slice %22 {offsets = [2, 0], sizes = [1, 96], strides = [1, 1]} : vector<8x96xf32> to vector<1x96xf32>
    %162 = vector.extract_strided_slice %27 {offsets = [2, 0], sizes = [1, 96], strides = [1, 1]} : vector<8x96xf32> to vector<1x96xf32>
    %163 = tpu.concatenate %161, %162 in 0 : vector<1x96xf32>, vector<1x96xf32> -> vector<2x96xf32>
    %cst_47 = arith.constant dense<0.000000e+00> : vector<2x96xf32>
    %164 = tpu.matmul %128, %1, %cst_47 {dimension_numbers = #tpu.dot_dimension_numbers<[1], [0], [0], [1], [0, 0, 1, 1], [], []>} : vector<2x32xf32>, vector<32x96xf32>, vector<2x96xf32> -> vector<2x96xf32>
    %165 = vector.broadcast %3 : vector<1x96xf32> to vector<2x96xf32>
    %166 = arith.addf %164, %165 : vector<2x96xf32>
    %167 = vector.extract_strided_slice %160 {offsets = [0, 0], sizes = [2, 32], strides = [1, 1]} : vector<2x96xf32> to vector<2x32xf32>
    %168 = vector.extract_strided_slice %166 {offsets = [0, 0], sizes = [2, 32], strides = [1, 1]} : vector<2x96xf32> to vector<2x32xf32>
    %169 = arith.addf %167, %168 : vector<2x32xf32>
    %170 = arith.negf %169 : vector<2x32xf32>
    %171 = math.exp %170 : vector<2x32xf32>
    %cst_48 = arith.constant 1.000000e+00 : f32
    %172 = vector.broadcast %cst_48 : f32 to vector<2x32xf32>
    %173 = arith.addf %172, %171 : vector<2x32xf32>
    %174 = arith.divf %172, %173 : vector<2x32xf32>
    %175 = vector.extract_strided_slice %160 {offsets = [0, 32], sizes = [2, 32], strides = [1, 1]} : vector<2x96xf32> to vector<2x32xf32>
    %176 = vector.extract_strided_slice %166 {offsets = [0, 32], sizes = [2, 32], strides = [1, 1]} : vector<2x96xf32> to vector<2x32xf32>
    %177 = arith.addf %175, %176 : vector<2x32xf32>
    %178 = arith.negf %177 : vector<2x32xf32>
    %179 = math.exp %178 : vector<2x32xf32>
    %cst_49 = arith.constant 1.000000e+00 : f32
    %180 = vector.broadcast %cst_49 : f32 to vector<2x32xf32>
    %181 = arith.addf %180, %179 : vector<2x32xf32>
    %182 = arith.divf %180, %181 : vector<2x32xf32>
    %183 = vector.extract_strided_slice %160 {offsets = [0, 64], sizes = [2, 32], strides = [1, 1]} : vector<2x96xf32> to vector<2x32xf32>
    %184 = vector.extract_strided_slice %166 {offsets = [0, 64], sizes = [2, 32], strides = [1, 1]} : vector<2x96xf32> to vector<2x32xf32>
    %185 = arith.mulf %174, %184 : vector<2x32xf32>
    %186 = arith.addf %183, %185 : vector<2x32xf32>
    %187 = math.tanh %186 : vector<2x32xf32>
    %cst_50 = arith.constant 1.000000e+00 : f32
    %188 = vector.broadcast %cst_50 : f32 to vector<2x32xf32>
    %189 = arith.subf %188, %182 : vector<2x32xf32>
    %190 = arith.mulf %189, %187 : vector<2x32xf32>
    %191 = arith.mulf %182, %128 : vector<2x32xf32>
    %192 = arith.addf %190, %191 : vector<2x32xf32>
    %cst_51 = arith.constant dense<0.000000e+00> : vector<2x96xf32>
    %193 = tpu.matmul %157, %5, %cst_51 {dimension_numbers = #tpu.dot_dimension_numbers<[1], [0], [0], [1], [0, 0, 1, 1], [], []>} : vector<2x32xf32>, vector<32x96xf32>, vector<2x96xf32> -> vector<2x96xf32>
    %194 = vector.broadcast %7 : vector<1x96xf32> to vector<2x96xf32>
    %195 = arith.addf %193, %194 : vector<2x96xf32>
    %196 = vector.extract_strided_slice %163 {offsets = [0, 0], sizes = [2, 32], strides = [1, 1]} : vector<2x96xf32> to vector<2x32xf32>
    %197 = vector.extract_strided_slice %195 {offsets = [0, 0], sizes = [2, 32], strides = [1, 1]} : vector<2x96xf32> to vector<2x32xf32>
    %198 = arith.addf %196, %197 : vector<2x32xf32>
    %199 = arith.negf %198 : vector<2x32xf32>
    %200 = math.exp %199 : vector<2x32xf32>
    %cst_52 = arith.constant 1.000000e+00 : f32
    %201 = vector.broadcast %cst_52 : f32 to vector<2x32xf32>
    %202 = arith.addf %201, %200 : vector<2x32xf32>
    %203 = arith.divf %201, %202 : vector<2x32xf32>
    %204 = vector.extract_strided_slice %163 {offsets = [0, 32], sizes = [2, 32], strides = [1, 1]} : vector<2x96xf32> to vector<2x32xf32>
    %205 = vector.extract_strided_slice %195 {offsets = [0, 32], sizes = [2, 32], strides = [1, 1]} : vector<2x96xf32> to vector<2x32xf32>
    %206 = arith.addf %204, %205 : vector<2x32xf32>
    %207 = arith.negf %206 : vector<2x32xf32>
    %208 = math.exp %207 : vector<2x32xf32>
    %cst_53 = arith.constant 1.000000e+00 : f32
    %209 = vector.broadcast %cst_53 : f32 to vector<2x32xf32>
    %210 = arith.addf %209, %208 : vector<2x32xf32>
    %211 = arith.divf %209, %210 : vector<2x32xf32>
    %212 = vector.extract_strided_slice %163 {offsets = [0, 64], sizes = [2, 32], strides = [1, 1]} : vector<2x96xf32> to vector<2x32xf32>
    %213 = vector.extract_strided_slice %195 {offsets = [0, 64], sizes = [2, 32], strides = [1, 1]} : vector<2x96xf32> to vector<2x32xf32>
    %214 = arith.mulf %203, %213 : vector<2x32xf32>
    %215 = arith.addf %212, %214 : vector<2x32xf32>
    %216 = math.tanh %215 : vector<2x32xf32>
    %cst_54 = arith.constant 1.000000e+00 : f32
    %217 = vector.broadcast %cst_54 : f32 to vector<2x32xf32>
    %218 = arith.subf %217, %211 : vector<2x32xf32>
    %219 = arith.mulf %218, %216 : vector<2x32xf32>
    %220 = arith.mulf %211, %157 : vector<2x32xf32>
    %221 = arith.addf %219, %220 : vector<2x32xf32>
    %222 = vector.extract_strided_slice %12 {offsets = [3, 0], sizes = [1, 96], strides = [1, 1]} : vector<8x96xf32> to vector<1x96xf32>
    %223 = vector.extract_strided_slice %17 {offsets = [3, 0], sizes = [1, 96], strides = [1, 1]} : vector<8x96xf32> to vector<1x96xf32>
    %224 = tpu.concatenate %222, %223 in 0 : vector<1x96xf32>, vector<1x96xf32> -> vector<2x96xf32>
    %225 = vector.extract_strided_slice %22 {offsets = [3, 0], sizes = [1, 96], strides = [1, 1]} : vector<8x96xf32> to vector<1x96xf32>
    %226 = vector.extract_strided_slice %27 {offsets = [3, 0], sizes = [1, 96], strides = [1, 1]} : vector<8x96xf32> to vector<1x96xf32>
    %227 = tpu.concatenate %225, %226 in 0 : vector<1x96xf32>, vector<1x96xf32> -> vector<2x96xf32>
    %cst_55 = arith.constant dense<0.000000e+00> : vector<2x96xf32>
    %228 = tpu.matmul %192, %1, %cst_55 {dimension_numbers = #tpu.dot_dimension_numbers<[1], [0], [0], [1], [0, 0, 1, 1], [], []>} : vector<2x32xf32>, vector<32x96xf32>, vector<2x96xf32> -> vector<2x96xf32>
    %229 = vector.broadcast %3 : vector<1x96xf32> to vector<2x96xf32>
    %230 = arith.addf %228, %229 : vector<2x96xf32>
    %231 = vector.extract_strided_slice %224 {offsets = [0, 0], sizes = [2, 32], strides = [1, 1]} : vector<2x96xf32> to vector<2x32xf32>
    %232 = vector.extract_strided_slice %230 {offsets = [0, 0], sizes = [2, 32], strides = [1, 1]} : vector<2x96xf32> to vector<2x32xf32>
    %233 = arith.addf %231, %232 : vector<2x32xf32>
    %234 = arith.negf %233 : vector<2x32xf32>
    %235 = math.exp %234 : vector<2x32xf32>
    %cst_56 = arith.constant 1.000000e+00 : f32
    %236 = vector.broadcast %cst_56 : f32 to vector<2x32xf32>
    %237 = arith.addf %236, %235 : vector<2x32xf32>
    %238 = arith.divf %236, %237 : vector<2x32xf32>
    %239 = vector.extract_strided_slice %224 {offsets = [0, 32], sizes = [2, 32], strides = [1, 1]} : vector<2x96xf32> to vector<2x32xf32>
    %240 = vector.extract_strided_slice %230 {offsets = [0, 32], sizes = [2, 32], strides = [1, 1]} : vector<2x96xf32> to vector<2x32xf32>
    %241 = arith.addf %239, %240 : vector<2x32xf32>
    %242 = arith.negf %241 : vector<2x32xf32>
    %243 = math.exp %242 : vector<2x32xf32>
    %cst_57 = arith.constant 1.000000e+00 : f32
    %244 = vector.broadcast %cst_57 : f32 to vector<2x32xf32>
    %245 = arith.addf %244, %243 : vector<2x32xf32>
    %246 = arith.divf %244, %245 : vector<2x32xf32>
    %247 = vector.extract_strided_slice %224 {offsets = [0, 64], sizes = [2, 32], strides = [1, 1]} : vector<2x96xf32> to vector<2x32xf32>
    %248 = vector.extract_strided_slice %230 {offsets = [0, 64], sizes = [2, 32], strides = [1, 1]} : vector<2x96xf32> to vector<2x32xf32>
    %249 = arith.mulf %238, %248 : vector<2x32xf32>
    %250 = arith.addf %247, %249 : vector<2x32xf32>
    %251 = math.tanh %250 : vector<2x32xf32>
    %cst_58 = arith.constant 1.000000e+00 : f32
    %252 = vector.broadcast %cst_58 : f32 to vector<2x32xf32>
    %253 = arith.subf %252, %246 : vector<2x32xf32>
    %254 = arith.mulf %253, %251 : vector<2x32xf32>
    %255 = arith.mulf %246, %192 : vector<2x32xf32>
    %256 = arith.addf %254, %255 : vector<2x32xf32>
    %cst_59 = arith.constant dense<0.000000e+00> : vector<2x96xf32>
    %257 = tpu.matmul %221, %5, %cst_59 {dimension_numbers = #tpu.dot_dimension_numbers<[1], [0], [0], [1], [0, 0, 1, 1], [], []>} : vector<2x32xf32>, vector<32x96xf32>, vector<2x96xf32> -> vector<2x96xf32>
    %258 = vector.broadcast %7 : vector<1x96xf32> to vector<2x96xf32>
    %259 = arith.addf %257, %258 : vector<2x96xf32>
    %260 = vector.extract_strided_slice %227 {offsets = [0, 0], sizes = [2, 32], strides = [1, 1]} : vector<2x96xf32> to vector<2x32xf32>
    %261 = vector.extract_strided_slice %259 {offsets = [0, 0], sizes = [2, 32], strides = [1, 1]} : vector<2x96xf32> to vector<2x32xf32>
    %262 = arith.addf %260, %261 : vector<2x32xf32>
    %263 = arith.negf %262 : vector<2x32xf32>
    %264 = math.exp %263 : vector<2x32xf32>
    %cst_60 = arith.constant 1.000000e+00 : f32
    %265 = vector.broadcast %cst_60 : f32 to vector<2x32xf32>
    %266 = arith.addf %265, %264 : vector<2x32xf32>
    %267 = arith.divf %265, %266 : vector<2x32xf32>
    %268 = vector.extract_strided_slice %227 {offsets = [0, 32], sizes = [2, 32], strides = [1, 1]} : vector<2x96xf32> to vector<2x32xf32>
    %269 = vector.extract_strided_slice %259 {offsets = [0, 32], sizes = [2, 32], strides = [1, 1]} : vector<2x96xf32> to vector<2x32xf32>
    %270 = arith.addf %268, %269 : vector<2x32xf32>
    %271 = arith.negf %270 : vector<2x32xf32>
    %272 = math.exp %271 : vector<2x32xf32>
    %cst_61 = arith.constant 1.000000e+00 : f32
    %273 = vector.broadcast %cst_61 : f32 to vector<2x32xf32>
    %274 = arith.addf %273, %272 : vector<2x32xf32>
    %275 = arith.divf %273, %274 : vector<2x32xf32>
    %276 = vector.extract_strided_slice %227 {offsets = [0, 64], sizes = [2, 32], strides = [1, 1]} : vector<2x96xf32> to vector<2x32xf32>
    %277 = vector.extract_strided_slice %259 {offsets = [0, 64], sizes = [2, 32], strides = [1, 1]} : vector<2x96xf32> to vector<2x32xf32>
    %278 = arith.mulf %267, %277 : vector<2x32xf32>
    %279 = arith.addf %276, %278 : vector<2x32xf32>
    %280 = math.tanh %279 : vector<2x32xf32>
    %cst_62 = arith.constant 1.000000e+00 : f32
    %281 = vector.broadcast %cst_62 : f32 to vector<2x32xf32>
    %282 = arith.subf %281, %275 : vector<2x32xf32>
    %283 = arith.mulf %282, %280 : vector<2x32xf32>
    %284 = arith.mulf %275, %221 : vector<2x32xf32>
    %285 = arith.addf %283, %284 : vector<2x32xf32>
    %286 = vector.extract_strided_slice %12 {offsets = [4, 0], sizes = [1, 96], strides = [1, 1]} : vector<8x96xf32> to vector<1x96xf32>
    %287 = vector.extract_strided_slice %17 {offsets = [4, 0], sizes = [1, 96], strides = [1, 1]} : vector<8x96xf32> to vector<1x96xf32>
    %288 = tpu.concatenate %286, %287 in 0 : vector<1x96xf32>, vector<1x96xf32> -> vector<2x96xf32>
    %289 = vector.extract_strided_slice %22 {offsets = [4, 0], sizes = [1, 96], strides = [1, 1]} : vector<8x96xf32> to vector<1x96xf32>
    %290 = vector.extract_strided_slice %27 {offsets = [4, 0], sizes = [1, 96], strides = [1, 1]} : vector<8x96xf32> to vector<1x96xf32>
    %291 = tpu.concatenate %289, %290 in 0 : vector<1x96xf32>, vector<1x96xf32> -> vector<2x96xf32>
    %cst_63 = arith.constant dense<0.000000e+00> : vector<2x96xf32>
    %292 = tpu.matmul %256, %1, %cst_63 {dimension_numbers = #tpu.dot_dimension_numbers<[1], [0], [0], [1], [0, 0, 1, 1], [], []>} : vector<2x32xf32>, vector<32x96xf32>, vector<2x96xf32> -> vector<2x96xf32>
    %293 = vector.broadcast %3 : vector<1x96xf32> to vector<2x96xf32>
    %294 = arith.addf %292, %293 : vector<2x96xf32>
    %295 = vector.extract_strided_slice %288 {offsets = [0, 0], sizes = [2, 32], strides = [1, 1]} : vector<2x96xf32> to vector<2x32xf32>
    %296 = vector.extract_strided_slice %294 {offsets = [0, 0], sizes = [2, 32], strides = [1, 1]} : vector<2x96xf32> to vector<2x32xf32>
    %297 = arith.addf %295, %296 : vector<2x32xf32>
    %298 = arith.negf %297 : vector<2x32xf32>
    %299 = math.exp %298 : vector<2x32xf32>
    %cst_64 = arith.constant 1.000000e+00 : f32
    %300 = vector.broadcast %cst_64 : f32 to vector<2x32xf32>
    %301 = arith.addf %300, %299 : vector<2x32xf32>
    %302 = arith.divf %300, %301 : vector<2x32xf32>
    %303 = vector.extract_strided_slice %288 {offsets = [0, 32], sizes = [2, 32], strides = [1, 1]} : vector<2x96xf32> to vector<2x32xf32>
    %304 = vector.extract_strided_slice %294 {offsets = [0, 32], sizes = [2, 32], strides = [1, 1]} : vector<2x96xf32> to vector<2x32xf32>
    %305 = arith.addf %303, %304 : vector<2x32xf32>
    %306 = arith.negf %305 : vector<2x32xf32>
    %307 = math.exp %306 : vector<2x32xf32>
    %cst_65 = arith.constant 1.000000e+00 : f32
    %308 = vector.broadcast %cst_65 : f32 to vector<2x32xf32>
    %309 = arith.addf %308, %307 : vector<2x32xf32>
    %310 = arith.divf %308, %309 : vector<2x32xf32>
    %311 = vector.extract_strided_slice %288 {offsets = [0, 64], sizes = [2, 32], strides = [1, 1]} : vector<2x96xf32> to vector<2x32xf32>
    %312 = vector.extract_strided_slice %294 {offsets = [0, 64], sizes = [2, 32], strides = [1, 1]} : vector<2x96xf32> to vector<2x32xf32>
    %313 = arith.mulf %302, %312 : vector<2x32xf32>
    %314 = arith.addf %311, %313 : vector<2x32xf32>
    %315 = math.tanh %314 : vector<2x32xf32>
    %cst_66 = arith.constant 1.000000e+00 : f32
    %316 = vector.broadcast %cst_66 : f32 to vector<2x32xf32>
    %317 = arith.subf %316, %310 : vector<2x32xf32>
    %318 = arith.mulf %317, %315 : vector<2x32xf32>
    %319 = arith.mulf %310, %256 : vector<2x32xf32>
    %320 = arith.addf %318, %319 : vector<2x32xf32>
    %cst_67 = arith.constant dense<0.000000e+00> : vector<2x96xf32>
    %321 = tpu.matmul %285, %5, %cst_67 {dimension_numbers = #tpu.dot_dimension_numbers<[1], [0], [0], [1], [0, 0, 1, 1], [], []>} : vector<2x32xf32>, vector<32x96xf32>, vector<2x96xf32> -> vector<2x96xf32>
    %322 = vector.broadcast %7 : vector<1x96xf32> to vector<2x96xf32>
    %323 = arith.addf %321, %322 : vector<2x96xf32>
    %324 = vector.extract_strided_slice %291 {offsets = [0, 0], sizes = [2, 32], strides = [1, 1]} : vector<2x96xf32> to vector<2x32xf32>
    %325 = vector.extract_strided_slice %323 {offsets = [0, 0], sizes = [2, 32], strides = [1, 1]} : vector<2x96xf32> to vector<2x32xf32>
    %326 = arith.addf %324, %325 : vector<2x32xf32>
    %327 = arith.negf %326 : vector<2x32xf32>
    %328 = math.exp %327 : vector<2x32xf32>
    %cst_68 = arith.constant 1.000000e+00 : f32
    %329 = vector.broadcast %cst_68 : f32 to vector<2x32xf32>
    %330 = arith.addf %329, %328 : vector<2x32xf32>
    %331 = arith.divf %329, %330 : vector<2x32xf32>
    %332 = vector.extract_strided_slice %291 {offsets = [0, 32], sizes = [2, 32], strides = [1, 1]} : vector<2x96xf32> to vector<2x32xf32>
    %333 = vector.extract_strided_slice %323 {offsets = [0, 32], sizes = [2, 32], strides = [1, 1]} : vector<2x96xf32> to vector<2x32xf32>
    %334 = arith.addf %332, %333 : vector<2x32xf32>
    %335 = arith.negf %334 : vector<2x32xf32>
    %336 = math.exp %335 : vector<2x32xf32>
    %cst_69 = arith.constant 1.000000e+00 : f32
    %337 = vector.broadcast %cst_69 : f32 to vector<2x32xf32>
    %338 = arith.addf %337, %336 : vector<2x32xf32>
    %339 = arith.divf %337, %338 : vector<2x32xf32>
    %340 = vector.extract_strided_slice %291 {offsets = [0, 64], sizes = [2, 32], strides = [1, 1]} : vector<2x96xf32> to vector<2x32xf32>
    %341 = vector.extract_strided_slice %323 {offsets = [0, 64], sizes = [2, 32], strides = [1, 1]} : vector<2x96xf32> to vector<2x32xf32>
    %342 = arith.mulf %331, %341 : vector<2x32xf32>
    %343 = arith.addf %340, %342 : vector<2x32xf32>
    %344 = math.tanh %343 : vector<2x32xf32>
    %cst_70 = arith.constant 1.000000e+00 : f32
    %345 = vector.broadcast %cst_70 : f32 to vector<2x32xf32>
    %346 = arith.subf %345, %339 : vector<2x32xf32>
    %347 = arith.mulf %346, %344 : vector<2x32xf32>
    %348 = arith.mulf %339, %285 : vector<2x32xf32>
    %349 = arith.addf %347, %348 : vector<2x32xf32>
    %350 = vector.extract_strided_slice %12 {offsets = [5, 0], sizes = [1, 96], strides = [1, 1]} : vector<8x96xf32> to vector<1x96xf32>
    %351 = vector.extract_strided_slice %17 {offsets = [5, 0], sizes = [1, 96], strides = [1, 1]} : vector<8x96xf32> to vector<1x96xf32>
    %352 = tpu.concatenate %350, %351 in 0 : vector<1x96xf32>, vector<1x96xf32> -> vector<2x96xf32>
    %353 = vector.extract_strided_slice %22 {offsets = [5, 0], sizes = [1, 96], strides = [1, 1]} : vector<8x96xf32> to vector<1x96xf32>
    %354 = vector.extract_strided_slice %27 {offsets = [5, 0], sizes = [1, 96], strides = [1, 1]} : vector<8x96xf32> to vector<1x96xf32>
    %355 = tpu.concatenate %353, %354 in 0 : vector<1x96xf32>, vector<1x96xf32> -> vector<2x96xf32>
    %cst_71 = arith.constant dense<0.000000e+00> : vector<2x96xf32>
    %356 = tpu.matmul %320, %1, %cst_71 {dimension_numbers = #tpu.dot_dimension_numbers<[1], [0], [0], [1], [0, 0, 1, 1], [], []>} : vector<2x32xf32>, vector<32x96xf32>, vector<2x96xf32> -> vector<2x96xf32>
    %357 = vector.broadcast %3 : vector<1x96xf32> to vector<2x96xf32>
    %358 = arith.addf %356, %357 : vector<2x96xf32>
    %359 = vector.extract_strided_slice %352 {offsets = [0, 0], sizes = [2, 32], strides = [1, 1]} : vector<2x96xf32> to vector<2x32xf32>
    %360 = vector.extract_strided_slice %358 {offsets = [0, 0], sizes = [2, 32], strides = [1, 1]} : vector<2x96xf32> to vector<2x32xf32>
    %361 = arith.addf %359, %360 : vector<2x32xf32>
    %362 = arith.negf %361 : vector<2x32xf32>
    %363 = math.exp %362 : vector<2x32xf32>
    %cst_72 = arith.constant 1.000000e+00 : f32
    %364 = vector.broadcast %cst_72 : f32 to vector<2x32xf32>
    %365 = arith.addf %364, %363 : vector<2x32xf32>
    %366 = arith.divf %364, %365 : vector<2x32xf32>
    %367 = vector.extract_strided_slice %352 {offsets = [0, 32], sizes = [2, 32], strides = [1, 1]} : vector<2x96xf32> to vector<2x32xf32>
    %368 = vector.extract_strided_slice %358 {offsets = [0, 32], sizes = [2, 32], strides = [1, 1]} : vector<2x96xf32> to vector<2x32xf32>
    %369 = arith.addf %367, %368 : vector<2x32xf32>
    %370 = arith.negf %369 : vector<2x32xf32>
    %371 = math.exp %370 : vector<2x32xf32>
    %cst_73 = arith.constant 1.000000e+00 : f32
    %372 = vector.broadcast %cst_73 : f32 to vector<2x32xf32>
    %373 = arith.addf %372, %371 : vector<2x32xf32>
    %374 = arith.divf %372, %373 : vector<2x32xf32>
    %375 = vector.extract_strided_slice %352 {offsets = [0, 64], sizes = [2, 32], strides = [1, 1]} : vector<2x96xf32> to vector<2x32xf32>
    %376 = vector.extract_strided_slice %358 {offsets = [0, 64], sizes = [2, 32], strides = [1, 1]} : vector<2x96xf32> to vector<2x32xf32>
    %377 = arith.mulf %366, %376 : vector<2x32xf32>
    %378 = arith.addf %375, %377 : vector<2x32xf32>
    %379 = math.tanh %378 : vector<2x32xf32>
    %cst_74 = arith.constant 1.000000e+00 : f32
    %380 = vector.broadcast %cst_74 : f32 to vector<2x32xf32>
    %381 = arith.subf %380, %374 : vector<2x32xf32>
    %382 = arith.mulf %381, %379 : vector<2x32xf32>
    %383 = arith.mulf %374, %320 : vector<2x32xf32>
    %384 = arith.addf %382, %383 : vector<2x32xf32>
    %cst_75 = arith.constant dense<0.000000e+00> : vector<2x96xf32>
    %385 = tpu.matmul %349, %5, %cst_75 {dimension_numbers = #tpu.dot_dimension_numbers<[1], [0], [0], [1], [0, 0, 1, 1], [], []>} : vector<2x32xf32>, vector<32x96xf32>, vector<2x96xf32> -> vector<2x96xf32>
    %386 = vector.broadcast %7 : vector<1x96xf32> to vector<2x96xf32>
    %387 = arith.addf %385, %386 : vector<2x96xf32>
    %388 = vector.extract_strided_slice %355 {offsets = [0, 0], sizes = [2, 32], strides = [1, 1]} : vector<2x96xf32> to vector<2x32xf32>
    %389 = vector.extract_strided_slice %387 {offsets = [0, 0], sizes = [2, 32], strides = [1, 1]} : vector<2x96xf32> to vector<2x32xf32>
    %390 = arith.addf %388, %389 : vector<2x32xf32>
    %391 = arith.negf %390 : vector<2x32xf32>
    %392 = math.exp %391 : vector<2x32xf32>
    %cst_76 = arith.constant 1.000000e+00 : f32
    %393 = vector.broadcast %cst_76 : f32 to vector<2x32xf32>
    %394 = arith.addf %393, %392 : vector<2x32xf32>
    %395 = arith.divf %393, %394 : vector<2x32xf32>
    %396 = vector.extract_strided_slice %355 {offsets = [0, 32], sizes = [2, 32], strides = [1, 1]} : vector<2x96xf32> to vector<2x32xf32>
    %397 = vector.extract_strided_slice %387 {offsets = [0, 32], sizes = [2, 32], strides = [1, 1]} : vector<2x96xf32> to vector<2x32xf32>
    %398 = arith.addf %396, %397 : vector<2x32xf32>
    %399 = arith.negf %398 : vector<2x32xf32>
    %400 = math.exp %399 : vector<2x32xf32>
    %cst_77 = arith.constant 1.000000e+00 : f32
    %401 = vector.broadcast %cst_77 : f32 to vector<2x32xf32>
    %402 = arith.addf %401, %400 : vector<2x32xf32>
    %403 = arith.divf %401, %402 : vector<2x32xf32>
    %404 = vector.extract_strided_slice %355 {offsets = [0, 64], sizes = [2, 32], strides = [1, 1]} : vector<2x96xf32> to vector<2x32xf32>
    %405 = vector.extract_strided_slice %387 {offsets = [0, 64], sizes = [2, 32], strides = [1, 1]} : vector<2x96xf32> to vector<2x32xf32>
    %406 = arith.mulf %395, %405 : vector<2x32xf32>
    %407 = arith.addf %404, %406 : vector<2x32xf32>
    %408 = math.tanh %407 : vector<2x32xf32>
    %cst_78 = arith.constant 1.000000e+00 : f32
    %409 = vector.broadcast %cst_78 : f32 to vector<2x32xf32>
    %410 = arith.subf %409, %403 : vector<2x32xf32>
    %411 = arith.mulf %410, %408 : vector<2x32xf32>
    %412 = arith.mulf %403, %349 : vector<2x32xf32>
    %413 = arith.addf %411, %412 : vector<2x32xf32>
    %414 = vector.extract_strided_slice %12 {offsets = [6, 0], sizes = [1, 96], strides = [1, 1]} : vector<8x96xf32> to vector<1x96xf32>
    %415 = vector.extract_strided_slice %17 {offsets = [6, 0], sizes = [1, 96], strides = [1, 1]} : vector<8x96xf32> to vector<1x96xf32>
    %416 = tpu.concatenate %414, %415 in 0 : vector<1x96xf32>, vector<1x96xf32> -> vector<2x96xf32>
    %417 = vector.extract_strided_slice %22 {offsets = [6, 0], sizes = [1, 96], strides = [1, 1]} : vector<8x96xf32> to vector<1x96xf32>
    %418 = vector.extract_strided_slice %27 {offsets = [6, 0], sizes = [1, 96], strides = [1, 1]} : vector<8x96xf32> to vector<1x96xf32>
    %419 = tpu.concatenate %417, %418 in 0 : vector<1x96xf32>, vector<1x96xf32> -> vector<2x96xf32>
    %cst_79 = arith.constant dense<0.000000e+00> : vector<2x96xf32>
    %420 = tpu.matmul %384, %1, %cst_79 {dimension_numbers = #tpu.dot_dimension_numbers<[1], [0], [0], [1], [0, 0, 1, 1], [], []>} : vector<2x32xf32>, vector<32x96xf32>, vector<2x96xf32> -> vector<2x96xf32>
    %421 = vector.broadcast %3 : vector<1x96xf32> to vector<2x96xf32>
    %422 = arith.addf %420, %421 : vector<2x96xf32>
    %423 = vector.extract_strided_slice %416 {offsets = [0, 0], sizes = [2, 32], strides = [1, 1]} : vector<2x96xf32> to vector<2x32xf32>
    %424 = vector.extract_strided_slice %422 {offsets = [0, 0], sizes = [2, 32], strides = [1, 1]} : vector<2x96xf32> to vector<2x32xf32>
    %425 = arith.addf %423, %424 : vector<2x32xf32>
    %426 = arith.negf %425 : vector<2x32xf32>
    %427 = math.exp %426 : vector<2x32xf32>
    %cst_80 = arith.constant 1.000000e+00 : f32
    %428 = vector.broadcast %cst_80 : f32 to vector<2x32xf32>
    %429 = arith.addf %428, %427 : vector<2x32xf32>
    %430 = arith.divf %428, %429 : vector<2x32xf32>
    %431 = vector.extract_strided_slice %416 {offsets = [0, 32], sizes = [2, 32], strides = [1, 1]} : vector<2x96xf32> to vector<2x32xf32>
    %432 = vector.extract_strided_slice %422 {offsets = [0, 32], sizes = [2, 32], strides = [1, 1]} : vector<2x96xf32> to vector<2x32xf32>
    %433 = arith.addf %431, %432 : vector<2x32xf32>
    %434 = arith.negf %433 : vector<2x32xf32>
    %435 = math.exp %434 : vector<2x32xf32>
    %cst_81 = arith.constant 1.000000e+00 : f32
    %436 = vector.broadcast %cst_81 : f32 to vector<2x32xf32>
    %437 = arith.addf %436, %435 : vector<2x32xf32>
    %438 = arith.divf %436, %437 : vector<2x32xf32>
    %439 = vector.extract_strided_slice %416 {offsets = [0, 64], sizes = [2, 32], strides = [1, 1]} : vector<2x96xf32> to vector<2x32xf32>
    %440 = vector.extract_strided_slice %422 {offsets = [0, 64], sizes = [2, 32], strides = [1, 1]} : vector<2x96xf32> to vector<2x32xf32>
    %441 = arith.mulf %430, %440 : vector<2x32xf32>
    %442 = arith.addf %439, %441 : vector<2x32xf32>
    %443 = math.tanh %442 : vector<2x32xf32>
    %cst_82 = arith.constant 1.000000e+00 : f32
    %444 = vector.broadcast %cst_82 : f32 to vector<2x32xf32>
    %445 = arith.subf %444, %438 : vector<2x32xf32>
    %446 = arith.mulf %445, %443 : vector<2x32xf32>
    %447 = arith.mulf %438, %384 : vector<2x32xf32>
    %448 = arith.addf %446, %447 : vector<2x32xf32>
    %cst_83 = arith.constant dense<0.000000e+00> : vector<2x96xf32>
    %449 = tpu.matmul %413, %5, %cst_83 {dimension_numbers = #tpu.dot_dimension_numbers<[1], [0], [0], [1], [0, 0, 1, 1], [], []>} : vector<2x32xf32>, vector<32x96xf32>, vector<2x96xf32> -> vector<2x96xf32>
    %450 = vector.broadcast %7 : vector<1x96xf32> to vector<2x96xf32>
    %451 = arith.addf %449, %450 : vector<2x96xf32>
    %452 = vector.extract_strided_slice %419 {offsets = [0, 0], sizes = [2, 32], strides = [1, 1]} : vector<2x96xf32> to vector<2x32xf32>
    %453 = vector.extract_strided_slice %451 {offsets = [0, 0], sizes = [2, 32], strides = [1, 1]} : vector<2x96xf32> to vector<2x32xf32>
    %454 = arith.addf %452, %453 : vector<2x32xf32>
    %455 = arith.negf %454 : vector<2x32xf32>
    %456 = math.exp %455 : vector<2x32xf32>
    %cst_84 = arith.constant 1.000000e+00 : f32
    %457 = vector.broadcast %cst_84 : f32 to vector<2x32xf32>
    %458 = arith.addf %457, %456 : vector<2x32xf32>
    %459 = arith.divf %457, %458 : vector<2x32xf32>
    %460 = vector.extract_strided_slice %419 {offsets = [0, 32], sizes = [2, 32], strides = [1, 1]} : vector<2x96xf32> to vector<2x32xf32>
    %461 = vector.extract_strided_slice %451 {offsets = [0, 32], sizes = [2, 32], strides = [1, 1]} : vector<2x96xf32> to vector<2x32xf32>
    %462 = arith.addf %460, %461 : vector<2x32xf32>
    %463 = arith.negf %462 : vector<2x32xf32>
    %464 = math.exp %463 : vector<2x32xf32>
    %cst_85 = arith.constant 1.000000e+00 : f32
    %465 = vector.broadcast %cst_85 : f32 to vector<2x32xf32>
    %466 = arith.addf %465, %464 : vector<2x32xf32>
    %467 = arith.divf %465, %466 : vector<2x32xf32>
    %468 = vector.extract_strided_slice %419 {offsets = [0, 64], sizes = [2, 32], strides = [1, 1]} : vector<2x96xf32> to vector<2x32xf32>
    %469 = vector.extract_strided_slice %451 {offsets = [0, 64], sizes = [2, 32], strides = [1, 1]} : vector<2x96xf32> to vector<2x32xf32>
    %470 = arith.mulf %459, %469 : vector<2x32xf32>
    %471 = arith.addf %468, %470 : vector<2x32xf32>
    %472 = math.tanh %471 : vector<2x32xf32>
    %cst_86 = arith.constant 1.000000e+00 : f32
    %473 = vector.broadcast %cst_86 : f32 to vector<2x32xf32>
    %474 = arith.subf %473, %467 : vector<2x32xf32>
    %475 = arith.mulf %474, %472 : vector<2x32xf32>
    %476 = arith.mulf %467, %413 : vector<2x32xf32>
    %477 = arith.addf %475, %476 : vector<2x32xf32>
    %478 = vector.extract_strided_slice %12 {offsets = [7, 0], sizes = [1, 96], strides = [1, 1]} : vector<8x96xf32> to vector<1x96xf32>
    %479 = vector.extract_strided_slice %17 {offsets = [7, 0], sizes = [1, 96], strides = [1, 1]} : vector<8x96xf32> to vector<1x96xf32>
    %480 = tpu.concatenate %478, %479 in 0 : vector<1x96xf32>, vector<1x96xf32> -> vector<2x96xf32>
    %481 = vector.extract_strided_slice %22 {offsets = [7, 0], sizes = [1, 96], strides = [1, 1]} : vector<8x96xf32> to vector<1x96xf32>
    %482 = vector.extract_strided_slice %27 {offsets = [7, 0], sizes = [1, 96], strides = [1, 1]} : vector<8x96xf32> to vector<1x96xf32>
    %483 = tpu.concatenate %481, %482 in 0 : vector<1x96xf32>, vector<1x96xf32> -> vector<2x96xf32>
    %cst_87 = arith.constant dense<0.000000e+00> : vector<2x96xf32>
    %484 = tpu.matmul %448, %1, %cst_87 {dimension_numbers = #tpu.dot_dimension_numbers<[1], [0], [0], [1], [0, 0, 1, 1], [], []>} : vector<2x32xf32>, vector<32x96xf32>, vector<2x96xf32> -> vector<2x96xf32>
    %485 = vector.broadcast %3 : vector<1x96xf32> to vector<2x96xf32>
    %486 = arith.addf %484, %485 : vector<2x96xf32>
    %487 = vector.extract_strided_slice %480 {offsets = [0, 0], sizes = [2, 32], strides = [1, 1]} : vector<2x96xf32> to vector<2x32xf32>
    %488 = vector.extract_strided_slice %486 {offsets = [0, 0], sizes = [2, 32], strides = [1, 1]} : vector<2x96xf32> to vector<2x32xf32>
    %489 = arith.addf %487, %488 : vector<2x32xf32>
    %490 = arith.negf %489 : vector<2x32xf32>
    %491 = math.exp %490 : vector<2x32xf32>
    %cst_88 = arith.constant 1.000000e+00 : f32
    %492 = vector.broadcast %cst_88 : f32 to vector<2x32xf32>
    %493 = arith.addf %492, %491 : vector<2x32xf32>
    %494 = arith.divf %492, %493 : vector<2x32xf32>
    %495 = vector.extract_strided_slice %480 {offsets = [0, 32], sizes = [2, 32], strides = [1, 1]} : vector<2x96xf32> to vector<2x32xf32>
    %496 = vector.extract_strided_slice %486 {offsets = [0, 32], sizes = [2, 32], strides = [1, 1]} : vector<2x96xf32> to vector<2x32xf32>
    %497 = arith.addf %495, %496 : vector<2x32xf32>
    %498 = arith.negf %497 : vector<2x32xf32>
    %499 = math.exp %498 : vector<2x32xf32>
    %cst_89 = arith.constant 1.000000e+00 : f32
    %500 = vector.broadcast %cst_89 : f32 to vector<2x32xf32>
    %501 = arith.addf %500, %499 : vector<2x32xf32>
    %502 = arith.divf %500, %501 : vector<2x32xf32>
    %503 = vector.extract_strided_slice %480 {offsets = [0, 64], sizes = [2, 32], strides = [1, 1]} : vector<2x96xf32> to vector<2x32xf32>
    %504 = vector.extract_strided_slice %486 {offsets = [0, 64], sizes = [2, 32], strides = [1, 1]} : vector<2x96xf32> to vector<2x32xf32>
    %505 = arith.mulf %494, %504 : vector<2x32xf32>
    %506 = arith.addf %503, %505 : vector<2x32xf32>
    %507 = math.tanh %506 : vector<2x32xf32>
    %cst_90 = arith.constant 1.000000e+00 : f32
    %508 = vector.broadcast %cst_90 : f32 to vector<2x32xf32>
    %509 = arith.subf %508, %502 : vector<2x32xf32>
    %510 = arith.mulf %509, %507 : vector<2x32xf32>
    %511 = arith.mulf %502, %448 : vector<2x32xf32>
    %512 = arith.addf %510, %511 : vector<2x32xf32>
    %cst_91 = arith.constant dense<0.000000e+00> : vector<2x96xf32>
    %513 = tpu.matmul %477, %5, %cst_91 {dimension_numbers = #tpu.dot_dimension_numbers<[1], [0], [0], [1], [0, 0, 1, 1], [], []>} : vector<2x32xf32>, vector<32x96xf32>, vector<2x96xf32> -> vector<2x96xf32>
    %514 = vector.broadcast %7 : vector<1x96xf32> to vector<2x96xf32>
    %515 = arith.addf %513, %514 : vector<2x96xf32>
    %516 = vector.extract_strided_slice %483 {offsets = [0, 0], sizes = [2, 32], strides = [1, 1]} : vector<2x96xf32> to vector<2x32xf32>
    %517 = vector.extract_strided_slice %515 {offsets = [0, 0], sizes = [2, 32], strides = [1, 1]} : vector<2x96xf32> to vector<2x32xf32>
    %518 = arith.addf %516, %517 : vector<2x32xf32>
    %519 = arith.negf %518 : vector<2x32xf32>
    %520 = math.exp %519 : vector<2x32xf32>
    %cst_92 = arith.constant 1.000000e+00 : f32
    %521 = vector.broadcast %cst_92 : f32 to vector<2x32xf32>
    %522 = arith.addf %521, %520 : vector<2x32xf32>
    %523 = arith.divf %521, %522 : vector<2x32xf32>
    %524 = vector.extract_strided_slice %483 {offsets = [0, 32], sizes = [2, 32], strides = [1, 1]} : vector<2x96xf32> to vector<2x32xf32>
    %525 = vector.extract_strided_slice %515 {offsets = [0, 32], sizes = [2, 32], strides = [1, 1]} : vector<2x96xf32> to vector<2x32xf32>
    %526 = arith.addf %524, %525 : vector<2x32xf32>
    %527 = arith.negf %526 : vector<2x32xf32>
    %528 = math.exp %527 : vector<2x32xf32>
    %cst_93 = arith.constant 1.000000e+00 : f32
    %529 = vector.broadcast %cst_93 : f32 to vector<2x32xf32>
    %530 = arith.addf %529, %528 : vector<2x32xf32>
    %531 = arith.divf %529, %530 : vector<2x32xf32>
    %532 = vector.extract_strided_slice %483 {offsets = [0, 64], sizes = [2, 32], strides = [1, 1]} : vector<2x96xf32> to vector<2x32xf32>
    %533 = vector.extract_strided_slice %515 {offsets = [0, 64], sizes = [2, 32], strides = [1, 1]} : vector<2x96xf32> to vector<2x32xf32>
    %534 = arith.mulf %523, %533 : vector<2x32xf32>
    %535 = arith.addf %532, %534 : vector<2x32xf32>
    %536 = math.tanh %535 : vector<2x32xf32>
    %cst_94 = arith.constant 1.000000e+00 : f32
    %537 = vector.broadcast %cst_94 : f32 to vector<2x32xf32>
    %538 = arith.subf %537, %531 : vector<2x32xf32>
    %539 = arith.mulf %538, %536 : vector<2x32xf32>
    %540 = arith.mulf %531, %477 : vector<2x32xf32>
    %541 = arith.addf %539, %540 : vector<2x32xf32>
    %c0_95 = arith.constant 0 : index
    %c0_96 = arith.constant 0 : index
    %542 = vector.load %arg7[%c0_95, %c0_96] : memref<32x8xf32, #tpu.memory_space<vmem>>, vector<32x8xf32>
    %cst_97 = arith.constant dense<0.000000e+00> : vector<2x8xf32>
    %543 = tpu.matmul %512, %542, %cst_97 {dimension_numbers = #tpu.dot_dimension_numbers<[1], [0], [0], [1], [0, 0, 1, 1], [], []>} : vector<2x32xf32>, vector<32x8xf32>, vector<2x8xf32> -> vector<2x8xf32>
    %c0_98 = arith.constant 0 : index
    %c0_99 = arith.constant 0 : index
    %544 = vector.load %arg8[%c0_98, %c0_99] : memref<32x8xf32, #tpu.memory_space<vmem>>, vector<32x8xf32>
    %cst_100 = arith.constant dense<0.000000e+00> : vector<2x8xf32>
    %545 = tpu.matmul %512, %544, %cst_100 {dimension_numbers = #tpu.dot_dimension_numbers<[1], [0], [0], [1], [0, 0, 1, 1], [], []>} : vector<2x32xf32>, vector<32x8xf32>, vector<2x8xf32> -> vector<2x8xf32>
    %c0_101 = arith.constant 0 : index
    %c0_102 = arith.constant 0 : index
    %546 = vector.load %arg9[%c0_101, %c0_102] : memref<1x8xf32, #tpu.memory_space<vmem>>, vector<1x8xf32>
    %547 = vector.broadcast %546 : vector<1x8xf32> to vector<2x8xf32>
    %548 = arith.addf %545, %547 : vector<2x8xf32>
    %c0_103 = arith.constant 0 : index
    %c0_104 = arith.constant 0 : index
    %549 = vector.load %arg23[%c0_103, %c0_104] : memref<2x8xf32, #tpu.memory_space<vmem>>, vector<2x8xf32>
    tpu.vector_store %arg23[%c0_103, %c0_104], %543 {strides = array<i32>} : memref<2x8xf32, #tpu.memory_space<vmem>>, vector<2x8xf32>,
    %c0_105 = arith.constant 0 : index
    %c0_106 = arith.constant 0 : index
    %550 = vector.load %arg24[%c0_105, %c0_106] : memref<2x8xf32, #tpu.memory_space<vmem>>, vector<2x8xf32>
    tpu.vector_store %arg24[%c0_105, %c0_106], %548 {strides = array<i32>} : memref<2x8xf32, #tpu.memory_space<vmem>>, vector<2x8xf32>,
    %c0_107 = arith.constant 0 : index
    %c0_108 = arith.constant 0 : index
    %551 = vector.load %arg2[%c0_107, %c0_108] : memref<2x8xf32, #tpu.memory_space<vmem>>, vector<2x8xf32>
    %552 = math.exp %548 : vector<2x8xf32>
    %553 = arith.mulf %551, %552 : vector<2x8xf32>
    %554 = arith.addf %543, %553 : vector<2x8xf32>
    %c0_109 = arith.constant 0 : index
    %c0_110 = arith.constant 0 : index
    %555 = vector.load %arg10[%c0_109, %c0_110] : memref<8x32xf32, #tpu.memory_space<vmem>>, vector<8x32xf32>
    %cst_111 = arith.constant dense<0.000000e+00> : vector<2x32xf32>
    %556 = tpu.matmul %554, %555, %cst_111 {dimension_numbers = #tpu.dot_dimension_numbers<[1], [0], [0], [1], [0, 0, 1, 1], [], []>} : vector<2x8xf32>, vector<8x32xf32>, vector<2x32xf32> -> vector<2x32xf32>
    %c0_112 = arith.constant 0 : index
    %c0_113 = arith.constant 0 : index
    %557 = vector.load %arg11[%c0_112, %c0_113] : memref<1x32xf32, #tpu.memory_space<vmem>>, vector<1x32xf32>
    %558 = vector.broadcast %557 : vector<1x32xf32> to vector<2x32xf32>
    %559 = arith.addf %556, %558 : vector<2x32xf32>
    %560 = math.tanh %559 : vector<2x32xf32>
    %c0_114 = arith.constant 0 : index
    %c0_115 = arith.constant 0 : index
    %561 = vector.load %arg12[%c0_114, %c0_115] : memref<32x16xf32, #tpu.memory_space<vmem>>, vector<32x16xf32>
    %cst_116 = arith.constant dense<0.000000e+00> : vector<2x16xf32>
    %562 = tpu.matmul %560, %561, %cst_116 {dimension_numbers = #tpu.dot_dimension_numbers<[1], [0], [0], [1], [0, 0, 1, 1], [], []>} : vector<2x32xf32>, vector<32x16xf32>, vector<2x16xf32> -> vector<2x16xf32>
    %c0_117 = arith.constant 0 : index
    %c0_118 = arith.constant 0 : index
    %563 = vector.load %arg13[%c0_117, %c0_118] : memref<1x16xf32, #tpu.memory_space<vmem>>, vector<1x16xf32>
    %564 = vector.broadcast %563 : vector<1x16xf32> to vector<2x16xf32>
    %565 = arith.addf %562, %564 : vector<2x16xf32>
    %c0_119 = arith.constant 0 : index
    %c0_120 = arith.constant 0 : index
    %566 = vector.load %arg16[%c0_119, %c0_120] : memref<32x16xf32, #tpu.memory_space<vmem>>, vector<32x16xf32>
    %c0_121 = arith.constant 0 : index
    %c0_122 = arith.constant 0 : index
    %567 = vector.load %arg17[%c0_121, %c0_122] : memref<8x8xf32, #tpu.memory_space<vmem>>, vector<8x8xf32>
    %c0_123 = arith.constant 0 : index
    %c0_124 = arith.constant 0 : index
    %c0_125 = arith.constant 0 : index
    %568 = vector.load %arg14[%c0_123, %c0_124, %c0_125] : memref<16x32x16xf32, #tpu.memory_space<vmem>>, vector<1x32x16xf32>
    %569 = vector.shape_cast %568 : vector<1x32x16xf32> to vector<32x16xf32>
    %c0_126 = arith.constant 0 : index
    %c0_127 = arith.constant 0 : index
    %c0_128 = arith.constant 0 : index
    %570 = vector.load %arg15[%c0_126, %c0_127, %c0_128] : memref<16x8x8xf32, #tpu.memory_space<vmem>>, vector<1x8x8xf32>
    %571 = vector.shape_cast %570 : vector<1x8x8xf32> to vector<8x8xf32>
    %572 = vector.extract_strided_slice %565 {offsets = [0, 0], sizes = [1, 1], strides = [1, 1]} : vector<2x16xf32> to vector<1x1xf32>
    %573 = vector.broadcast %572 : vector<1x1xf32> to vector<32x16xf32>
    %574 = arith.mulf %573, %569 : vector<32x16xf32>
    %575 = arith.addf %566, %574 : vector<32x16xf32>
    %576 = vector.broadcast %572 : vector<1x1xf32> to vector<8x8xf32>
    %577 = arith.mulf %576, %571 : vector<8x8xf32>
    %578 = arith.addf %567, %577 : vector<8x8xf32>
    %579 = vector.extract_strided_slice %565 {offsets = [1, 0], sizes = [1, 1], strides = [1, 1]} : vector<2x16xf32> to vector<1x1xf32>
    %580 = vector.broadcast %579 : vector<1x1xf32> to vector<32x16xf32>
    %581 = arith.mulf %580, %569 : vector<32x16xf32>
    %582 = arith.addf %566, %581 : vector<32x16xf32>
    %583 = vector.broadcast %579 : vector<1x1xf32> to vector<8x8xf32>
    %584 = arith.mulf %583, %571 : vector<8x8xf32>
    %585 = arith.addf %567, %584 : vector<8x8xf32>
    %c1_129 = arith.constant 1 : index
    %c0_130 = arith.constant 0 : index
    %c0_131 = arith.constant 0 : index
    %586 = vector.load %arg14[%c1_129, %c0_130, %c0_131] : memref<16x32x16xf32, #tpu.memory_space<vmem>>, vector<1x32x16xf32>
    %587 = vector.shape_cast %586 : vector<1x32x16xf32> to vector<32x16xf32>
    %c1_132 = arith.constant 1 : index
    %c0_133 = arith.constant 0 : index
    %c0_134 = arith.constant 0 : index
    %588 = vector.load %arg15[%c1_132, %c0_133, %c0_134] : memref<16x8x8xf32, #tpu.memory_space<vmem>>, vector<1x8x8xf32>
    %589 = vector.shape_cast %588 : vector<1x8x8xf32> to vector<8x8xf32>
    %590 = vector.extract_strided_slice %565 {offsets = [0, 1], sizes = [1, 1], strides = [1, 1]} : vector<2x16xf32> to vector<1x1xf32>
    %591 = vector.broadcast %590 : vector<1x1xf32> to vector<32x16xf32>
    %592 = arith.mulf %591, %587 : vector<32x16xf32>
    %593 = arith.addf %575, %592 : vector<32x16xf32>
    %594 = vector.broadcast %590 : vector<1x1xf32> to vector<8x8xf32>
    %595 = arith.mulf %594, %589 : vector<8x8xf32>
    %596 = arith.addf %578, %595 : vector<8x8xf32>
    %597 = vector.extract_strided_slice %565 {offsets = [1, 1], sizes = [1, 1], strides = [1, 1]} : vector<2x16xf32> to vector<1x1xf32>
    %598 = vector.broadcast %597 : vector<1x1xf32> to vector<32x16xf32>
    %599 = arith.mulf %598, %587 : vector<32x16xf32>
    %600 = arith.addf %582, %599 : vector<32x16xf32>
    %601 = vector.broadcast %597 : vector<1x1xf32> to vector<8x8xf32>
    %602 = arith.mulf %601, %589 : vector<8x8xf32>
    %603 = arith.addf %585, %602 : vector<8x8xf32>
    %c2 = arith.constant 2 : index
    %c0_135 = arith.constant 0 : index
    %c0_136 = arith.constant 0 : index
    %604 = vector.load %arg14[%c2, %c0_135, %c0_136] : memref<16x32x16xf32, #tpu.memory_space<vmem>>, vector<1x32x16xf32>
    %605 = vector.shape_cast %604 : vector<1x32x16xf32> to vector<32x16xf32>
    %c2_137 = arith.constant 2 : index
    %c0_138 = arith.constant 0 : index
    %c0_139 = arith.constant 0 : index
    %606 = vector.load %arg15[%c2_137, %c0_138, %c0_139] : memref<16x8x8xf32, #tpu.memory_space<vmem>>, vector<1x8x8xf32>
    %607 = vector.shape_cast %606 : vector<1x8x8xf32> to vector<8x8xf32>
    %608 = vector.extract_strided_slice %565 {offsets = [0, 2], sizes = [1, 1], strides = [1, 1]} : vector<2x16xf32> to vector<1x1xf32>
    %609 = vector.broadcast %608 : vector<1x1xf32> to vector<32x16xf32>
    %610 = arith.mulf %609, %605 : vector<32x16xf32>
    %611 = arith.addf %593, %610 : vector<32x16xf32>
    %612 = vector.broadcast %608 : vector<1x1xf32> to vector<8x8xf32>
    %613 = arith.mulf %612, %607 : vector<8x8xf32>
    %614 = arith.addf %596, %613 : vector<8x8xf32>
    %615 = vector.extract_strided_slice %565 {offsets = [1, 2], sizes = [1, 1], strides = [1, 1]} : vector<2x16xf32> to vector<1x1xf32>
    %616 = vector.broadcast %615 : vector<1x1xf32> to vector<32x16xf32>
    %617 = arith.mulf %616, %605 : vector<32x16xf32>
    %618 = arith.addf %600, %617 : vector<32x16xf32>
    %619 = vector.broadcast %615 : vector<1x1xf32> to vector<8x8xf32>
    %620 = arith.mulf %619, %607 : vector<8x8xf32>
    %621 = arith.addf %603, %620 : vector<8x8xf32>
    %c3 = arith.constant 3 : index
    %c0_140 = arith.constant 0 : index
    %c0_141 = arith.constant 0 : index
    %622 = vector.load %arg14[%c3, %c0_140, %c0_141] : memref<16x32x16xf32, #tpu.memory_space<vmem>>, vector<1x32x16xf32>
    %623 = vector.shape_cast %622 : vector<1x32x16xf32> to vector<32x16xf32>
    %c3_142 = arith.constant 3 : index
    %c0_143 = arith.constant 0 : index
    %c0_144 = arith.constant 0 : index
    %624 = vector.load %arg15[%c3_142, %c0_143, %c0_144] : memref<16x8x8xf32, #tpu.memory_space<vmem>>, vector<1x8x8xf32>
    %625 = vector.shape_cast %624 : vector<1x8x8xf32> to vector<8x8xf32>
    %626 = vector.extract_strided_slice %565 {offsets = [0, 3], sizes = [1, 1], strides = [1, 1]} : vector<2x16xf32> to vector<1x1xf32>
    %627 = vector.broadcast %626 : vector<1x1xf32> to vector<32x16xf32>
    %628 = arith.mulf %627, %623 : vector<32x16xf32>
    %629 = arith.addf %611, %628 : vector<32x16xf32>
    %630 = vector.broadcast %626 : vector<1x1xf32> to vector<8x8xf32>
    %631 = arith.mulf %630, %625 : vector<8x8xf32>
    %632 = arith.addf %614, %631 : vector<8x8xf32>
    %633 = vector.extract_strided_slice %565 {offsets = [1, 3], sizes = [1, 1], strides = [1, 1]} : vector<2x16xf32> to vector<1x1xf32>
    %634 = vector.broadcast %633 : vector<1x1xf32> to vector<32x16xf32>
    %635 = arith.mulf %634, %623 : vector<32x16xf32>
    %636 = arith.addf %618, %635 : vector<32x16xf32>
    %637 = vector.broadcast %633 : vector<1x1xf32> to vector<8x8xf32>
    %638 = arith.mulf %637, %625 : vector<8x8xf32>
    %639 = arith.addf %621, %638 : vector<8x8xf32>
    %c4 = arith.constant 4 : index
    %c0_145 = arith.constant 0 : index
    %c0_146 = arith.constant 0 : index
    %640 = vector.load %arg14[%c4, %c0_145, %c0_146] : memref<16x32x16xf32, #tpu.memory_space<vmem>>, vector<1x32x16xf32>
    %641 = vector.shape_cast %640 : vector<1x32x16xf32> to vector<32x16xf32>
    %c4_147 = arith.constant 4 : index
    %c0_148 = arith.constant 0 : index
    %c0_149 = arith.constant 0 : index
    %642 = vector.load %arg15[%c4_147, %c0_148, %c0_149] : memref<16x8x8xf32, #tpu.memory_space<vmem>>, vector<1x8x8xf32>
    %643 = vector.shape_cast %642 : vector<1x8x8xf32> to vector<8x8xf32>
    %644 = vector.extract_strided_slice %565 {offsets = [0, 4], sizes = [1, 1], strides = [1, 1]} : vector<2x16xf32> to vector<1x1xf32>
    %645 = vector.broadcast %644 : vector<1x1xf32> to vector<32x16xf32>
    %646 = arith.mulf %645, %641 : vector<32x16xf32>
    %647 = arith.addf %629, %646 : vector<32x16xf32>
    %648 = vector.broadcast %644 : vector<1x1xf32> to vector<8x8xf32>
    %649 = arith.mulf %648, %643 : vector<8x8xf32>
    %650 = arith.addf %632, %649 : vector<8x8xf32>
    %651 = vector.extract_strided_slice %565 {offsets = [1, 4], sizes = [1, 1], strides = [1, 1]} : vector<2x16xf32> to vector<1x1xf32>
    %652 = vector.broadcast %651 : vector<1x1xf32> to vector<32x16xf32>
    %653 = arith.mulf %652, %641 : vector<32x16xf32>
    %654 = arith.addf %636, %653 : vector<32x16xf32>
    %655 = vector.broadcast %651 : vector<1x1xf32> to vector<8x8xf32>
    %656 = arith.mulf %655, %643 : vector<8x8xf32>
    %657 = arith.addf %639, %656 : vector<8x8xf32>
    %c5 = arith.constant 5 : index
    %c0_150 = arith.constant 0 : index
    %c0_151 = arith.constant 0 : index
    %658 = vector.load %arg14[%c5, %c0_150, %c0_151] : memref<16x32x16xf32, #tpu.memory_space<vmem>>, vector<1x32x16xf32>
    %659 = vector.shape_cast %658 : vector<1x32x16xf32> to vector<32x16xf32>
    %c5_152 = arith.constant 5 : index
    %c0_153 = arith.constant 0 : index
    %c0_154 = arith.constant 0 : index
    %660 = vector.load %arg15[%c5_152, %c0_153, %c0_154] : memref<16x8x8xf32, #tpu.memory_space<vmem>>, vector<1x8x8xf32>
    %661 = vector.shape_cast %660 : vector<1x8x8xf32> to vector<8x8xf32>
    %662 = vector.extract_strided_slice %565 {offsets = [0, 5], sizes = [1, 1], strides = [1, 1]} : vector<2x16xf32> to vector<1x1xf32>
    %663 = vector.broadcast %662 : vector<1x1xf32> to vector<32x16xf32>
    %664 = arith.mulf %663, %659 : vector<32x16xf32>
    %665 = arith.addf %647, %664 : vector<32x16xf32>
    %666 = vector.broadcast %662 : vector<1x1xf32> to vector<8x8xf32>
    %667 = arith.mulf %666, %661 : vector<8x8xf32>
    %668 = arith.addf %650, %667 : vector<8x8xf32>
    %669 = vector.extract_strided_slice %565 {offsets = [1, 5], sizes = [1, 1], strides = [1, 1]} : vector<2x16xf32> to vector<1x1xf32>
    %670 = vector.broadcast %669 : vector<1x1xf32> to vector<32x16xf32>
    %671 = arith.mulf %670, %659 : vector<32x16xf32>
    %672 = arith.addf %654, %671 : vector<32x16xf32>
    %673 = vector.broadcast %669 : vector<1x1xf32> to vector<8x8xf32>
    %674 = arith.mulf %673, %661 : vector<8x8xf32>
    %675 = arith.addf %657, %674 : vector<8x8xf32>
    %c6 = arith.constant 6 : index
    %c0_155 = arith.constant 0 : index
    %c0_156 = arith.constant 0 : index
    %676 = vector.load %arg14[%c6, %c0_155, %c0_156] : memref<16x32x16xf32, #tpu.memory_space<vmem>>, vector<1x32x16xf32>
    %677 = vector.shape_cast %676 : vector<1x32x16xf32> to vector<32x16xf32>
    %c6_157 = arith.constant 6 : index
    %c0_158 = arith.constant 0 : index
    %c0_159 = arith.constant 0 : index
    %678 = vector.load %arg15[%c6_157, %c0_158, %c0_159] : memref<16x8x8xf32, #tpu.memory_space<vmem>>, vector<1x8x8xf32>
    %679 = vector.shape_cast %678 : vector<1x8x8xf32> to vector<8x8xf32>
    %680 = vector.extract_strided_slice %565 {offsets = [0, 6], sizes = [1, 1], strides = [1, 1]} : vector<2x16xf32> to vector<1x1xf32>
    %681 = vector.broadcast %680 : vector<1x1xf32> to vector<32x16xf32>
    %682 = arith.mulf %681, %677 : vector<32x16xf32>
    %683 = arith.addf %665, %682 : vector<32x16xf32>
    %684 = vector.broadcast %680 : vector<1x1xf32> to vector<8x8xf32>
    %685 = arith.mulf %684, %679 : vector<8x8xf32>
    %686 = arith.addf %668, %685 : vector<8x8xf32>
    %687 = vector.extract_strided_slice %565 {offsets = [1, 6], sizes = [1, 1], strides = [1, 1]} : vector<2x16xf32> to vector<1x1xf32>
    %688 = vector.broadcast %687 : vector<1x1xf32> to vector<32x16xf32>
    %689 = arith.mulf %688, %677 : vector<32x16xf32>
    %690 = arith.addf %672, %689 : vector<32x16xf32>
    %691 = vector.broadcast %687 : vector<1x1xf32> to vector<8x8xf32>
    %692 = arith.mulf %691, %679 : vector<8x8xf32>
    %693 = arith.addf %675, %692 : vector<8x8xf32>
    %c7 = arith.constant 7 : index
    %c0_160 = arith.constant 0 : index
    %c0_161 = arith.constant 0 : index
    %694 = vector.load %arg14[%c7, %c0_160, %c0_161] : memref<16x32x16xf32, #tpu.memory_space<vmem>>, vector<1x32x16xf32>
    %695 = vector.shape_cast %694 : vector<1x32x16xf32> to vector<32x16xf32>
    %c7_162 = arith.constant 7 : index
    %c0_163 = arith.constant 0 : index
    %c0_164 = arith.constant 0 : index
    %696 = vector.load %arg15[%c7_162, %c0_163, %c0_164] : memref<16x8x8xf32, #tpu.memory_space<vmem>>, vector<1x8x8xf32>
    %697 = vector.shape_cast %696 : vector<1x8x8xf32> to vector<8x8xf32>
    %698 = vector.extract_strided_slice %565 {offsets = [0, 7], sizes = [1, 1], strides = [1, 1]} : vector<2x16xf32> to vector<1x1xf32>
    %699 = vector.broadcast %698 : vector<1x1xf32> to vector<32x16xf32>
    %700 = arith.mulf %699, %695 : vector<32x16xf32>
    %701 = arith.addf %683, %700 : vector<32x16xf32>
    %702 = vector.broadcast %698 : vector<1x1xf32> to vector<8x8xf32>
    %703 = arith.mulf %702, %697 : vector<8x8xf32>
    %704 = arith.addf %686, %703 : vector<8x8xf32>
    %705 = vector.extract_strided_slice %565 {offsets = [1, 7], sizes = [1, 1], strides = [1, 1]} : vector<2x16xf32> to vector<1x1xf32>
    %706 = vector.broadcast %705 : vector<1x1xf32> to vector<32x16xf32>
    %707 = arith.mulf %706, %695 : vector<32x16xf32>
    %708 = arith.addf %690, %707 : vector<32x16xf32>
    %709 = vector.broadcast %705 : vector<1x1xf32> to vector<8x8xf32>
    %710 = arith.mulf %709, %697 : vector<8x8xf32>
    %711 = arith.addf %693, %710 : vector<8x8xf32>
    %c8 = arith.constant 8 : index
    %c0_165 = arith.constant 0 : index
    %c0_166 = arith.constant 0 : index
    %712 = vector.load %arg14[%c8, %c0_165, %c0_166] : memref<16x32x16xf32, #tpu.memory_space<vmem>>, vector<1x32x16xf32>
    %713 = vector.shape_cast %712 : vector<1x32x16xf32> to vector<32x16xf32>
    %c8_167 = arith.constant 8 : index
    %c0_168 = arith.constant 0 : index
    %c0_169 = arith.constant 0 : index
    %714 = vector.load %arg15[%c8_167, %c0_168, %c0_169] : memref<16x8x8xf32, #tpu.memory_space<vmem>>, vector<1x8x8xf32>
    %715 = vector.shape_cast %714 : vector<1x8x8xf32> to vector<8x8xf32>
    %716 = vector.extract_strided_slice %565 {offsets = [0, 8], sizes = [1, 1], strides = [1, 1]} : vector<2x16xf32> to vector<1x1xf32>
    %717 = vector.broadcast %716 : vector<1x1xf32> to vector<32x16xf32>
    %718 = arith.mulf %717, %713 : vector<32x16xf32>
    %719 = arith.addf %701, %718 : vector<32x16xf32>
    %720 = vector.broadcast %716 : vector<1x1xf32> to vector<8x8xf32>
    %721 = arith.mulf %720, %715 : vector<8x8xf32>
    %722 = arith.addf %704, %721 : vector<8x8xf32>
    %723 = vector.extract_strided_slice %565 {offsets = [1, 8], sizes = [1, 1], strides = [1, 1]} : vector<2x16xf32> to vector<1x1xf32>
    %724 = vector.broadcast %723 : vector<1x1xf32> to vector<32x16xf32>
    %725 = arith.mulf %724, %713 : vector<32x16xf32>
    %726 = arith.addf %708, %725 : vector<32x16xf32>
    %727 = vector.broadcast %723 : vector<1x1xf32> to vector<8x8xf32>
    %728 = arith.mulf %727, %715 : vector<8x8xf32>
    %729 = arith.addf %711, %728 : vector<8x8xf32>
    %c9 = arith.constant 9 : index
    %c0_170 = arith.constant 0 : index
    %c0_171 = arith.constant 0 : index
    %730 = vector.load %arg14[%c9, %c0_170, %c0_171] : memref<16x32x16xf32, #tpu.memory_space<vmem>>, vector<1x32x16xf32>
    %731 = vector.shape_cast %730 : vector<1x32x16xf32> to vector<32x16xf32>
    %c9_172 = arith.constant 9 : index
    %c0_173 = arith.constant 0 : index
    %c0_174 = arith.constant 0 : index
    %732 = vector.load %arg15[%c9_172, %c0_173, %c0_174] : memref<16x8x8xf32, #tpu.memory_space<vmem>>, vector<1x8x8xf32>
    %733 = vector.shape_cast %732 : vector<1x8x8xf32> to vector<8x8xf32>
    %734 = vector.extract_strided_slice %565 {offsets = [0, 9], sizes = [1, 1], strides = [1, 1]} : vector<2x16xf32> to vector<1x1xf32>
    %735 = vector.broadcast %734 : vector<1x1xf32> to vector<32x16xf32>
    %736 = arith.mulf %735, %731 : vector<32x16xf32>
    %737 = arith.addf %719, %736 : vector<32x16xf32>
    %738 = vector.broadcast %734 : vector<1x1xf32> to vector<8x8xf32>
    %739 = arith.mulf %738, %733 : vector<8x8xf32>
    %740 = arith.addf %722, %739 : vector<8x8xf32>
    %741 = vector.extract_strided_slice %565 {offsets = [1, 9], sizes = [1, 1], strides = [1, 1]} : vector<2x16xf32> to vector<1x1xf32>
    %742 = vector.broadcast %741 : vector<1x1xf32> to vector<32x16xf32>
    %743 = arith.mulf %742, %731 : vector<32x16xf32>
    %744 = arith.addf %726, %743 : vector<32x16xf32>
    %745 = vector.broadcast %741 : vector<1x1xf32> to vector<8x8xf32>
    %746 = arith.mulf %745, %733 : vector<8x8xf32>
    %747 = arith.addf %729, %746 : vector<8x8xf32>
    %c10 = arith.constant 10 : index
    %c0_175 = arith.constant 0 : index
    %c0_176 = arith.constant 0 : index
    %748 = vector.load %arg14[%c10, %c0_175, %c0_176] : memref<16x32x16xf32, #tpu.memory_space<vmem>>, vector<1x32x16xf32>
    %749 = vector.shape_cast %748 : vector<1x32x16xf32> to vector<32x16xf32>
    %c10_177 = arith.constant 10 : index
    %c0_178 = arith.constant 0 : index
    %c0_179 = arith.constant 0 : index
    %750 = vector.load %arg15[%c10_177, %c0_178, %c0_179] : memref<16x8x8xf32, #tpu.memory_space<vmem>>, vector<1x8x8xf32>
    %751 = vector.shape_cast %750 : vector<1x8x8xf32> to vector<8x8xf32>
    %752 = vector.extract_strided_slice %565 {offsets = [0, 10], sizes = [1, 1], strides = [1, 1]} : vector<2x16xf32> to vector<1x1xf32>
    %753 = vector.broadcast %752 : vector<1x1xf32> to vector<32x16xf32>
    %754 = arith.mulf %753, %749 : vector<32x16xf32>
    %755 = arith.addf %737, %754 : vector<32x16xf32>
    %756 = vector.broadcast %752 : vector<1x1xf32> to vector<8x8xf32>
    %757 = arith.mulf %756, %751 : vector<8x8xf32>
    %758 = arith.addf %740, %757 : vector<8x8xf32>
    %759 = vector.extract_strided_slice %565 {offsets = [1, 10], sizes = [1, 1], strides = [1, 1]} : vector<2x16xf32> to vector<1x1xf32>
    %760 = vector.broadcast %759 : vector<1x1xf32> to vector<32x16xf32>
    %761 = arith.mulf %760, %749 : vector<32x16xf32>
    %762 = arith.addf %744, %761 : vector<32x16xf32>
    %763 = vector.broadcast %759 : vector<1x1xf32> to vector<8x8xf32>
    %764 = arith.mulf %763, %751 : vector<8x8xf32>
    %765 = arith.addf %747, %764 : vector<8x8xf32>
    %c11 = arith.constant 11 : index
    %c0_180 = arith.constant 0 : index
    %c0_181 = arith.constant 0 : index
    %766 = vector.load %arg14[%c11, %c0_180, %c0_181] : memref<16x32x16xf32, #tpu.memory_space<vmem>>, vector<1x32x16xf32>
    %767 = vector.shape_cast %766 : vector<1x32x16xf32> to vector<32x16xf32>
    %c11_182 = arith.constant 11 : index
    %c0_183 = arith.constant 0 : index
    %c0_184 = arith.constant 0 : index
    %768 = vector.load %arg15[%c11_182, %c0_183, %c0_184] : memref<16x8x8xf32, #tpu.memory_space<vmem>>, vector<1x8x8xf32>
    %769 = vector.shape_cast %768 : vector<1x8x8xf32> to vector<8x8xf32>
    %770 = vector.extract_strided_slice %565 {offsets = [0, 11], sizes = [1, 1], strides = [1, 1]} : vector<2x16xf32> to vector<1x1xf32>
    %771 = vector.broadcast %770 : vector<1x1xf32> to vector<32x16xf32>
    %772 = arith.mulf %771, %767 : vector<32x16xf32>
    %773 = arith.addf %755, %772 : vector<32x16xf32>
    %774 = vector.broadcast %770 : vector<1x1xf32> to vector<8x8xf32>
    %775 = arith.mulf %774, %769 : vector<8x8xf32>
    %776 = arith.addf %758, %775 : vector<8x8xf32>
    %777 = vector.extract_strided_slice %565 {offsets = [1, 11], sizes = [1, 1], strides = [1, 1]} : vector<2x16xf32> to vector<1x1xf32>
    %778 = vector.broadcast %777 : vector<1x1xf32> to vector<32x16xf32>
    %779 = arith.mulf %778, %767 : vector<32x16xf32>
    %780 = arith.addf %762, %779 : vector<32x16xf32>
    %781 = vector.broadcast %777 : vector<1x1xf32> to vector<8x8xf32>
    %782 = arith.mulf %781, %769 : vector<8x8xf32>
    %783 = arith.addf %765, %782 : vector<8x8xf32>
    %c12 = arith.constant 12 : index
    %c0_185 = arith.constant 0 : index
    %c0_186 = arith.constant 0 : index
    %784 = vector.load %arg14[%c12, %c0_185, %c0_186] : memref<16x32x16xf32, #tpu.memory_space<vmem>>, vector<1x32x16xf32>
    %785 = vector.shape_cast %784 : vector<1x32x16xf32> to vector<32x16xf32>
    %c12_187 = arith.constant 12 : index
    %c0_188 = arith.constant 0 : index
    %c0_189 = arith.constant 0 : index
    %786 = vector.load %arg15[%c12_187, %c0_188, %c0_189] : memref<16x8x8xf32, #tpu.memory_space<vmem>>, vector<1x8x8xf32>
    %787 = vector.shape_cast %786 : vector<1x8x8xf32> to vector<8x8xf32>
    %788 = vector.extract_strided_slice %565 {offsets = [0, 12], sizes = [1, 1], strides = [1, 1]} : vector<2x16xf32> to vector<1x1xf32>
    %789 = vector.broadcast %788 : vector<1x1xf32> to vector<32x16xf32>
    %790 = arith.mulf %789, %785 : vector<32x16xf32>
    %791 = arith.addf %773, %790 : vector<32x16xf32>
    %792 = vector.broadcast %788 : vector<1x1xf32> to vector<8x8xf32>
    %793 = arith.mulf %792, %787 : vector<8x8xf32>
    %794 = arith.addf %776, %793 : vector<8x8xf32>
    %795 = vector.extract_strided_slice %565 {offsets = [1, 12], sizes = [1, 1], strides = [1, 1]} : vector<2x16xf32> to vector<1x1xf32>
    %796 = vector.broadcast %795 : vector<1x1xf32> to vector<32x16xf32>
    %797 = arith.mulf %796, %785 : vector<32x16xf32>
    %798 = arith.addf %780, %797 : vector<32x16xf32>
    %799 = vector.broadcast %795 : vector<1x1xf32> to vector<8x8xf32>
    %800 = arith.mulf %799, %787 : vector<8x8xf32>
    %801 = arith.addf %783, %800 : vector<8x8xf32>
    %c13 = arith.constant 13 : index
    %c0_190 = arith.constant 0 : index
    %c0_191 = arith.constant 0 : index
    %802 = vector.load %arg14[%c13, %c0_190, %c0_191] : memref<16x32x16xf32, #tpu.memory_space<vmem>>, vector<1x32x16xf32>
    %803 = vector.shape_cast %802 : vector<1x32x16xf32> to vector<32x16xf32>
    %c13_192 = arith.constant 13 : index
    %c0_193 = arith.constant 0 : index
    %c0_194 = arith.constant 0 : index
    %804 = vector.load %arg15[%c13_192, %c0_193, %c0_194] : memref<16x8x8xf32, #tpu.memory_space<vmem>>, vector<1x8x8xf32>
    %805 = vector.shape_cast %804 : vector<1x8x8xf32> to vector<8x8xf32>
    %806 = vector.extract_strided_slice %565 {offsets = [0, 13], sizes = [1, 1], strides = [1, 1]} : vector<2x16xf32> to vector<1x1xf32>
    %807 = vector.broadcast %806 : vector<1x1xf32> to vector<32x16xf32>
    %808 = arith.mulf %807, %803 : vector<32x16xf32>
    %809 = arith.addf %791, %808 : vector<32x16xf32>
    %810 = vector.broadcast %806 : vector<1x1xf32> to vector<8x8xf32>
    %811 = arith.mulf %810, %805 : vector<8x8xf32>
    %812 = arith.addf %794, %811 : vector<8x8xf32>
    %813 = vector.extract_strided_slice %565 {offsets = [1, 13], sizes = [1, 1], strides = [1, 1]} : vector<2x16xf32> to vector<1x1xf32>
    %814 = vector.broadcast %813 : vector<1x1xf32> to vector<32x16xf32>
    %815 = arith.mulf %814, %803 : vector<32x16xf32>
    %816 = arith.addf %798, %815 : vector<32x16xf32>
    %817 = vector.broadcast %813 : vector<1x1xf32> to vector<8x8xf32>
    %818 = arith.mulf %817, %805 : vector<8x8xf32>
    %819 = arith.addf %801, %818 : vector<8x8xf32>
    %c14 = arith.constant 14 : index
    %c0_195 = arith.constant 0 : index
    %c0_196 = arith.constant 0 : index
    %820 = vector.load %arg14[%c14, %c0_195, %c0_196] : memref<16x32x16xf32, #tpu.memory_space<vmem>>, vector<1x32x16xf32>
    %821 = vector.shape_cast %820 : vector<1x32x16xf32> to vector<32x16xf32>
    %c14_197 = arith.constant 14 : index
    %c0_198 = arith.constant 0 : index
    %c0_199 = arith.constant 0 : index
    %822 = vector.load %arg15[%c14_197, %c0_198, %c0_199] : memref<16x8x8xf32, #tpu.memory_space<vmem>>, vector<1x8x8xf32>
    %823 = vector.shape_cast %822 : vector<1x8x8xf32> to vector<8x8xf32>
    %824 = vector.extract_strided_slice %565 {offsets = [0, 14], sizes = [1, 1], strides = [1, 1]} : vector<2x16xf32> to vector<1x1xf32>
    %825 = vector.broadcast %824 : vector<1x1xf32> to vector<32x16xf32>
    %826 = arith.mulf %825, %821 : vector<32x16xf32>
    %827 = arith.addf %809, %826 : vector<32x16xf32>
    %828 = vector.broadcast %824 : vector<1x1xf32> to vector<8x8xf32>
    %829 = arith.mulf %828, %823 : vector<8x8xf32>
    %830 = arith.addf %812, %829 : vector<8x8xf32>
    %831 = vector.extract_strided_slice %565 {offsets = [1, 14], sizes = [1, 1], strides = [1, 1]} : vector<2x16xf32> to vector<1x1xf32>
    %832 = vector.broadcast %831 : vector<1x1xf32> to vector<32x16xf32>
    %833 = arith.mulf %832, %821 : vector<32x16xf32>
    %834 = arith.addf %816, %833 : vector<32x16xf32>
    %835 = vector.broadcast %831 : vector<1x1xf32> to vector<8x8xf32>
    %836 = arith.mulf %835, %823 : vector<8x8xf32>
    %837 = arith.addf %819, %836 : vector<8x8xf32>
    %c15 = arith.constant 15 : index
    %c0_200 = arith.constant 0 : index
    %c0_201 = arith.constant 0 : index
    %838 = vector.load %arg14[%c15, %c0_200, %c0_201] : memref<16x32x16xf32, #tpu.memory_space<vmem>>, vector<1x32x16xf32>
    %839 = vector.shape_cast %838 : vector<1x32x16xf32> to vector<32x16xf32>
    %c15_202 = arith.constant 15 : index
    %c0_203 = arith.constant 0 : index
    %c0_204 = arith.constant 0 : index
    %840 = vector.load %arg15[%c15_202, %c0_203, %c0_204] : memref<16x8x8xf32, #tpu.memory_space<vmem>>, vector<1x8x8xf32>
    %841 = vector.shape_cast %840 : vector<1x8x8xf32> to vector<8x8xf32>
    %842 = vector.extract_strided_slice %565 {offsets = [0, 15], sizes = [1, 1], strides = [1, 1]} : vector<2x16xf32> to vector<1x1xf32>
    %843 = vector.broadcast %842 : vector<1x1xf32> to vector<32x16xf32>
    %844 = arith.mulf %843, %839 : vector<32x16xf32>
    %845 = arith.addf %827, %844 : vector<32x16xf32>
    %846 = vector.broadcast %842 : vector<1x1xf32> to vector<8x8xf32>
    %847 = arith.mulf %846, %841 : vector<8x8xf32>
    %848 = arith.addf %830, %847 : vector<8x8xf32>
    %849 = vector.extract_strided_slice %565 {offsets = [1, 15], sizes = [1, 1], strides = [1, 1]} : vector<2x16xf32> to vector<1x1xf32>
    %850 = vector.broadcast %849 : vector<1x1xf32> to vector<32x16xf32>
    %851 = arith.mulf %850, %839 : vector<32x16xf32>
    %852 = arith.addf %834, %851 : vector<32x16xf32>
    %853 = vector.broadcast %849 : vector<1x1xf32> to vector<8x8xf32>
    %854 = arith.mulf %853, %841 : vector<8x8xf32>
    %855 = arith.addf %837, %854 : vector<8x8xf32>
    %856 = vector.extract_strided_slice %93 {offsets = [0, 0], sizes = [1, 32], strides = [1, 1]} : vector<2x32xf32> to vector<1x32xf32>
    %857 = vector.extract_strided_slice %157 {offsets = [0, 0], sizes = [1, 32], strides = [1, 1]} : vector<2x32xf32> to vector<1x32xf32>
    %858 = vector.extract_strided_slice %221 {offsets = [0, 0], sizes = [1, 32], strides = [1, 1]} : vector<2x32xf32> to vector<1x32xf32>
    %859 = vector.extract_strided_slice %285 {offsets = [0, 0], sizes = [1, 32], strides = [1, 1]} : vector<2x32xf32> to vector<1x32xf32>
    %860 = vector.extract_strided_slice %349 {offsets = [0, 0], sizes = [1, 32], strides = [1, 1]} : vector<2x32xf32> to vector<1x32xf32>
    %861 = vector.extract_strided_slice %413 {offsets = [0, 0], sizes = [1, 32], strides = [1, 1]} : vector<2x32xf32> to vector<1x32xf32>
    %862 = vector.extract_strided_slice %477 {offsets = [0, 0], sizes = [1, 32], strides = [1, 1]} : vector<2x32xf32> to vector<1x32xf32>
    %863 = vector.extract_strided_slice %541 {offsets = [0, 0], sizes = [1, 32], strides = [1, 1]} : vector<2x32xf32> to vector<1x32xf32>
    %864 = tpu.concatenate %856, %857, %858, %859, %860, %861, %862, %863 in 0 : vector<1x32xf32>, vector<1x32xf32>, vector<1x32xf32>, vector<1x32xf32>, vector<1x32xf32>, vector<1x32xf32>, vector<1x32xf32>, vector<1x32xf32> -> vector<8x32xf32>
    %c0_205 = arith.constant 0 : index
    %c0_206 = arith.constant 0 : index
    %c0_207 = arith.constant 0 : index
    %865 = vector.load %arg0[%c0_205, %c0_206, %c0_207] : memref<2x8x8xf32, #tpu.memory_space<vmem>>, vector<1x8x8xf32>
    %866 = vector.shape_cast %865 : vector<1x8x8xf32> to vector<8x8xf32>
    %cst_208 = arith.constant dense<0.000000e+00> : vector<8x16xf32>
    %867 = tpu.matmul %864, %845, %cst_208 {dimension_numbers = #tpu.dot_dimension_numbers<[1], [0], [0], [1], [0, 0, 1, 1], [], []>} : vector<8x32xf32>, vector<32x16xf32>, vector<8x16xf32> -> vector<8x16xf32>
    %cst_209 = arith.constant dense<0.000000e+00> : vector<8x8xf32>
    %868 = tpu.matmul %866, %848, %cst_209 {dimension_numbers = #tpu.dot_dimension_numbers<[1], [0], [0], [1], [0, 0, 1, 1], [], []>} : vector<8x8xf32>, vector<8x8xf32>, vector<8x8xf32> -> vector<8x8xf32>
    %869 = tpu.concatenate %866, %868 in 1 : vector<8x8xf32>, vector<8x8xf32> -> vector<8x16xf32>
    %870 = arith.addf %867, %869 : vector<8x16xf32>
    %c0_210 = arith.constant 0 : index
    %c0_211 = arith.constant 0 : index
    %c0_212 = arith.constant 0 : index
    %871 = vector.load %arg22[%c0_210, %c0_211, %c0_212] : memref<2x8x16xf32, #tpu.memory_space<vmem>>, vector<1x8x16xf32>
    %872 = vector.shape_cast %871 : vector<1x8x16xf32> to vector<8x16xf32>
    %873 = vector.shape_cast %870 : vector<8x16xf32> to vector<1x8x16xf32>
    tpu.vector_store %arg22[%c0_210, %c0_211, %c0_212], %873 {strides = array<i32>} : memref<2x8x16xf32, #tpu.memory_space<vmem>>, vector<1x8x16xf32>,
    %874 = vector.extract_strided_slice %93 {offsets = [1, 0], sizes = [1, 32], strides = [1, 1]} : vector<2x32xf32> to vector<1x32xf32>
    %875 = vector.extract_strided_slice %157 {offsets = [1, 0], sizes = [1, 32], strides = [1, 1]} : vector<2x32xf32> to vector<1x32xf32>
    %876 = vector.extract_strided_slice %221 {offsets = [1, 0], sizes = [1, 32], strides = [1, 1]} : vector<2x32xf32> to vector<1x32xf32>
    %877 = vector.extract_strided_slice %285 {offsets = [1, 0], sizes = [1, 32], strides = [1, 1]} : vector<2x32xf32> to vector<1x32xf32>
    %878 = vector.extract_strided_slice %349 {offsets = [1, 0], sizes = [1, 32], strides = [1, 1]} : vector<2x32xf32> to vector<1x32xf32>
    %879 = vector.extract_strided_slice %413 {offsets = [1, 0], sizes = [1, 32], strides = [1, 1]} : vector<2x32xf32> to vector<1x32xf32>
    %880 = vector.extract_strided_slice %477 {offsets = [1, 0], sizes = [1, 32], strides = [1, 1]} : vector<2x32xf32> to vector<1x32xf32>
    %881 = vector.extract_strided_slice %541 {offsets = [1, 0], sizes = [1, 32], strides = [1, 1]} : vector<2x32xf32> to vector<1x32xf32>
    %882 = tpu.concatenate %874, %875, %876, %877, %878, %879, %880, %881 in 0 : vector<1x32xf32>, vector<1x32xf32>, vector<1x32xf32>, vector<1x32xf32>, vector<1x32xf32>, vector<1x32xf32>, vector<1x32xf32>, vector<1x32xf32> -> vector<8x32xf32>
    %c1_213 = arith.constant 1 : index
    %c0_214 = arith.constant 0 : index
    %c0_215 = arith.constant 0 : index
    %883 = vector.load %arg0[%c1_213, %c0_214, %c0_215] : memref<2x8x8xf32, #tpu.memory_space<vmem>>, vector<1x8x8xf32>
    %884 = vector.shape_cast %883 : vector<1x8x8xf32> to vector<8x8xf32>
    %cst_216 = arith.constant dense<0.000000e+00> : vector<8x16xf32>
    %885 = tpu.matmul %882, %852, %cst_216 {dimension_numbers = #tpu.dot_dimension_numbers<[1], [0], [0], [1], [0, 0, 1, 1], [], []>} : vector<8x32xf32>, vector<32x16xf32>, vector<8x16xf32> -> vector<8x16xf32>
    %cst_217 = arith.constant dense<0.000000e+00> : vector<8x8xf32>
    %886 = tpu.matmul %884, %855, %cst_217 {dimension_numbers = #tpu.dot_dimension_numbers<[1], [0], [0], [1], [0, 0, 1, 1], [], []>} : vector<8x8xf32>, vector<8x8xf32>, vector<8x8xf32> -> vector<8x8xf32>
    %887 = tpu.concatenate %884, %886 in 1 : vector<8x8xf32>, vector<8x8xf32> -> vector<8x16xf32>
    %888 = arith.addf %885, %887 : vector<8x16xf32>
    %c1_218 = arith.constant 1 : index
    %c0_219 = arith.constant 0 : index
    %c0_220 = arith.constant 0 : index
    %889 = vector.load %arg22[%c1_218, %c0_219, %c0_220] : memref<2x8x16xf32, #tpu.memory_space<vmem>>, vector<1x8x16xf32>
    %890 = vector.shape_cast %889 : vector<1x8x16xf32> to vector<8x16xf32>
    %891 = vector.shape_cast %888 : vector<8x16xf32> to vector<1x8x16xf32>
    tpu.vector_store %arg22[%c1_218, %c0_219, %c0_220], %891 {strides = array<i32>} : memref<2x8x16xf32, #tpu.memory_space<vmem>>, vector<1x8x16xf32>,
    return
  }
}

</mosaic_0001>

<bundles_post_ra>
// kernel: forward.1
= control target key start
LH: loop header
LB: loop body
LE: loop exit
PB: predicated region body
PF: predicated region fallthrough
CT: control target
= control target key end

     0   :  { %s5314_s0 = inlined_call_operand.vmem [shape: f32[2,8,8], index: 0, kind: input, shape index: {}]   ;;  %s5315_s1 = inlined_call_operand.vmem [shape: f32[2,8,16], index: 1, kind: input, shape index: {}]   ;;  %s5316_s2 = inlined_call_operand.vmem [shape: f32[2,8], index: 2, kind: input, shape index: {}]   ;;  %s5317_s3 = inlined_call_operand.vmem [shape: f32[16,96], index: 3, kind: input, shape index: {}]   ;;  %s5318_s4 = inlined_call_operand.vmem [shape: f32[32,96], index: 4, kind: input, shape index: {}]   ;;  %s5319_s5 = inlined_call_operand.vmem [shape: f32[1,96], index: 5, kind: input, shape index: {}]   ;;  %s5320_s6 = inlined_call_operand.vmem [shape: f32[1,96], index: 6, kind: input, shape index: {}]   ;;  %s5321_s7 = inlined_call_operand.vmem [shape: f32[32,8], index: 7, kind: input, shape index: {}]   ;;  %s5322_s8 = inlined_call_operand.vmem [shape: f32[32,8], index: 8, kind: input, shape index: {}]   ;;  %s5323_s9 = inlined_call_operand.vmem [shape: f32[1,8], index: 9, kind: input, shape index: {}]   ;;  %s5324_s10 = inlined_call_operand.vmem [shape: f32[8,32], index: 10, kind: input, shape index: {}]   ;;  %s5325_s11 = inlined_call_operand.vmem [shape: f32[1,32], index: 11, kind: input, shape index: {}]   ;;  %s5326_s12 = inlined_call_operand.vmem [shape: f32[32,16], index: 12, kind: input, shape index: {}]   ;;  %s5327_s13 = inlined_call_operand.vmem [shape: f32[1,16], index: 13, kind: input, shape index: {}]   ;;  %s5328_s14 = inlined_call_operand.vmem [shape: f32[16,32,16], index: 14, kind: input, shape index: {}]   ;;  %s5329_s15 = inlined_call_operand.vmem [shape: f32[16,8,8], index: 15, kind: input, shape index: {}]   ;;  %s5330_s16 = inlined_call_operand.vmem [shape: f32[32,16], index: 16, kind: input, shape index: {}]   ;;  %s5331_s17 = inlined_call_operand.vmem [shape: f32[8,8], index: 17, kind: input, shape index: {}]   ;;  %s5332_s18 = inlined_call_operand.vmem [shape: f32[8,96], index: 18, kind: input, shape index: {}]   ;;  %s5333_s19 = inlined_call_operand.vmem [shape: f32[32,96], index: 19, kind: input, shape index: {}]   ;;  %s5334_s20 = inlined_call_operand.vmem [shape: f32[1,96], index: 20, kind: input, shape index: {}]   ;;  %s5335_s21 = inlined_call_operand.vmem [shape: f32[1,96], index: 21, kind: input, shape index: {}]   ;;  %s5336_s22 = inlined_call_operand.hbm [shape: f32[2,8,16], index: 22, kind: output, shape index: {0}]   ;;  %s5337_s23 = inlined_call_operand.hbm [shape: f32[2,8], index: 23, kind: output, shape index: {1}]   ;;  %s5338_s24 = inlined_call_operand.hbm [shape: f32[2,8], index: 24, kind: output, shape index: {2}]  }
   0x1   :  { %5345 = sst [smem:[#allocation9_spill]] %s5314_s0 }
   0x2   :  { %5346 = sst [smem:[#allocation10_spill]] %s5315_s1 }
   0x3   :  { %5347 = sst [smem:[#allocation11_spill]] %s5316_s2 }
   0x4   :  { %5348 = sst [smem:[#allocation12_spill]] %s5317_s3 }
   0x5   :  { %5349 = sst [smem:[#allocation13_spill]] %s5318_s4 }
   0x6   :  { %5350 = sst [smem:[#allocation14_spill]] %s5319_s5 }
   0x7   :  { %5351 = sst [smem:[#allocation15_spill]] %s5320_s6 }
   0x8   :  { %5352 = sst [smem:[#allocation16_spill]] %s5321_s7 }
   0x9   :  { %5353 = sst [smem:[#allocation17_spill]] %s5322_s8 }
   0xa   :  { %30 = vsyncpa [#allocation3], 0  ;;  %s5354_s27 = sld [smem:[#allocation12_spill]]  ;;  %v4341_v2 = vmov 0.0|0.0   ;;  %vm4342_vm0 = vmmov 0   ;;  %v4343_v4 = vmov 0.0  }
   0xb   :  { %3950 = vmatprep.subr.bf16.mxu0 %v4341_v2  ;;  %3953 = vmatprep.subr.bf16.mxu1 %v4341_v2  ;;  %s5355_s0 = sld [smem:[#allocation10_spill]]  ;;  %vm98_vm1 = vcmask 130048   ;;  %v84_v7 = vld [vmem:[%s5332_s18] sm:$0xff]  ;;  %s5356_s1 = sld [smem:[#allocation13_spill]]  ;;  %v86_v11 = vld [vmem:[%s5333_s19 + $0x8] sm:$0xff] }
   0xc   :  { %3684 = vmatprep.mubr.msk.f32.mxu0 %vm4342_vm0, %v4343_v4  ;;  %3691 = vmatprep.mubr.msk.f32.mxu1 %vm4342_vm0, %v4343_v4  ;;  %v85_v10 = vld [vmem:[%s5333_s19] sm:$0xff] }
  0x10   :  { %v76_v0 = vld [vmem:[%s5354_s27] sm:$0xff]  ;;  %v77_v1 = vld [vmem:[%s5354_s27 + $0x8] sm:$0xff] }
  0x11   :  { %v3951_v3 = vpack.c.bf16 %v77_v1, %v76_v0  ;;  %v91_v5 = vld [vmem:[%s5355_s0] sm:$0xff]  ;;  %v3434_v6 = vld [vmem:[%s5355_s0 + $0x8] sm:$0xff] }
  0x12   :  { %v78_v8 = vld [vmem:[%s5356_s1] sm:$0xff]  ;;  %v79_v9 = vld [vmem:[%s5356_s1 + $0x8] sm:$0xff] }
  0x13   :  { %3952 = vmatpush3.bf16.msra.mxu0 %v3951_v3  ;;  %3955 = vmatpush3.bf16.msra.mxu1 %v3951_v3 }
  0x14   :  { %3694 = vmatprep.subr.mxu0 %v4343_v4  ;;  %3699 = vmatprep.subr.mxu1 %v4343_v4 }
  0x15   :  { %31 = vsyncpa [#allocation5], 0  ;;  %s5357_s0 = sld [smem:[#allocation9_spill]]  ;;  %vm254_vm2 = vcmask 64512   ;;  %v4534_v14 = vpack.c.bf16 %v79_v9, %v78_v8  ;;  %v4536_v15 = vpack.c.bf16 %v86_v11, %v85_v10  ;;  %v80_v16 = vld [vmem:[%s5356_s1 + $0x10] sm:$0xff]  ;;  %v81_v17 = vld [vmem:[%s5356_s1 + $0x18] sm:$0xff] }
  0x16   :  { %3685 = vmatmul.mubr.msk.f32.vlgmr.msra.gmra.mrb[0].mxu0 %vm98_vm1, %v91_v5  ;;  %3692 = vmatmul.mubr.msk.f32.vlgmr.msra.gmra.mrb[0].mxu1 %vm98_vm1, %v3434_v6  ;;  %v87_v18 = vld [vmem:[%s5333_s19 + $0x10] sm:$0xff]  ;;  %v88_v19 = vld [vmem:[%s5333_s19 + $0x18] sm:$0xff]  ;;  %v4560_v20 = vpack.c.bf16 %v81_v17, %v80_v16  ;;  %s5358_s6 = sld [smem:[#allocation14_spill]]  ;;  %v3436_v29 = vld [vmem:[%s5334_s20] ss:$0 sm:$0xff]  ;;  %vm406_vm3 = vcmask 1040384  }
  0x17   :  { %3695 = vmatpush3.msra.mxu0 %v84_v7  ;;  %3700 = vmatpush3.msra.mxu1 %v84_v7  ;;  %v4562_v21 = vpack.c.bf16 %v88_v19, %v87_v18  ;;  %s5359_s7 = sld [smem:[#allocation15_spill]]  ;;  %s4344_s30 = smov 64   ;;  %vm418_vm4 = vcmask 261120   ;;  %vm2262_vm5 = vcmask 58368   ;;  %vm3045_vm6 = vcmask 1041408  }
  0x18   :  { %3696 = vmatprep.mubr.msk.f32.mxu0 %vm4342_vm0, %v4343_v4  ;;  %3701 = vmatprep.mubr.msk.f32.mxu1 %vm4342_vm0, %v4343_v4  ;;  %s5360_s5 = sld [smem:[#allocation16_spill]]  ;;  %s5361_s1 = sld [smem:[#allocation17_spill]]  ;;  %vm3047_vm7 = vcmask 1042432   ;;  %vm3049_vm8 = vcmask 1043456   ;;  %vm3051_vm9 = vcmask 1044480   ;;  %vm3053_vm10 = vcmask 1045504  }
  0x19   :  { %3956 = vmatprep.subr.bf16.mxu0 %v4341_v2  ;;  %3962 = vmatprep.subr.bf16.mxu1 %v4341_v2  ;;  %s4346_s4 = smov 123   ;;  %s4349_s26 = smov 126   ;;  %vm3055_vm11 = vcmask 1046528  }
  0x1a   :  { %s4350_s27 = smov 121   ;;  %s4352_s28 = smov 120  }
  0x1b   :  { %v247_v12 = vld [vmem:[%s5357_s0] sm:$0xff]  ;;  %v3438_v13 = vld [vmem:[%s5357_s0 + $0x8] sm:$0xff]  ;;  %s4354_s19 = smov 119   ;;  %s4359_s2 = smov 114  }
  0x1c   :  { %3697 = vmatmul.mubr.msk.f32.vlgmr.msra.gmra.mrb[2].mxu0 %vm254_vm2, %v247_v12  ;;  %3702 = vmatmul.mubr.msk.f32.vlgmr.msra.gmra.mrb[2].mxu1 %vm254_vm2, %v3438_v13  ;;  %v3432_v22 = vld [vmem:[%s5358_s6] ss:$0 sm:$0xff]  ;;  %s4358_s6 = smov 115   ;;  %s4360_s18 = smov 113  }
  0x1d   :  { %3958 = vmatpush3.bf16.msra.mxu0 %v4534_v14  ;;  %3964 = vmatpush3.bf16.msra.mxu1 %v4536_v15  ;;  %v4619_v62 = vld [vmem:[%s5359_s7] ss:$0 sm:$0xff] }
  0x1e   :  { %3959 = vmatprep.subr.bf16.mxu0 %v4341_v2  ;;  %3965 = vmatprep.subr.bf16.mxu1 %v4341_v2 }
  0x1f   :  { %3712 = vmatprep.mubr.msk.f32.mxu0 %vm4342_vm0, %v4343_v4  ;;  %3723 = vmatprep.mubr.msk.f32.mxu1 %vm4342_vm0, %v4343_v4 }
  0x21   :  { %3961 = vmatpush3.bf16.msra.mxu0 %v4560_v20  ;;  %3967 = vmatpush3.bf16.msra.mxu1 %v4562_v21 }
  0x22   :  { %3968 = vmatprep.subr.bf16.mxu0 %v4341_v2  ;;  %3974 = vmatprep.subr.bf16.mxu1 %v4341_v2 }
  0x24   :  { %3713 = vmatmul.mubr.f32.vlgmr.msra.gmra.mrb[4].mxu0 %v4343_v4  ;;  %3724 = vmatmul.mubr.f32.vlgmr.msra.gmra.mrb[4].mxu1 %v4343_v4 }
  0x25   :  { %3970 = vmatpush3.bf16.msra.mxu0 %v4534_v14  ;;  %3734 = vmatprep.mubr.msk.f32.mxu0 %vm4342_vm0, %v4343_v4 }
  0x26   :  { %3971 = vmatprep.subr.bf16.mxu0 %v4341_v2  ;;  %3976 = vmatpush3.bf16.msra.mxu1 %v4536_v15 }
  0x27   :  { %3977 = vmatprep.subr.bf16.mxu1 %v4341_v2  ;;  %3745 = vmatprep.mubr.msk.f32.mxu1 %vm4342_vm0, %v4343_v4 }
  0x29   :  { %3973 = vmatpush3.bf16.msra.mxu0 %v4560_v20 }
  0x2a   :  { %3979 = vmatpush3.bf16.msra.mxu1 %v4562_v21  ;;  %3980 = vmatprep.subr.bf16.mxu0 %v4341_v2 }
  0x2b   :  { %3986 = vmatprep.subr.bf16.mxu1 %v4341_v2 }
  0xe9   :  { %v168_v23 = vpop.f32.mrb[0].mxu0  ;;  %v243_v24 = vpop.f32.mrb[0].mxu1 }
  0xea   :  { %v169_v25 = vadd.f32 %v3432_v22, %v168_v23  ;;  %v244_v26 = vadd.f32 %v3432_v22, %v243_v24  ;;  %v3686_v27 = vpop.f32.mrb[1].mxu0  ;;  %v3693_v28 = vpop.f32.mrb[1].mxu1 }
  0xec   :  { %v404_v30 = vrot.slane %v244_v26, 7  ;;  %v621_v31 = vrot.slane %v169_v25, 1  ;;  %v830_v32 = vrot.slane %v169_v25, 2  ;;  %v832_v33 = vrot.slane %v244_v26, 1 }
  0xed   :  { %v1042_v36 = vrot.slane %v169_v25, 3  ;;  %v1044_v37 = vrot.slane %v244_v26, 2  ;;  %v1254_v38 = vrot.slane %v169_v25, 4  ;;  %v1256_v39 = vrot.slane %v244_v26, 3 }
  0xee   :  { %v4595_v44 = vsel %vm406_vm3, %v169_v25, %v404_v30  ;;  %v4598_v45 = vsel %vm406_vm3, %v621_v31, %v244_v26  ;;  %v4601_v46 = vsel %vm406_vm3, %v830_v32, %v832_v33  ;;  %v1466_v49 = vrot.slane %v169_v25, 5 }
  0xef   :  { %v324_v34 = vpop.f32.mrb[2].mxu0  ;;  %v399_v35 = vpop.f32.mrb[2].mxu1  ;;  %v4604_v47 = vsel %vm406_vm3, %v1042_v36, %v1044_v37  ;;  %v4607_v48 = vsel %vm406_vm3, %v1254_v38, %v1256_v39  ;;  %v1468_v61 = vrot.slane %v244_v26, 4  ;;  %v1678_v6 = vrot.slane %v169_v25, 6 }
  0xf0   :  { %v325_v40 = vadd.f32 %v3436_v29, %v324_v34  ;;  %v400_v41 = vadd.f32 %v3436_v29, %v399_v35  ;;  %v3698_v42 = vpop.f32.mrb[3].mxu0  ;;  %v3703_v43 = vpop.f32.mrb[3].mxu1  ;;  %v1680_v7 = vrot.slane %v244_v26, 5  ;;  %v1890_v13 = vrot.slane %v169_v25, 7  ;;  %v4651_v35 = vld [vmem:[%s5335_s21] ss:$0 sm:$0xff] }
  0xf1   :  { %v4628_v5 = vsel %vm406_vm3, %v1466_v49, %v1468_v61  ;;  %v1892_v16 = vrot.slane %v244_v26, 6  ;;  %s4345_s21 = smov 96  }
  0xf2   :  { %v409_v50 = vrot.slane %v400_v41, 7  ;;  %v625_v51 = vrot.slane %v325_v40, 1  ;;  %v835_v52 = vrot.slane %v325_v40, 2  ;;  %v837_v53 = vrot.slane %v400_v41, 1 }
  0xf3   :  { %v1047_v54 = vrot.slane %v325_v40, 3  ;;  %v1049_v55 = vrot.slane %v400_v41, 2  ;;  %v1259_v56 = vrot.slane %v325_v40, 4  ;;  %v1261_v57 = vrot.slane %v400_v41, 3 }
  0xf4   :  { %v411_v58 = vsel %vm406_vm3, %v325_v40, %v409_v50  ;;  %v4611_v59 = vsel %vm406_vm3, %v625_v51, %v400_v41  ;;  %v4614_v60 = vsel %vm406_vm3, %v835_v52, %v837_v53  ;;  %v1471_v1 = vrot.slane %v325_v40, 5 }
  0xf5   :  { %v4622_v63 = vsel %vm406_vm3, %v1047_v54, %v1049_v55  ;;  %v4625_v0 = vsel %vm406_vm3, %v1259_v56, %v1261_v57  ;;  %v1473_v3 = vrot.slane %v400_v41, 4  ;;  %v1683_v8 = vrot.slane %v325_v40, 6 }
  0xf6   :  { %v1685_v12 = vrot.slane %v400_v41, 5  ;;  %v4635_v22 = vsel %vm406_vm3, %v1678_v6, %v1680_v7  ;;  %v1895_v23 = vrot.slane %v325_v40, 7  ;;  %v4641_v27 = vsel %vm406_vm3, %v1890_v13, %v1892_v16 }
  0xf7   :  { %v488_v9 = vpop.f32.mrb[4].mxu0  ;;  %v590_v10 = vpop.f32.mrb[4].mxu1  ;;  %v4631_v11 = vsel %vm406_vm3, %v1471_v1, %v1473_v3  ;;  %v1897_v28 = vrot.slane %v400_v41, 6 }
  0xf8   :  { %v489_v17 = vadd.f32 %v4619_v62, %v488_v9  ;;  %v3714_v18 = vpop.f32.mrb[5].mxu0  ;;  %v3725_v19 = vpop.f32.mrb[5].mxu1  ;;  %v4638_v24 = vsel %vm406_vm3, %v1683_v8, %v1685_v12  ;;  %v591_v36 = vadd.f32 %v4651_v35, %v590_v10 }
  0xf9   :  { %v4645_v25 = vsel %vm406_vm3, %v1895_v23, %v1897_v28 }
  0xfa   :  { %500 = vrot.lane.b32.xlu0 %v489_v17, %s4344_s30  ;;  %v492_v26 = vadd.f32 %v489_v17, %v4595_v44  ;;  %v594_v37 = vadd.f32 %v591_v36, %v411_v58 }
  0xfc   :  { %v3441_v29 = vmul.f32 -1.442695, %v492_v26  ;;  %v3443_v38 = vmul.f32 -1.442695, %v594_v37 }
  0xfe   :  { %4171 = vpow2.f32 %v3441_v29 }
 0x108   :  { %v4172_v30 = vpop.eup %4171 }
 0x109   :  { %v496_v31 = vadd.f32 1.0, %v4172_v30 }
 0x10b   :  { %4173 = vrcp.f32 %v496_v31 }
 0x10c   :  { %4175 = vpow2.f32 %v3443_v38 }
 0x115   :  { %v4174_v32 = vpop.eup %4173 }
 0x116   :  { %v4176_v39 = vpop.eup %4175  ;;  %v510_v54 = vsub.f32 1.0, %v4174_v32  ;;  %v516_v56 = vmul.f32 0.0, %v4174_v32 }
 0x117   :  { %v598_v40 = vadd.f32 1.0, %v4176_v39 }
 0x119   :  { %4177 = vrcp.f32 %v598_v40 }
 0x123   :  { %v4178_v43 = vpop.eup %4177 }
 0x124   :  { %v612_v3 = vsub.f32 1.0, %v4178_v43 }
 0x16c   :  { %v501_v33 = vpop.permute.xlu0 %500 }
 0x16d   :  { %v503_v34 = vmul.f32 %v4174_v32, %v501_v33 }
 0x16f   :  { %505 = vrot.lane.b32.xlu0 %v503_v34, %s4344_s30 }
 0x173   :  { %602 = vrot.lane.b32.xlu0 %v591_v36, %s4344_s30 }
 0x1e1   :  { %v506_v41 = vpop.permute.xlu0 %505 }
 0x1e2   :  { %v508_v42 = vadd.f32 %v506_v41, %v4595_v44 }
 0x1e4   :  { %4179 = vtanh.f32 %v508_v42 }
 0x1e5   :  { %v603_v49 = vpop.permute.xlu0 %602 }
 0x1e6   :  { %v605_v50 = vmul.f32 %v4178_v43, %v603_v49 }
 0x1e8   :  { %607 = vrot.lane.b32.xlu0 %v605_v50, %s4344_s30 }
 0x1ee   :  { %v4180_v51 = vpop.eup %4179 }
 0x1ef   :  { %512 = vrot.lane.b32.xlu1 %v4180_v51, %s4345_s21 }
 0x25a   :  { %v608_v52 = vpop.permute.xlu0 %607 }
 0x25b   :  { %v610_v53 = vadd.f32 %v608_v52, %v411_v58  ;;  %v618_v58 = vmul.f32 0.0, %v4178_v43 }
 0x25d   :  { %4181 = vtanh.f32 %v610_v53 }
 0x261   :  { %v513_v55 = vpop.permute.xlu1 %512 }
 0x262   :  { %v515_v57 = vmul.f32 %v513_v55, %v510_v54 }
 0x264   :  { %v4659_v61 = vadd.f32 %v516_v56, %v515_v57 }
 0x266   :  { %629 = vrot.lane.b32.xlu1 %v4659_v61, %s4345_s21 }
 0x267   :  { %v4182_v44 = vpop.eup %4181 }
 0x268   :  { %614 = vrot.lane.b32.xlu0 %v4182_v44, %s4345_s21 }
 0x2d8   :  { %v630_v1 = vpop.permute.xlu1 %629 }
 0x2d9   :  { %3735 = vmatmul.mubr.msk.f32.vlgmr.msra.gmra.mrb[6].mxu0 %vm418_vm4, %v630_v1 }
 0x2da   :  { %v615_v6 = vpop.permute.xlu0 %614  ;;  %3982 = vmatpush3.bf16.msra.mxu0 %v4534_v14  ;;  %3756 = vmatprep.mubr.msk.f32.mxu0 %vm4342_vm0, %v4343_v4 }
 0x2db   :  { %v617_v7 = vmul.f32 %v615_v6, %v612_v3  ;;  %3983 = vmatprep.subr.bf16.mxu0 %v4341_v2 }
 0x2dd   :  { %v4669_v8 = vadd.f32 %v618_v58, %v617_v7 }
 0x2de   :  { %3985 = vmatpush3.bf16.msra.mxu0 %v4560_v20 }
 0x2df   :  { %730 = vrot.lane.b32.xlu0 %v4669_v8, %s4345_s21  ;;  %3992 = vmatprep.subr.bf16.mxu0 %v4341_v2 }
 0x351   :  { %v731_v9 = vpop.permute.xlu0 %730 }
 0x352   :  { %3746 = vmatmul.mubr.msk.f32.vlgmr.msra.gmra.mrb[6].mxu1 %vm418_vm4, %v731_v9 }
 0x353   :  { %3988 = vmatpush3.bf16.msra.mxu1 %v4536_v15  ;;  %3767 = vmatprep.mubr.msk.f32.mxu1 %vm4342_vm0, %v4343_v4 }
 0x354   :  { %3989 = vmatprep.subr.bf16.mxu1 %v4341_v2 }
 0x357   :  { %3991 = vmatpush3.bf16.msra.mxu1 %v4562_v21 }
 0x358   :  { %3998 = vmatprep.subr.bf16.mxu1 %v4341_v2 }
 0x3ac   :  { %v699_v10 = vpop.f32.mrb[6].mxu0 }
 0x3ad   :  { %v700_v12 = vadd.f32 %v4619_v62, %v699_v10  ;;  %v3736_v13 = vpop.f32.mrb[7].mxu0 }
 0x3af   :  { %711 = vrot.lane.b32.xlu1 %v700_v12, %s4344_s30  ;;  %v703_v16 = vadd.f32 %v700_v12, %v4598_v45 }
 0x3b1   :  { %v3445_v17 = vmul.f32 -1.442695, %v703_v16 }
 0x3b3   :  { %4183 = vpow2.f32 %v3445_v17 }
 0x3bd   :  { %v4184_v18 = vpop.eup %4183 }
 0x3be   :  { %v707_v19 = vadd.f32 1.0, %v4184_v18 }
 0x3c0   :  { %4185 = vrcp.f32 %v707_v19 }
 0x3ca   :  { %v4186_v23 = vpop.eup %4185 }
 0x3cb   :  { %v721_v50 = vsub.f32 1.0, %v4186_v23  ;;  %v727_v52 = vmul.f32 %v4186_v23, %v4659_v61 }
 0x421   :  { %v712_v28 = vpop.permute.xlu1 %711 }
 0x422   :  { %v714_v26 = vmul.f32 %v4186_v23, %v712_v28 }
 0x424   :  { %716 = vrot.lane.b32.xlu1 %v714_v26, %s4344_s30 }
 0x425   :  { %v800_v29 = vpop.f32.mrb[6].mxu1 }
 0x426   :  { %v801_v30 = vadd.f32 %v4651_v35, %v800_v29  ;;  %v3747_v31 = vpop.f32.mrb[7].mxu1 }
 0x428   :  { %812 = vrot.lane.b32.xlu0 %v801_v30, %s4344_s30  ;;  %v804_v32 = vadd.f32 %v801_v30, %v4611_v59 }
 0x42a   :  { %v3447_v33 = vmul.f32 -1.442695, %v804_v32 }
 0x42c   :  { %4187 = vpow2.f32 %v3447_v33 }
 0x436   :  { %v4188_v34 = vpop.eup %4187 }
 0x437   :  { %v808_v36 = vadd.f32 1.0, %v4188_v34 }
 0x439   :  { %4189 = vrcp.f32 %v808_v36 }
 0x443   :  { %v4190_v39 = vpop.eup %4189 }
 0x444   :  { %v822_v56 = vsub.f32 1.0, %v4190_v39 }
 0x496   :  { %v717_v37 = vpop.permute.xlu1 %716 }
 0x497   :  { %v719_v38 = vadd.f32 %v717_v37, %v4598_v45 }
 0x499   :  { %4191 = vtanh.f32 %v719_v38 }
 0x49a   :  { %v813_v40 = vpop.permute.xlu0 %812 }
 0x49b   :  { %v815_v41 = vmul.f32 %v4190_v39, %v813_v40 }
 0x49d   :  { %817 = vrot.lane.b32.xlu0 %v815_v41, %s4344_s30 }
 0x4a3   :  { %v4192_v42 = vpop.eup %4191 }
 0x4a4   :  { %723 = vrot.lane.b32.xlu1 %v4192_v42, %s4345_s21 }
 0x50f   :  { %v818_v43 = vpop.permute.xlu0 %817 }
 0x510   :  { %v820_v49 = vadd.f32 %v818_v43, %v4611_v59  ;;  %v828_v59 = vmul.f32 %v4190_v39, %v4669_v8 }
 0x512   :  { %4193 = vtanh.f32 %v820_v49 }
 0x516   :  { %v724_v51 = vpop.permute.xlu1 %723 }
 0x517   :  { %v726_v53 = vmul.f32 %v724_v51, %v721_v50 }
 0x519   :  { %v728_v54 = vadd.f32 %v727_v52, %v726_v53 }
 0x51b   :  { %841 = vrot.lane.b32.xlu1 %v728_v54, %s4345_s21 }
 0x51c   :  { %v4194_v45 = vpop.eup %4193 }
 0x51d   :  { %824 = vrot.lane.b32.xlu0 %v4194_v45, %s4345_s21 }
 0x58d   :  { %v842_v55 = vpop.permute.xlu1 %841 }
 0x58e   :  { %3757 = vmatmul.mubr.msk.f32.vlgmr.msra.gmra.mrb[8].mxu0 %vm418_vm4, %v842_v55 }
 0x58f   :  { %v825_v57 = vpop.permute.xlu0 %824  ;;  %3994 = vmatpush3.bf16.msra.mxu0 %v4534_v14  ;;  %3778 = vmatprep.mubr.msk.f32.mxu0 %vm4342_vm0, %v4343_v4 }
 0x590   :  { %v827_v61 = vmul.f32 %v825_v57, %v822_v56  ;;  %3995 = vmatprep.subr.bf16.mxu0 %v4341_v2 }
 0x592   :  { %v4702_v44 = vadd.f32 %v828_v59, %v827_v61 }
 0x593   :  { %3997 = vmatpush3.bf16.msra.mxu0 %v4560_v20 }
 0x594   :  { %942 = vrot.lane.b32.xlu0 %v4702_v44, %s4345_s21  ;;  %4004 = vmatprep.subr.bf16.mxu0 %v4341_v2 }
 0x606   :  { %v943_v1 = vpop.permute.xlu0 %942 }
 0x607   :  { %3768 = vmatmul.mubr.msk.f32.vlgmr.msra.gmra.mrb[8].mxu1 %vm418_vm4, %v943_v1 }
 0x608   :  { %4000 = vmatpush3.bf16.msra.mxu1 %v4536_v15  ;;  %3789 = vmatprep.mubr.msk.f32.mxu1 %vm4342_vm0, %v4343_v4 }
 0x609   :  { %4001 = vmatprep.subr.bf16.mxu1 %v4341_v2 }
 0x60c   :  { %4003 = vmatpush3.bf16.msra.mxu1 %v4562_v21 }
 0x60d   :  { %4010 = vmatprep.subr.bf16.mxu1 %v4341_v2 }
 0x661   :  { %v911_v3 = vpop.f32.mrb[8].mxu0 }
 0x662   :  { %v912_v6 = vadd.f32 %v4619_v62, %v911_v3  ;;  %v3758_v58 = vpop.f32.mrb[9].mxu0 }
 0x664   :  { %923 = vrot.lane.b32.xlu1 %v912_v6, %s4344_s30  ;;  %v915_v7 = vadd.f32 %v912_v6, %v4601_v46 }
 0x666   :  { %v3449_v9 = vmul.f32 -1.442695, %v915_v7 }
 0x668   :  { %4195 = vpow2.f32 %v3449_v9 }
 0x672   :  { %v4196_v10 = vpop.eup %4195 }
 0x673   :  { %v919_v12 = vadd.f32 1.0, %v4196_v10 }
 0x675   :  { %4197 = vrcp.f32 %v919_v12 }
 0x67f   :  { %v4198_v13 = vpop.eup %4197 }
 0x680   :  { %v933_v40 = vsub.f32 1.0, %v4198_v13  ;;  %v939_v42 = vmul.f32 %v4198_v13, %v728_v54 }
 0x6d6   :  { %v924_v16 = vpop.permute.xlu1 %923 }
 0x6d7   :  { %v926_v17 = vmul.f32 %v4198_v13, %v924_v16 }
 0x6d9   :  { %928 = vrot.lane.b32.xlu1 %v926_v17, %s4344_s30 }
 0x6da   :  { %v1012_v18 = vpop.f32.mrb[8].mxu1 }
 0x6db   :  { %v1013_v19 = vadd.f32 %v4651_v35, %v1012_v18  ;;  %v3769_v23 = vpop.f32.mrb[9].mxu1 }
 0x6dd   :  { %1024 = vrot.lane.b32.xlu0 %v1013_v19, %s4344_s30  ;;  %v1016_v28 = vadd.f32 %v1013_v19, %v4614_v60 }
 0x6df   :  { %v3451_v26 = vmul.f32 -1.442695, %v1016_v28 }
 0x6e1   :  { %4199 = vpow2.f32 %v3451_v26 }
 0x6eb   :  { %v4200_v29 = vpop.eup %4199 }
 0x6ec   :  { %v1020_v30 = vadd.f32 1.0, %v4200_v29 }
 0x6ee   :  { %4201 = vrcp.f32 %v1020_v30 }
 0x6f8   :  { %v4202_v33 = vpop.eup %4201 }
 0x6f9   :  { %v1034_v51 = vsub.f32 1.0, %v4202_v33 }
 0x74b   :  { %v929_v31 = vpop.permute.xlu1 %928 }
 0x74c   :  { %v931_v32 = vadd.f32 %v929_v31, %v4601_v46 }
 0x74e   :  { %4203 = vtanh.f32 %v931_v32 }
 0x74f   :  { %v1025_v34 = vpop.permute.xlu0 %1024 }
 0x750   :  { %v1027_v36 = vmul.f32 %v4202_v33, %v1025_v34 }
 0x752   :  { %1029 = vrot.lane.b32.xlu0 %v1027_v36, %s4344_s30 }
 0x758   :  { %v4204_v37 = vpop.eup %4203 }
 0x759   :  { %935 = vrot.lane.b32.xlu1 %v4204_v37, %s4345_s21 }
 0x7c4   :  { %v1030_v38 = vpop.permute.xlu0 %1029 }
 0x7c5   :  { %v1032_v39 = vadd.f32 %v1030_v38, %v4614_v60  ;;  %v1040_v60 = vmul.f32 %v4202_v33, %v4702_v44 }
 0x7c7   :  { %4205 = vtanh.f32 %v1032_v39 }
 0x7cb   :  { %v936_v41 = vpop.permute.xlu1 %935 }
 0x7cc   :  { %v938_v43 = vmul.f32 %v936_v41, %v933_v40 }
 0x7ce   :  { %v940_v49 = vadd.f32 %v939_v42, %v938_v43 }
 0x7d0   :  { %1053 = vrot.lane.b32.xlu1 %v940_v49, %s4345_s21 }
 0x7d1   :  { %v4206_v46 = vpop.eup %4205 }
 0x7d2   :  { %1036 = vrot.lane.b32.xlu0 %v4206_v46, %s4345_s21 }
 0x842   :  { %v1054_v50 = vpop.permute.xlu1 %1053 }
 0x843   :  { %3779 = vmatmul.mubr.msk.f32.vlgmr.msra.gmra.mrb[10].mxu0 %vm418_vm4, %v1054_v50 }
 0x844   :  { %v1037_v52 = vpop.permute.xlu0 %1036  ;;  %4006 = vmatpush3.bf16.msra.mxu0 %v4534_v14  ;;  %3800 = vmatprep.mubr.msk.f32.mxu0 %vm4342_vm0, %v4343_v4 }
 0x845   :  { %v1039_v53 = vmul.f32 %v1037_v52, %v1034_v51  ;;  %4007 = vmatprep.subr.bf16.mxu0 %v4341_v2 }
 0x847   :  { %v4734_v54 = vadd.f32 %v1040_v60, %v1039_v53 }
 0x848   :  { %4009 = vmatpush3.bf16.msra.mxu0 %v4560_v20 }
 0x849   :  { %1154 = vrot.lane.b32.xlu0 %v4734_v54, %s4345_s21  ;;  %4016 = vmatprep.subr.bf16.mxu0 %v4341_v2 }
 0x8bb   :  { %v1155_v45 = vpop.permute.xlu0 %1154 }
 0x8bc   :  { %3790 = vmatmul.mubr.msk.f32.vlgmr.msra.gmra.mrb[10].mxu1 %vm418_vm4, %v1155_v45 }
 0x8bd   :  { %4012 = vmatpush3.bf16.msra.mxu1 %v4536_v15  ;;  %3811 = vmatprep.mubr.msk.f32.mxu1 %vm4342_vm0, %v4343_v4 }
 0x8be   :  { %4013 = vmatprep.subr.bf16.mxu1 %v4341_v2 }
 0x8c1   :  { %4015 = vmatpush3.bf16.msra.mxu1 %v4562_v21 }
 0x8c2   :  { %4022 = vmatprep.subr.bf16.mxu1 %v4341_v2 }
 0x916   :  { %v1123_v55 = vpop.f32.mrb[10].mxu0 }
 0x917   :  { %v1124_v56 = vadd.f32 %v4619_v62, %v1123_v55  ;;  %v3780_v57 = vpop.f32.mrb[11].mxu0 }
 0x919   :  { %1135 = vrot.lane.b32.xlu1 %v1124_v56, %s4344_s30  ;;  %v1127_v59 = vadd.f32 %v1124_v56, %v4604_v47 }
 0x91b   :  { %v3453_v61 = vmul.f32 -1.442695, %v1127_v59 }
 0x91d   :  { %4207 = vpow2.f32 %v3453_v61 }
 0x927   :  { %v4208_v1 = vpop.eup %4207 }
 0x928   :  { %v1131_v3 = vadd.f32 1.0, %v4208_v1 }
 0x92a   :  { %4209 = vrcp.f32 %v1131_v3 }
 0x934   :  { %v4210_v6 = vpop.eup %4209 }
 0x935   :  { %v1145_v33 = vsub.f32 1.0, %v4210_v6  ;;  %v1151_v36 = vmul.f32 %v4210_v6, %v940_v49 }
 0x98b   :  { %v1136_v58 = vpop.permute.xlu1 %1135 }
 0x98c   :  { %v1138_v7 = vmul.f32 %v4210_v6, %v1136_v58 }
 0x98e   :  { %1140 = vrot.lane.b32.xlu1 %v1138_v7, %s4344_s30 }
 0x98f   :  { %v1224_v9 = vpop.f32.mrb[10].mxu1 }
 0x990   :  { %v1225_v10 = vadd.f32 %v4651_v35, %v1224_v9  ;;  %v3791_v12 = vpop.f32.mrb[11].mxu1 }
 0x992   :  { %1236 = vrot.lane.b32.xlu0 %v1225_v10, %s4344_s30  ;;  %v1228_v13 = vadd.f32 %v1225_v10, %v4622_v63 }
 0x994   :  { %v3455_v16 = vmul.f32 -1.442695, %v1228_v13 }
 0x996   :  { %4211 = vpow2.f32 %v3455_v16 }
 0x9a0   :  { %v4212_v17 = vpop.eup %4211 }
 0x9a1   :  { %v1232_v18 = vadd.f32 1.0, %v4212_v17 }
 0x9a3   :  { %4213 = vrcp.f32 %v1232_v18 }
 0x9ad   :  { %v4214_v28 = vpop.eup %4213 }
 0x9ae   :  { %v1246_v40 = vsub.f32 1.0, %v4214_v28 }
 0xa00   :  { %v1141_v19 = vpop.permute.xlu1 %1140 }
 0xa01   :  { %v1143_v23 = vadd.f32 %v1141_v19, %v4604_v47 }
 0xa03   :  { %4215 = vtanh.f32 %v1143_v23 }
 0xa04   :  { %v1237_v26 = vpop.permute.xlu0 %1236 }
 0xa05   :  { %v1239_v29 = vmul.f32 %v4214_v28, %v1237_v26 }
 0xa07   :  { %1241 = vrot.lane.b32.xlu0 %v1239_v29, %s4344_s30 }
 0xa0d   :  { %v4216_v30 = vpop.eup %4215 }
 0xa0e   :  { %1147 = vrot.lane.b32.xlu1 %v4216_v30, %s4345_s21 }
 0xa79   :  { %v1242_v31 = vpop.permute.xlu0 %1241 }
 0xa7a   :  { %v1244_v32 = vadd.f32 %v1242_v31, %v4622_v63  ;;  %v1252_v63 = vmul.f32 %v4214_v28, %v4734_v54 }
 0xa7c   :  { %4217 = vtanh.f32 %v1244_v32 }
 0xa80   :  { %v1148_v34 = vpop.permute.xlu1 %1147 }
 0xa81   :  { %v1150_v37 = vmul.f32 %v1148_v34, %v1145_v33 }
 0xa83   :  { %v1152_v38 = vadd.f32 %v1151_v36, %v1150_v37 }
 0xa85   :  { %1265 = vrot.lane.b32.xlu1 %v1152_v38, %s4345_s21 }
 0xa86   :  { %v4218_v47 = vpop.eup %4217 }
 0xa87   :  { %1248 = vrot.lane.b32.xlu0 %v4218_v47, %s4345_s21 }
 0xaf7   :  { %v1266_v39 = vpop.permute.xlu1 %1265 }
 0xaf8   :  { %3801 = vmatmul.mubr.msk.f32.vlgmr.msra.gmra.mrb[12].mxu0 %vm418_vm4, %v1266_v39 }
 0xaf9   :  { %v1249_v41 = vpop.permute.xlu0 %1248  ;;  %4018 = vmatpush3.bf16.msra.mxu0 %v4534_v14  ;;  %3822 = vmatprep.mubr.msk.f32.mxu0 %vm4342_vm0, %v4343_v4 }
 0xafa   :  { %v1251_v42 = vmul.f32 %v1249_v41, %v1246_v40  ;;  %4019 = vmatprep.subr.bf16.mxu0 %v4341_v2 }
 0xafc   :  { %v4766_v43 = vadd.f32 %v1252_v63, %v1251_v42 }
 0xafd   :  { %4021 = vmatpush3.bf16.msra.mxu0 %v4560_v20 }
 0xafe   :  { %1366 = vrot.lane.b32.xlu0 %v4766_v43, %s4345_s21  ;;  %4028 = vmatprep.subr.bf16.mxu0 %v4341_v2 }
 0xb70   :  { %v1367_v49 = vpop.permute.xlu0 %1366 }
 0xb71   :  { %3812 = vmatmul.mubr.msk.f32.vlgmr.msra.gmra.mrb[12].mxu1 %vm418_vm4, %v1367_v49 }
 0xb72   :  { %4024 = vmatpush3.bf16.msra.mxu1 %v4536_v15  ;;  %3833 = vmatprep.mubr.msk.f32.mxu1 %vm4342_vm0, %v4343_v4 }
 0xb73   :  { %4025 = vmatprep.subr.bf16.mxu1 %v4341_v2 }
 0xb76   :  { %4027 = vmatpush3.bf16.msra.mxu1 %v4562_v21 }
 0xb77   :  { %4034 = vmatprep.subr.bf16.mxu1 %v4341_v2 }
 0xbcb   :  { %v1335_v46 = vpop.f32.mrb[12].mxu0 }
 0xbcc   :  { %v1336_v50 = vadd.f32 %v4619_v62, %v1335_v46  ;;  %v3802_v51 = vpop.f32.mrb[13].mxu0 }
 0xbce   :  { %1347 = vrot.lane.b32.xlu1 %v1336_v50, %s4344_s30  ;;  %v1339_v52 = vadd.f32 %v1336_v50, %v4607_v48 }
 0xbd0   :  { %v3457_v60 = vmul.f32 -1.442695, %v1339_v52 }
 0xbd2   :  { %4219 = vpow2.f32 %v3457_v60 }
 0xbdc   :  { %v4220_v53 = vpop.eup %4219 }
 0xbdd   :  { %v1343_v45 = vadd.f32 1.0, %v4220_v53 }
 0xbdf   :  { %4221 = vrcp.f32 %v1343_v45 }
 0xbe9   :  { %v4222_v55 = vpop.eup %4221 }
 0xbea   :  { %v1357_v23 = vsub.f32 1.0, %v4222_v55  ;;  %v1363_v26 = vmul.f32 %v4222_v55, %v1152_v38 }
 0xc40   :  { %v1348_v56 = vpop.permute.xlu1 %1347 }
 0xc41   :  { %v1350_v57 = vmul.f32 %v4222_v55, %v1348_v56 }
 0xc43   :  { %1352 = vrot.lane.b32.xlu1 %v1350_v57, %s4344_s30 }
 0xc44   :  { %v1436_v59 = vpop.f32.mrb[12].mxu1 }
 0xc45   :  { %v1437_v61 = vadd.f32 %v4651_v35, %v1436_v59  ;;  %v3813_v1 = vpop.f32.mrb[13].mxu1 }
 0xc47   :  { %1448 = vrot.lane.b32.xlu0 %v1437_v61, %s4344_s30  ;;  %v1440_v3 = vadd.f32 %v1437_v61, %v4625_v0 }
 0xc49   :  { %v3459_v6 = vmul.f32 -1.442695, %v1440_v3 }
 0xc4b   :  { %4223 = vpow2.f32 %v3459_v6 }
 0xc55   :  { %v4224_v58 = vpop.eup %4223 }
 0xc56   :  { %v1444_v7 = vadd.f32 1.0, %v4224_v58 }
 0xc58   :  { %4225 = vrcp.f32 %v1444_v7 }
 0xc62   :  { %v4226_v12 = vpop.eup %4225 }
 0xc63   :  { %v1458_v32 = vsub.f32 1.0, %v4226_v12 }
 0xcb5   :  { %v1353_v9 = vpop.permute.xlu1 %1352 }
 0xcb6   :  { %v1355_v10 = vadd.f32 %v1353_v9, %v4607_v48 }
 0xcb8   :  { %4227 = vtanh.f32 %v1355_v10 }
 0xcb9   :  { %v1449_v13 = vpop.permute.xlu0 %1448 }
 0xcba   :  { %v1451_v16 = vmul.f32 %v4226_v12, %v1449_v13 }
 0xcbc   :  { %1453 = vrot.lane.b32.xlu0 %v1451_v16, %s4344_s30 }
 0xcc2   :  { %v4228_v17 = vpop.eup %4227 }
 0xcc3   :  { %1359 = vrot.lane.b32.xlu1 %v4228_v17, %s4345_s21 }
 0xd2e   :  { %v1454_v18 = vpop.permute.xlu0 %1453 }
 0xd2f   :  { %v1456_v19 = vadd.f32 %v1454_v18, %v4625_v0  ;;  %v1464_v0 = vmul.f32 %v4226_v12, %v4766_v43 }
 0xd31   :  { %4229 = vtanh.f32 %v1456_v19 }
 0xd35   :  { %v1360_v28 = vpop.permute.xlu1 %1359 }
 0xd36   :  { %v1362_v29 = vmul.f32 %v1360_v28, %v1357_v23 }
 0xd38   :  { %v1364_v30 = vadd.f32 %v1363_v26, %v1362_v29 }
 0xd3a   :  { %1477 = vrot.lane.b32.xlu1 %v1364_v30, %s4345_s21 }
 0xd3b   :  { %v4230_v48 = vpop.eup %4229 }
 0xd3c   :  { %1460 = vrot.lane.b32.xlu0 %v4230_v48, %s4345_s21 }
 0xdac   :  { %v1478_v31 = vpop.permute.xlu1 %1477 }
 0xdad   :  { %3823 = vmatmul.mubr.msk.f32.vlgmr.msra.gmra.mrb[14].mxu0 %vm418_vm4, %v1478_v31 }
 0xdae   :  { %v1461_v33 = vpop.permute.xlu0 %1460  ;;  %4030 = vmatpush3.bf16.msra.mxu0 %v4534_v14  ;;  %3844 = vmatprep.mubr.msk.f32.mxu0 %vm4342_vm0, %v4343_v4 }
 0xdaf   :  { %v1463_v34 = vmul.f32 %v1461_v33, %v1458_v32  ;;  %4031 = vmatprep.subr.bf16.mxu0 %v4341_v2 }
 0xdb1   :  { %v4798_v36 = vadd.f32 %v1464_v0, %v1463_v34 }
 0xdb2   :  { %4033 = vmatpush3.bf16.msra.mxu0 %v4560_v20 }
 0xdb3   :  { %1578 = vrot.lane.b32.xlu0 %v4798_v36, %s4345_s21  ;;  %4040 = vmatprep.subr.bf16.mxu0 %v4341_v2 }
 0xe25   :  { %v1579_v37 = vpop.permute.xlu0 %1578 }
 0xe26   :  { %3834 = vmatmul.mubr.msk.f32.vlgmr.msra.gmra.mrb[14].mxu1 %vm418_vm4, %v1579_v37 }
 0xe27   :  { %4036 = vmatpush3.bf16.msra.mxu1 %v4536_v15  ;;  %3855 = vmatprep.mubr.msk.f32.mxu1 %vm4342_vm0, %v4343_v4 }
 0xe28   :  { %4037 = vmatprep.subr.bf16.mxu1 %v4341_v2 }
 0xe2b   :  { %4039 = vmatpush3.bf16.msra.mxu1 %v4562_v21 }
 0xe2c   :  { %4046 = vmatprep.subr.bf16.mxu1 %v4341_v2 }
 0xe80   :  { %v1547_v38 = vpop.f32.mrb[14].mxu0 }
 0xe81   :  { %v1548_v47 = vadd.f32 %v4619_v62, %v1547_v38  ;;  %v3824_v39 = vpop.f32.mrb[15].mxu0 }
 0xe83   :  { %1559 = vrot.lane.b32.xlu1 %v1548_v47, %s4344_s30  ;;  %v1551_v40 = vadd.f32 %v1548_v47, %v4628_v5 }
 0xe85   :  { %v3461_v41 = vmul.f32 -1.442695, %v1551_v40 }
 0xe87   :  { %4231 = vpow2.f32 %v3461_v41 }
 0xe91   :  { %v4232_v63 = vpop.eup %4231 }
 0xe92   :  { %v1555_v42 = vadd.f32 1.0, %v4232_v63 }
 0xe94   :  { %4233 = vrcp.f32 %v1555_v42 }
 0xe9e   :  { %v4234_v49 = vpop.eup %4233 }
 0xe9f   :  { %v1569_v9 = vsub.f32 1.0, %v4234_v49  ;;  %v1575_v12 = vmul.f32 %v4234_v49, %v1364_v30 }
 0xef5   :  { %v1560_v46 = vpop.permute.xlu1 %1559 }
 0xef6   :  { %v1562_v50 = vmul.f32 %v4234_v49, %v1560_v46 }
 0xef8   :  { %1564 = vrot.lane.b32.xlu1 %v1562_v50, %s4344_s30 }
 0xef9   :  { %v1648_v51 = vpop.f32.mrb[14].mxu1 }
 0xefa   :  { %v1649_v52 = vadd.f32 %v4651_v35, %v1648_v51  ;;  %v3835_v60 = vpop.f32.mrb[15].mxu1 }
 0xefc   :  { %1660 = vrot.lane.b32.xlu0 %v1649_v52, %s4344_s30  ;;  %v1652_v53 = vadd.f32 %v1649_v52, %v4631_v11 }
 0xefe   :  { %v3463_v45 = vmul.f32 -1.442695, %v1652_v53 }
 0xf00   :  { %4235 = vpow2.f32 %v3463_v45 }
 0xf0a   :  { %v4236_v55 = vpop.eup %4235 }
 0xf0b   :  { %v1656_v56 = vadd.f32 1.0, %v4236_v55 }
 0xf0d   :  { %4237 = vrcp.f32 %v1656_v56 }
 0xf17   :  { %v4238_v61 = vpop.eup %4237 }
 0xf18   :  { %v1670_v18 = vsub.f32 1.0, %v4238_v61 }
 0xf6a   :  { %v1565_v57 = vpop.permute.xlu1 %1564 }
 0xf6b   :  { %v1567_v59 = vadd.f32 %v1565_v57, %v4628_v5 }
 0xf6d   :  { %4239 = vtanh.f32 %v1567_v59 }
 0xf6e   :  { %v1661_v1 = vpop.permute.xlu0 %1660 }
 0xf6f   :  { %v1663_v3 = vmul.f32 %v4238_v61, %v1661_v1 }
 0xf71   :  { %1665 = vrot.lane.b32.xlu0 %v1663_v3, %s4344_s30 }
 0xf77   :  { %v4240_v6 = vpop.eup %4239 }
 0xf78   :  { %1571 = vrot.lane.b32.xlu1 %v4240_v6, %s4345_s21 }
 0xfe3   :  { %v1666_v58 = vpop.permute.xlu0 %1665 }
 0xfe4   :  { %v1668_v7 = vadd.f32 %v1666_v58, %v4631_v11  ;;  %v1676_v11 = vmul.f32 %v4238_v61, %v4798_v36 }
 0xfe6   :  { %4241 = vtanh.f32 %v1668_v7 }
 0xfea   :  { %v1572_v10 = vpop.permute.xlu1 %1571 }
 0xfeb   :  { %v1574_v13 = vmul.f32 %v1572_v10, %v1569_v9 }
 0xfed   :  { %v1576_v16 = vadd.f32 %v1575_v12, %v1574_v13 }
 0xfef   :  { %1689 = vrot.lane.b32.xlu1 %v1576_v16, %s4345_s21 }
 0xff0   :  { %v4242_v5 = vpop.eup %4241 }
 0xff1   :  { %1672 = vrot.lane.b32.xlu0 %v4242_v5, %s4345_s21 }
0x1061   :  { %v1690_v17 = vpop.permute.xlu1 %1689 }
0x1062   :  { %3845 = vmatmul.mubr.msk.f32.vlgmr.msra.gmra.mrb[16].mxu0 %vm418_vm4, %v1690_v17 }
0x1063   :  { %v1673_v19 = vpop.permute.xlu0 %1672  ;;  %4042 = vmatpush3.bf16.msra.mxu0 %v4534_v14  ;;  %3866 = vmatprep.mubr.msk.f32.mxu0 %vm4342_vm0, %v4343_v4 }
0x1064   :  { %v1675_v23 = vmul.f32 %v1673_v19, %v1670_v18  ;;  %4043 = vmatprep.subr.bf16.mxu0 %v4341_v2 }
0x1066   :  { %v4830_v28 = vadd.f32 %v1676_v11, %v1675_v23 }
0x1067   :  { %4045 = vmatpush3.bf16.msra.mxu0 %v4560_v20 }
0x1068   :  { %1790 = vrot.lane.b32.xlu0 %v4830_v28, %s4345_s21  ;;  %4052 = vmatprep.subr.bf16.mxu0 %v4341_v2 }
0x10da   :  { %v1791_v26 = vpop.permute.xlu0 %1790 }
0x10db   :  { %3856 = vmatmul.mubr.msk.f32.vlgmr.msra.gmra.mrb[16].mxu1 %vm418_vm4, %v1791_v26 }
0x10dc   :  { %4048 = vmatpush3.bf16.msra.mxu1 %v4536_v15  ;;  %3877 = vmatprep.mubr.msk.f32.mxu1 %vm4342_vm0, %v4343_v4 }
0x10dd   :  { %4049 = vmatprep.subr.bf16.mxu1 %v4341_v2 }
0x10e0   :  { %4051 = vmatpush3.bf16.msra.mxu1 %v4562_v21 }
0x10e1   :  { %4058 = vmatprep.subr.bf16.mxu1 %v4341_v2 }
0x1135   :  { %v1759_v14 = vpop.f32.mrb[16].mxu0 }
0x1136   :  { %v1760_v20 = vadd.f32 %v4619_v62, %v1759_v14  ;;  %v3846_v29 = vpop.f32.mrb[17].mxu0  ;;  %v2102_v14 = vld [vmem:[%s5360_s5] sm:$0xff] }
0x1137   :  { %v2181_v29 = vld [vmem:[%s5361_s1] sm:$0xff] }
0x1138   :  { %1771 = vrot.lane.b32.xlu1 %v1760_v20, %s4344_s30  ;;  %v1763_v30 = vadd.f32 %v1760_v20, %v4635_v22  ;;  %v2103_v20 = vld [vmem:[%s5360_s5 + $0x8] sm:$0xff] }
0x113a   :  { %v3465_v48 = vmul.f32 -1.442695, %v1763_v30  ;;  %v2182_v30 = vld [vmem:[%s5361_s1 + $0x8] sm:$0xff] }
0x113c   :  { %4243 = vpow2.f32 %v3465_v48  ;;  %v2105_v48 = vld [vmem:[%s5360_s5 + $0x18] sm:$0xff] }
0x1146   :  { %v4244_v15 = vpop.eup %4243 }
0x1147   :  { %v1767_v31 = vadd.f32 1.0, %v4244_v15  ;;  %v4059_v15 = vpack.c.bf16 %v2182_v30, %v2181_v29 }
0x1149   :  { %4245 = vrcp.f32 %v1767_v31  ;;  %v2183_v31 = vld [vmem:[%s5361_s1 + $0x10] sm:$0xff] }
0x1153   :  { %v4246_v32 = vpop.eup %4245 }
0x1154   :  { %v1781_v60 = vsub.f32 1.0, %v4246_v32  ;;  %v1787_v45 = vmul.f32 %v4246_v32, %v1576_v16 }
0x11aa   :  { %v1772_v33 = vpop.permute.xlu1 %1771 }
0x11ab   :  { %v1774_v0 = vmul.f32 %v4246_v32, %v1772_v33  ;;  %v2184_v32 = vld [vmem:[%s5361_s1 + $0x18] sm:$0xff]  ;;  %s4357_s1 = smov 116  }
0x11ad   :  { %1776 = vrot.lane.b32.xlu1 %v1774_v0, %s4344_s30 }
0x11ae   :  { %v1860_v21 = vpop.f32.mrb[16].mxu1 }
0x11af   :  { %v1861_v34 = vadd.f32 %v4651_v35, %v1860_v21  ;;  %v3857_v37 = vpop.f32.mrb[17].mxu1  ;;  %v4062_v21 = vpack.c.bf16 %v2184_v32, %v2183_v31 }
0x11b1   :  { %1872 = vrot.lane.b32.xlu0 %v1861_v34, %s4344_s30  ;;  %v1864_v38 = vadd.f32 %v1861_v34, %v4638_v24 }
0x11b3   :  { %v3467_v47 = vmul.f32 -1.442695, %v1864_v38 }
0x11b5   :  { %4247 = vpow2.f32 %v3467_v47 }
0x11bf   :  { %v4248_v39 = vpop.eup %4247 }
0x11c0   :  { %v1868_v40 = vadd.f32 1.0, %v4248_v39 }
0x11c2   :  { %4249 = vrcp.f32 %v1868_v40 }
0x11cc   :  { %v4250_v42 = vpop.eup %4249 }
0x11cd   :  { %v1882_v59 = vsub.f32 1.0, %v4250_v42 }
0x121f   :  { %v1777_v41 = vpop.permute.xlu1 %1776 }
0x1220   :  { %v1779_v63 = vadd.f32 %v1777_v41, %v4635_v22 }
0x1222   :  { %4251 = vtanh.f32 %v1779_v63 }
0x1223   :  { %v1873_v49 = vpop.permute.xlu0 %1872 }
0x1224   :  { %v1875_v46 = vmul.f32 %v4250_v42, %v1873_v49 }
0x1226   :  { %1877 = vrot.lane.b32.xlu0 %v1875_v46, %s4344_s30 }
0x122c   :  { %v4252_v50 = vpop.eup %4251 }
0x122d   :  { %1783 = vrot.lane.b32.xlu1 %v4252_v50, %s4345_s21 }
0x1298   :  { %v1878_v51 = vpop.permute.xlu0 %1877 }
0x1299   :  { %v1880_v52 = vadd.f32 %v1878_v51, %v4638_v24  ;;  %v1888_v24 = vmul.f32 %v4250_v42, %v4830_v28 }
0x129b   :  { %4253 = vtanh.f32 %v1880_v52  ;;  %v2270_v52 = vld [vmem:[%s5324_s10] sm:$0xff]  ;;  %s5362_s10 = sld [smem:[#allocation11_spill]] }
0x129f   :  { %v1784_v53 = vpop.permute.xlu1 %1783 }
0x12a0   :  { %v1786_v55 = vmul.f32 %v1784_v53, %v1781_v60  ;;  %v3473_v60 = vld [vmem:[%s5323_s9] ss:$0 sm:$0xff]  ;;  %s4356_s9 = smov 117  }
0x12a2   :  { %v4854_v56 = vadd.f32 %v1787_v45, %v1786_v55 }
0x12a4   :  { %1901 = vrot.lane.b32.xlu1 %v4854_v56, %s4345_s21 }
0x12a5   :  { %v4254_v22 = vpop.eup %4253 }
0x12a6   :  { %1884 = vrot.lane.b32.xlu0 %v4254_v22, %s4345_s21 }
0x1316   :  { %v1902_v57 = vpop.permute.xlu1 %1901 }
0x1317   :  { %3867 = vmatmul.mubr.msk.f32.vlgmr.msra.gmra.mrb[18].mxu0 %vm418_vm4, %v1902_v57 }
0x1318   :  { %v1885_v61 = vpop.permute.xlu0 %1884  ;;  %3888 = vmatprep.mubr.msk.f32.mxu0 %vm4342_vm0, %v4343_v4 }
0x1319   :  { %v1887_v1 = vmul.f32 %v1885_v61, %v1882_v59  ;;  %v2265_v59 = vld [vmem:[%s5362_s10] sm:$0x3]  ;;  %s4355_s10 = smov 118  }
0x131b   :  { %v4863_v3 = vadd.f32 %v1888_v24, %v1887_v1 }
0x131d   :  { %2002 = vrot.lane.b32.xlu0 %v4863_v3, %s4345_s21 }
0x138f   :  { %v2003_v6 = vpop.permute.xlu0 %2002 }
0x1390   :  { %3878 = vmatmul.mubr.msk.f32.vlgmr.msra.gmra.mrb[18].mxu1 %vm418_vm4, %v2003_v6  ;;  %v2352_v6 = vld [vmem:[%s5326_s12] sm:$0xff] }
0x1391   :  { %3899 = vmatprep.mubr.msk.f32.mxu1 %vm4342_vm0, %v4343_v4  ;;  %4060 = vmatpush3.bf16.msra.mxu1 %v4059_v15 }
0x1392   :  { %4061 = vmatprep.subr.bf16.mxu1 %v4341_v2 }
0x1395   :  { %4063 = vmatpush3.bf16.msra.mxu1 %v4062_v21 }
0x1396   :  { %4064 = vmatprep.subr.bf16.mxu1 %v4341_v2 }
0x13ea   :  { %v1971_v58 = vpop.f32.mrb[18].mxu0 }
0x13eb   :  { %v1972_v7 = vadd.f32 %v4619_v62, %v1971_v58  ;;  %v3868_v9 = vpop.f32.mrb[19].mxu0  ;;  %v2353_v58 = vld [vmem:[%s5326_s12 + $0x8] sm:$0xff] }
0x13ec   :  { %v4065_v9 = vpack.c.bf16 %v2353_v58, %v2352_v6 }
0x13ed   :  { %1983 = vrot.lane.b32.xlu1 %v1972_v7, %s4344_s30  ;;  %v1975_v10 = vadd.f32 %v1972_v7, %v4641_v27  ;;  %v2354_v7 = vld [vmem:[%s5326_s12 + $0x10] sm:$0xff] }
0x13ef   :  { %v3469_v12 = vmul.f32 -1.442695, %v1975_v10  ;;  %v2355_v10 = vld [vmem:[%s5326_s12 + $0x18] sm:$0xff] }
0x13f1   :  { %4255 = vpow2.f32 %v3469_v12  ;;  %v4068_v12 = vpack.c.bf16 %v2355_v10, %v2354_v7  ;;  %v3033_v7 = vrot.slane %v4766_v43, 5 }
0x13fb   :  { %v4256_v13 = vpop.eup %4255 }
0x13fc   :  { %v1979_v16 = vadd.f32 1.0, %v4256_v13  ;;  %v3475_v13 = vld [vmem:[%s5325_s11] ss:$0 sm:$0xff]  ;;  %s4347_s11 = smov 127  }
0x13fe   :  { %4257 = vrcp.f32 %v1979_v16 }
0x1408   :  { %v4258_v5 = vpop.eup %4257 }
0x1409   :  { %v1993_v39 = vsub.f32 1.0, %v4258_v5  ;;  %v1999_v41 = vmul.f32 %v4258_v5, %v4854_v56 }
0x145f   :  { %v1984_v17 = vpop.permute.xlu1 %1983 }
0x1460   :  { %v1986_v18 = vmul.f32 %v4258_v5, %v1984_v17 }
0x1462   :  { %1988 = vrot.lane.b32.xlu1 %v1986_v18, %s4344_s30 }
0x1463   :  { %v2072_v19 = vpop.f32.mrb[18].mxu1 }
0x1464   :  { %v2073_v11 = vadd.f32 %v4651_v35, %v2072_v19  ;;  %v3879_v23 = vpop.f32.mrb[19].mxu1  ;;  %v4053_v35 = vpack.c.bf16 %v2103_v20, %v2102_v14  ;;  %v3477_v19 = vld [vmem:[%s5327_s13] ss:$0 sm:$0xff]  ;;  %s4353_s13 = smov 124  }
0x1466   :  { %2084 = vrot.lane.b32.xlu0 %v2073_v11, %s4344_s30  ;;  %4054 = vmatpush3.bf16.msra.mxu0 %v4053_v35  ;;  %v2076_v34 = vadd.f32 %v2073_v11, %v4645_v25 }
0x1467   :  { %4055 = vmatprep.subr.bf16.mxu0 %v4341_v2 }
0x1468   :  { %v3471_v37 = vmul.f32 -1.442695, %v2076_v34 }
0x14d4   :  { %v1989_v62 = vpop.permute.xlu1 %1988 }
0x14d5   :  { %v1991_v26 = vadd.f32 %v1989_v62, %v4641_v27  ;;  %v2104_v27 = vld [vmem:[%s5360_s5 + $0x10] sm:$0xff]  ;;  %s4348_s5 = smov 122  }
0x14d6   :  { %v4056_v33 = vpack.c.bf16 %v2105_v48, %v2104_v27 }
0x14d7   :  { %4259 = vtanh.f32 %v1991_v26 }
0x14d8   :  { %4057 = vmatpush3.bf16.msra.mxu0 %v4056_v33  ;;  %4261 = vpow2.f32 %v3471_v37  ;;  %v2085_v49 = vpop.permute.xlu0 %2084 }
0x14d9   :  { %3902 = vmatprep.subr.mxu0 %v4343_v4 }
0x14e1   :  { %v4260_v0 = vpop.eup %4259 }
0x14e2   :  { %1995 = vrot.lane.b32.xlu1 %v4260_v0, %s4345_s21  ;;  %v4262_v38 = vpop.eup %4261 }
0x14e3   :  { %v2080_v47 = vadd.f32 1.0, %v4262_v38 }
0x14e5   :  { %4263 = vrcp.f32 %v2080_v47 }
0x14ef   :  { %v4909_v46 = vpop.eup %4263 }
0x14f0   :  { %v2087_v50 = vmul.f32 %v4909_v46, %v2085_v49 }
0x1554   :  { %v1996_v40 = vpop.permute.xlu1 %1995 }
0x1555   :  { %v1998_v63 = vmul.f32 %v1996_v40, %v1993_v39 }
0x1557   :  { %v2000_v42 = vadd.f32 %v1999_v41, %v1998_v63 }
0x1559   :  { %2107 = vrot.lane.b32.xlu1 %v2000_v42, %s4345_s21 }
0x155d   :  { %2089 = vrot.lane.b32.xlu1 %v2087_v50, %s4344_s30  ;;  %s4351_s30 = smov 125  }
0x15cb   :  { %v2108_v51 = vpop.permute.xlu1 %2107 }
0x15cc   :  { %3889 = vmatmul.mubr.msk.f32.vlgmr.msra.gmra.mrb[20].mxu0 %vm418_vm4, %v2108_v51  ;;  %3900 = vmatmul.mubr.msk.f32.vlgmr.msra.gmra.mrb[20].mxu1 %vm418_vm4, %v2108_v51 }
0x15cd   :  { %3904 = vmatprep.mubr.msk.f32.mxu0 %vm4342_vm0, %v4343_v4  ;;  %3915 = vmatprep.mubr.msk.f32.mxu1 %vm4342_vm0, %v4343_v4 }
0x15ce   :  { %3903 = vmatpush3.msra.mxu0 %v2270_v52  ;;  %4066 = vmatpush3.bf16.msra.mxu1 %v4065_v9  ;;  %v3218_v9 = vrot.slane %v4798_v36, 5 }
0x15cf   :  { %3918 = vmatprep.subr.mxu0 %v4343_v4  ;;  %4067 = vmatprep.subr.bf16.mxu1 %v4341_v2  ;;  %v2090_v14 = vpop.permute.xlu1 %2089 }
0x15d0   :  { %v2092_v20 = vadd.f32 %v2090_v14, %v4645_v25  ;;  %v2445_v14 = vld [vmem:[%s5329_s15] sm:$0xff] }
0x15d2   :  { %4069 = vmatpush3.bf16.msra.mxu1 %v4068_v12  ;;  %v3220_v12 = vrot.slane %v4830_v28, 4 }
0x15d3   :  { %3934 = vmatprep.subr.mxu1 %v4343_v4 }
0x169f   :  { %v2177_v53 = vpop.f32.mrb[20].mxu0  ;;  %v2258_v45 = vpop.f32.mrb[20].mxu1 }
0x16a0   :  { %v2259_v55 = vadd.f32 %v3473_v60, %v2258_v45  ;;  %v3890_v56 = vpop.f32.mrb[21].mxu0  ;;  %v3901_v22 = vpop.f32.mrb[21].mxu1  ;;  %2263 = vst.msk [vmem:[#allocation4] sm:$0x3] %vm2262_vm5, %v2177_v53  ;;  %v3029_v45 = vrot.slane %v4702_v44, 7 }
0x16a1   :  { %v3214_v22 = vrot.slane %v4734_v54, 7 }
0x16a2   :  { %v2266_v57 = vmul.f32 1.442695, %v2259_v55  ;;  %2264 = vst.msk [vmem:[#allocation6] sm:$0x3] %vm2262_vm5, %v2259_v55 }
0x16a4   :  { %4265 = vpow2.f32 %v2266_v57  ;;  %v3212_v57 = vrot.slane %v4669_v8, 1 }
0x16ae   :  { %v4266_v61 = vpop.eup %4265 }
0x16af   :  { %v2268_v24 = vmul.f32 %v4266_v61, %v2265_v59  ;;  %v3044_v59 = vsel %vm406_vm3, %v4669_v8, %v3029_v45  ;;  %v3226_v61 = vsel %vm406_vm3, %v3212_v57, %v4702_v44  ;;  %v3035_v8 = vrot.slane %v4798_v36, 4  ;;  %v3483_v45 = vld [vmem:[%s5329_s15 + $0x8] sm:$0xff] }
0x16b0   :  { %v3227_v10 = vsel %vm3045_vm6, %v3226_v61, %v3214_v22  ;;  %v3037_v44 = vrot.slane %v4830_v28, 3  ;;  %v2442_v28 = vld [vmem:[%s5328_s14 + $0x8] sm:$0xff] }
0x16b1   :  { %v2269_v1 = vadd.f32 %v2268_v24, %v2177_v53  ;;  %v3031_v24 = vrot.slane %v4734_v54, 6  ;;  %v2441_v54 = vld [vmem:[%s5328_s14] sm:$0xff] }
0x16b3   :  { %3905 = vmatmul.mubr.msk.f32.vlgmr.msra.gmra.mrb[22].mxu0 %vm254_vm2, %v2269_v1  ;;  %v3216_v1 = vrot.slane %v4766_v43, 6 }
0x16b4   :  { %3920 = vmatprep.mubr.msk.f32.mxu0 %vm4342_vm0, %v4343_v4 }
0x16b5   :  { %v3228_v36 = vsel %vm3047_vm7, %v3227_v10, %v3216_v1 }
0x1786   :  { %v2347_v16 = vpop.f32.mrb[22].mxu0 }
0x1787   :  { %v2348_v5 = vadd.f32 %v3475_v13, %v2347_v16  ;;  %v3906_v17 = vpop.f32.mrb[23].mxu0  ;;  %v2094_v13 = vsub.f32 1.0, %v4909_v46  ;;  %v3222_v16 = vrot.slane %v4863_v3, 3 }
0x1788   :  { %v3046_v17 = vsel %vm3045_vm6, %v3044_v59, %v3031_v24 }
0x1789   :  { %4267 = vtanh.f32 %v2348_v5 }
0x178a   :  { %4269 = vtanh.f32 %v2092_v20 }
0x1793   :  { %v4268_v18 = vpop.eup %4267 }
0x1794   :  { %3916 = vmatmul.mubr.msk.f32.vlgmr.msra.gmra.mrb[22].mxu1 %vm418_vm4, %v4268_v18  ;;  %v4270_v29 = vpop.eup %4269  ;;  %v2443_v18 = vld [vmem:[%s5328_s14 + $0x10] sm:$0xff] }
0x1795   :  { %3936 = vmatprep.mubr.msk.f32.mxu1 %vm4342_vm0, %v4343_v4 }
0x1867   :  { %v2432_v11 = vpop.f32.mrb[22].mxu1 }
0x1868   :  { %v2433_v23 = vadd.f32 %v3477_v19, %v2432_v11  ;;  %v3917_v62 = vpop.f32.mrb[23].mxu1  ;;  %v2444_v19 = vld [vmem:[%s5328_s14 + $0x18] sm:$0xff]  ;;  %v2100_v11 = vmul.f32 %v4909_v46, %v4863_v3  ;;  %v2436_v46 = vld [vmem:[%s5330_s16] sm:$0xff] }
0x1869   :  { %v3229_v62 = vsel %vm3049_vm8, %v3228_v36, %v3218_v9  ;;  %v3484_v36 = vld [vmem:[%s5328_s14 + $0x40] sm:$0xff] }
0x186a   :  { %2629 = vrot.lane.b32.xlu0 %v2433_v23, %s4346_s4  ;;  %2481 = vrot.lane.b32.xlu1 %v2433_v23, %s4347_s11  ;;  %4082 = vpush %v2433_v23  ;;  %v2460_v26 = vrot.slane %v2433_v23, 1 }
0x186c   :  { %4084 = vpush %v2460_v26 }
0x186e   :  { %2666 = vrot.lane.b32.xlu0 %v2433_v23, %s4348_s5  ;;  %2518 = vrot.lane.b32.xlu1 %v2433_v23, %s4349_s26 }
0x1872   :  { %2703 = vrot.lane.b32.xlu0 %v2433_v23, %s4350_s27  ;;  %2555 = vrot.lane.b32.xlu1 %v2433_v23, %s4351_s30 }
0x1876   :  { %2740 = vrot.lane.b32.xlu0 %v2433_v23, %s4352_s28  ;;  %2592 = vrot.lane.b32.xlu1 %v2433_v23, %s4353_s13 }
0x187a   :  { %2777 = vrot.lane.b32.xlu0 %v2433_v23, %s4354_s19  ;;  %2644 = vrot.lane.b32.xlu1 %v2460_v26, %s4346_s4 }
0x187e   :  { %2681 = vrot.lane.b32.xlu1 %v2460_v26, %s4348_s5  ;;  %2496 = vrot.lane.b32.xlu0 %v2460_v26, %s4347_s11 }
0x1882   :  { %2718 = vrot.lane.b32.xlu1 %v2460_v26, %s4350_s27  ;;  %2533 = vrot.lane.b32.xlu0 %v2460_v26, %s4349_s26 }
0x1886   :  { %2755 = vrot.lane.b32.xlu1 %v2460_v26, %s4352_s28  ;;  %2570 = vrot.lane.b32.xlu0 %v2460_v26, %s4351_s30 }
0x188a   :  { %2792 = vrot.lane.b32.xlu1 %v2460_v26, %s4354_s19  ;;  %2607 = vrot.lane.b32.xlu0 %v2460_v26, %s4353_s13 }
0x188e   :  { %2829 = vrot.lane.b32.xlu1 %v2460_v26, %s4355_s10  ;;  %2814 = vrot.lane.b32.xlu0 %v2433_v23, %s4355_s10 }
0x1892   :  { %2866 = vrot.lane.b32.xlu1 %v2460_v26, %s4356_s9  ;;  %2851 = vrot.lane.b32.xlu0 %v2433_v23, %s4356_s9 }
0x1896   :  { %2903 = vrot.lane.b32.xlu1 %v2460_v26, %s4357_s1  ;;  %2888 = vrot.lane.b32.xlu0 %v2433_v23, %s4357_s1 }
0x189a   :  { %2940 = vrot.lane.b32.xlu1 %v2460_v26, %s4358_s6  ;;  %2925 = vrot.lane.b32.xlu0 %v2433_v23, %s4358_s6 }
0x189b   :  { %s4083_s20 = spop %4082 }
0x189c   :  { %v2448_v43 = vstv %s4083_s20 }
0x189d   :  { %s4085_s3 = spop %4084  ;;  %v2450_v20 = vmul.f32 %v2448_v43, %v2441_v54 }
0x189e   :  { %2977 = vrot.lane.b32.xlu1 %v2460_v26, %s4359_s2  ;;  %2962 = vrot.lane.b32.xlu0 %v2433_v23, %s4359_s2 }
0x18a2   :  { %3014 = vrot.lane.b32.xlu1 %v2460_v26, %s4360_s18  ;;  %2999 = vrot.lane.b32.xlu0 %v2433_v23, %s4360_s18  ;;  %v3048_v26 = vsel %vm3047_vm7, %v3046_v17, %v3033_v7  ;;  %v3485_v17 = vld [vmem:[%s5328_s14 + $0x48] sm:$0xff] }
0x18a6   :  { %2096 = vrot.lane.b32.xlu0 %v4270_v29, %s4345_s21  ;;  %v3230_v29 = vsel %vm3051_vm9, %v3229_v62, %v3220_v12  ;;  %v3488_v62 = vld [vmem:[%s5329_s15 + $0x10] sm:$0xff] }
0x18dc   :  { %v2630_v35 = vpop.permute.xlu0 %2629  ;;  %v2482_v30 = vpop.permute.xlu1 %2481 }
0x18dd   :  { %4086 = vpush %v2482_v30  ;;  %v3050_v30 = vsel %vm3049_vm8, %v3048_v26, %v3035_v8 }
0x18e0   :  { %v2667_v27 = vpop.permute.xlu0 %2666  ;;  %v2519_v48 = vpop.permute.xlu1 %2518 }
0x18e4   :  { %v2704_v15 = vpop.permute.xlu0 %2703  ;;  %v2556_v25 = vpop.permute.xlu1 %2555 }
0x18e8   :  { %v2741_v31 = vpop.permute.xlu0 %2740  ;;  %v2593_v32 = vpop.permute.xlu1 %2592 }
0x18ec   :  { %v2778_v33 = vpop.permute.xlu0 %2777  ;;  %v2645_v0 = vpop.permute.xlu1 %2644 }
0x18f0   :  { %v2682_v21 = vpop.permute.xlu1 %2681  ;;  %v2497_v34 = vpop.permute.xlu0 %2496 }
0x18f1   :  { %4088 = vpush %v2497_v34  ;;  %v3480_v34 = vld [vmem:[%s5328_s14 + $0x28] sm:$0xff] }
0x18f2   :  { %4090 = vpush %v2519_v48 }
0x18f4   :  { %v2719_v37 = vpop.permute.xlu1 %2718  ;;  %v2534_v38 = vpop.permute.xlu0 %2533 }
0x18f5   :  { %4092 = vpush %v2534_v38 }
0x18f6   :  { %4094 = vpush %v2556_v25  ;;  %v3052_v25 = vsel %vm3051_vm9, %v3050_v30, %v3037_v44 }
0x18f8   :  { %v2756_v47 = vpop.permute.xlu1 %2755  ;;  %v2571_v39 = vpop.permute.xlu0 %2570 }
0x18f9   :  { %4096 = vpush %v2571_v39  ;;  %v2438_v39 = vld [vmem:[%s5330_s16 + $0x10] sm:$0xff] }
0x18fa   :  { %4098 = vpush %v2593_v32  ;;  %v2452_v32 = vmul.f32 %v2448_v43, %v2443_v18 }
0x18fc   :  { %v2793_v40 = vpop.permute.xlu1 %2792  ;;  %v2608_v41 = vpop.permute.xlu0 %2607  ;;  %v2456_v24 = vadd.f32 %v2452_v32, %v2438_v39  ;;  %v3489_v32 = vld [vmem:[%s5328_s14 + $0x60] sm:$0xff] }
0x18fd   :  { %4100 = vpush %v2608_v41  ;;  %v2440_v41 = vld [vmem:[%s5331_s17] sm:$0xff] }
0x18fe   :  { %4102 = vpush %v2630_v35  ;;  %v3039_v35 = vrot.slane %v4863_v3, 2  ;;  %v2437_v3 = vld [vmem:[%s5330_s16 + $0x8] sm:$0xff] }
0x18ff   :  { %4104 = vpush %v2645_v0  ;;  %v2458_v0 = vmul.f32 %v2448_v43, %v2445_v14 }
0x1900   :  { %4106 = vpush %v2667_v27  ;;  %v2830_v63 = vpop.permute.xlu1 %2829  ;;  %v2815_v42 = vpop.permute.xlu0 %2814  ;;  %v2462_v27 = vstv %s4085_s3 }
0x1901   :  { %4108 = vpush %v2682_v21  ;;  %v3479_v21 = vld [vmem:[%s5328_s14 + $0x20] sm:$0xff]  ;;  %v2472_v22 = vmul.f32 %v2462_v27, %v2445_v14 }
0x1902   :  { %4110 = vpush %v2704_v15  ;;  %v3231_v15 = vsel %vm3053_vm10, %v3230_v29, %v3222_v16 }
0x1903   :  { %4112 = vpush %v2719_v37 }
0x1904   :  { %4114 = vpush %v2741_v31  ;;  %v2867_v49 = vpop.permute.xlu1 %2866  ;;  %v2852_v50 = vpop.permute.xlu0 %2851  ;;  %v2451_v31 = vmul.f32 %v2448_v43, %v2442_v28 }
0x1905   :  { %4116 = vpush %v2756_v47 }
0x1906   :  { %4118 = vpush %v2778_v33  ;;  %v2453_v33 = vmul.f32 %v2448_v43, %v2444_v19  ;;  %v2455_v61 = vadd.f32 %v2451_v31, %v2437_v3  ;;  %v2473_v43 = vadd.f32 %v2472_v22, %v2440_v41 }
0x1907   :  { %4120 = vpush %v2793_v40  ;;  %v2439_v40 = vld [vmem:[%s5330_s16 + $0x18] sm:$0xff] }
0x1908   :  { %4122 = vpush %v2815_v42  ;;  %v2904_v51 = vpop.permute.xlu1 %2903  ;;  %v2889_v52 = vpop.permute.xlu0 %2888  ;;  %v2464_v42 = vmul.f32 %v2462_v27, %v2441_v54  ;;  %v2457_v1 = vadd.f32 %v2453_v33, %v2439_v40 }
0x1909   :  { %4124 = vpush %v2830_v63  ;;  %v2454_v63 = vadd.f32 %v2450_v20, %v2436_v46 }
0x190a   :  { %4126 = vpush %v2852_v50  ;;  %v3054_v50 = vsel %vm3053_vm10, %v3052_v25, %v3039_v35 }
0x190b   :  { %4128 = vpush %v2867_v49  ;;  %v2465_v49 = vmul.f32 %v2462_v27, %v2442_v28  ;;  %v3486_v28 = vld [vmem:[%s5328_s14 + $0x50] sm:$0xff] }
0x190c   :  { %4130 = vpush %v2889_v52  ;;  %v2941_v60 = vpop.permute.xlu1 %2940  ;;  %v2926_v53 = vpop.permute.xlu0 %2925  ;;  %v2467_v52 = vmul.f32 %v2462_v27, %v2444_v19 }
0x190d   :  { %4132 = vpush %v2904_v51  ;;  %v2466_v51 = vmul.f32 %v2462_v27, %v2443_v18  ;;  %v2469_v8 = vadd.f32 %v2465_v49, %v2437_v3 }
0x190e   :  { %4134 = vpush %v2926_v53  ;;  %s4087_s30 = spop %4086  ;;  %v3482_v53 = vld [vmem:[%s5328_s14 + $0x38] sm:$0xff]  ;;  %v2471_v44 = vadd.f32 %v2467_v52, %v2439_v40  ;;  %v3490_v40 = vld [vmem:[%s5328_s14 + $0x68] sm:$0xff] }
0x190f   :  { %4136 = vpush %v2941_v60  ;;  %v2484_v37 = vstv %s4087_s30  ;;  %v3481_v60 = vld [vmem:[%s5328_s14 + $0x30] sm:$0xff]  ;;  %v2470_v12 = vadd.f32 %v2466_v51, %v2438_v39  ;;  %v3493_v51 = vld [vmem:[%s5329_s15 + $0x18] sm:$0xff] }
0x1910   :  { %v2978_v55 = vpop.permute.xlu1 %2977  ;;  %v2963_v56 = vpop.permute.xlu0 %2962  ;;  %v2486_v57 = vmul.f32 %v3479_v21, %v2484_v37  ;;  %v2487_v59 = vmul.f32 %v3480_v34, %v2484_v37  ;;  %v2488_v7 = vmul.f32 %v3481_v60, %v2484_v37  ;;  %v2489_v9 = vmul.f32 %v3482_v53, %v2484_v37 }
0x1911   :  { %4138 = vpush %v2963_v56  ;;  %v2494_v10 = vmul.f32 %v3483_v45, %v2484_v37 }
0x1912   :  { %4140 = vpush %v2978_v55  ;;  %v2491_v16 = vadd.f32 %v2487_v59, %v2455_v61  ;;  %v2492_v14 = vadd.f32 %v2488_v7, %v2456_v24  ;;  %v2493_v20 = vadd.f32 %v2489_v9, %v2457_v1 }
0x1914   :  { %v3015_v6 = vpop.permute.xlu1 %3014  ;;  %v3000_v58 = vpop.permute.xlu0 %2999 }
0x1915   :  { %4142 = vpush %v3000_v58  ;;  %v2468_v58 = vadd.f32 %v2464_v42, %v2436_v46 }
0x1916   :  { %4144 = vpush %v3015_v6  ;;  %v2459_v6 = vadd.f32 %v2458_v0, %v2440_v41  ;;  %v3491_v41 = vld [vmem:[%s5328_s14 + $0x70] sm:$0xff] }
0x1918   :  { %v2097_v5 = vpop.permute.xlu0 %2096  ;;  %v2495_v29 = vadd.f32 %v2494_v10, %v2459_v6 }
0x1919   :  { %v2099_v23 = vmul.f32 %v2097_v5, %v2094_v13  ;;  %v2490_v13 = vadd.f32 %v2486_v57, %v2454_v63  ;;  %v3492_v63 = vld [vmem:[%s5328_s14 + $0x78] sm:$0xff] }
0x191b   :  { %v2101_v48 = vadd.f32 %v2100_v11, %v2099_v23  ;;  %v3487_v23 = vld [vmem:[%s5328_s14 + $0x58] sm:$0xff] }
0x191d   :  { %v3042_v38 = vrot.slane %v2101_v48, 1  ;;  %v3224_v47 = vrot.slane %v2101_v48, 2 }
0x191f   :  { %v3232_v55 = vsel %vm3055_vm11, %v3231_v15, %v3224_v47  ;;  %v3056_v56 = vsel %vm3055_vm11, %v3054_v50, %v3042_v38 }
0x1920   :  { %3313 = vrot.lane.b32.xlu0 %v3232_v55, %s4345_s21  ;;  %3137 = vrot.lane.b32.xlu1 %v3056_v56, %s4345_s21 }
0x1922   :  { %s4089_s17 = spop %4088 }
0x1923   :  { %v2499_v54 = vstv %s4089_s17  ;;  %s4091_s26 = spop %4090 }
0x1924   :  { %v2501_v5 = vmul.f32 %v3479_v21, %v2499_v54  ;;  %v2502_v18 = vmul.f32 %v3480_v34, %v2499_v54  ;;  %v2503_v19 = vmul.f32 %v3481_v60, %v2499_v54  ;;  %v2504_v11 = vmul.f32 %v3482_v53, %v2499_v54 }
0x1925   :  { %v2521_v26 = vstv %s4091_s26  ;;  %v2509_v35 = vmul.f32 %v3483_v45, %v2499_v54 }
0x1926   :  { %s4093_s2 = spop %4092  ;;  %v2505_v30 = vadd.f32 %v2501_v5, %v2468_v58  ;;  %v2523_v46 = vmul.f32 %v3484_v36, %v2521_v26  ;;  %v2524_v27 = vmul.f32 %v3485_v17, %v2521_v26  ;;  %v2525_v48 = vmul.f32 %v3486_v28, %v2521_v26  ;;  %v3494_v58 = vld [vmem:[%s5328_s14 + $0x80] sm:$0xff] }
0x1927   :  { %s4095_s18 = spop %4094  ;;  %v2526_v15 = vmul.f32 %v3487_v23, %v2521_v26  ;;  %v2531_v25 = vmul.f32 %v3488_v62, %v2521_v26  ;;  %v2536_v31 = vstv %s4093_s2  ;;  %v2506_v3 = vadd.f32 %v2502_v18, %v2469_v8  ;;  %v3498_v5 = vld [vmem:[%s5329_s15 + $0x20] sm:$0xff] }
0x1928   :  { %v2558_v33 = vstv %s4095_s18  ;;  %v2507_v0 = vadd.f32 %v2503_v19, %v2470_v12  ;;  %v2508_v21 = vadd.f32 %v2504_v11, %v2471_v44  ;;  %v2538_v34 = vmul.f32 %v3484_v36, %v2536_v31  ;;  %v3495_v12 = vld [vmem:[%s5328_s14 + $0x88] sm:$0xff]  ;;  %v3496_v44 = vld [vmem:[%s5328_s14 + $0x90] sm:$0xff] }
0x1929   :  { %v2510_v37 = vadd.f32 %v2509_v35, %v2473_v43  ;;  %v2527_v38 = vadd.f32 %v2523_v46, %v2490_v13  ;;  %v2539_v47 = vmul.f32 %v3485_v17, %v2536_v31  ;;  %v2540_v39 = vmul.f32 %v3486_v28, %v2536_v31 }
0x192a   :  { %v2528_v42 = vadd.f32 %v2524_v27, %v2491_v16  ;;  %v2541_v49 = vmul.f32 %v3487_v23, %v2536_v31  ;;  %v2546_v50 = vmul.f32 %v3488_v62, %v2536_v31  ;;  %v2560_v52 = vmul.f32 %v3489_v32, %v2558_v33  ;;  %s4097_s5 = spop %4096  ;;  %v3497_v16 = vld [vmem:[%s5328_s14 + $0x98] sm:$0xff] }
0x192b   :  { %v2529_v60 = vadd.f32 %v2525_v48, %v2492_v14  ;;  %v2530_v53 = vadd.f32 %v2526_v15, %v2493_v20  ;;  %v2532_v45 = vadd.f32 %v2531_v25, %v2495_v29  ;;  %v2542_v55 = vadd.f32 %v2538_v34, %v2505_v30  ;;  %s4099_s17 = spop %4098  ;;  %v3499_v15 = vld [vmem:[%s5328_s14 + $0xa0] sm:$0xff]  ;;  %v3500_v25 = vld [vmem:[%s5328_s14 + $0xa8] sm:$0xff] }
0x192c   :  { %v2543_v56 = vadd.f32 %v2539_v47, %v2506_v3  ;;  %v2561_v22 = vmul.f32 %v3490_v40, %v2558_v33  ;;  %v2562_v57 = vmul.f32 %v3491_v41, %v2558_v33  ;;  %v2563_v59 = vmul.f32 %v3492_v63, %v2558_v33  ;;  %v3503_v34 = vld [vmem:[%s5329_s15 + $0x28] sm:$0xff] }
0x192d   :  { %v2544_v61 = vadd.f32 %v2540_v39, %v2507_v0  ;;  %v2545_v24 = vadd.f32 %v2541_v49, %v2508_v21  ;;  %v2568_v1 = vmul.f32 %v3493_v51, %v2558_v33  ;;  %v2573_v6 = vstv %s4097_s5  ;;  %v3501_v0 = vld [vmem:[%s5328_s14 + $0xb0] sm:$0xff]  ;;  %v3502_v21 = vld [vmem:[%s5328_s14 + $0xb8] sm:$0xff] }
0x192e   :  { %v2547_v7 = vadd.f32 %v2546_v50, %v2510_v37  ;;  %v2564_v9 = vadd.f32 %v2560_v52, %v2527_v38  ;;  %v2575_v10 = vmul.f32 %v3489_v32, %v2573_v6  ;;  %v2576_v8 = vmul.f32 %v3490_v40, %v2573_v6  ;;  %s4101_s6 = spop %4100 }
0x192f   :  { %v2577_v54 = vmul.f32 %v3491_v41, %v2573_v6  ;;  %v2578_v43 = vmul.f32 %v3492_v63, %v2573_v6  ;;  %v2583_v13 = vmul.f32 %v3493_v51, %v2573_v6  ;;  %v2595_v36 = vstv %s4099_s17  ;;  %s4103_s2 = spop %4102 }
0x1930   :  { %v2565_v17 = vadd.f32 %v2561_v22, %v2528_v42  ;;  %v2566_v28 = vadd.f32 %v2562_v57, %v2529_v60  ;;  %v2567_v18 = vadd.f32 %v2563_v59, %v2530_v53  ;;  %v2597_v19 = vmul.f32 %v3494_v58, %v2595_v36  ;;  %s4105_s16 = spop %4104  ;;  %v3504_v59 = vld [vmem:[%s5328_s14 + $0xc0] sm:$0xff] }
0x1931   :  { %v2569_v11 = vadd.f32 %v2568_v1, %v2532_v45  ;;  %v2579_v23 = vadd.f32 %v2575_v10, %v2542_v55  ;;  %v2598_v62 = vmul.f32 %v3495_v12, %v2595_v36  ;;  %v2599_v26 = vmul.f32 %v3496_v44, %v2595_v36  ;;  %s4107_s5 = spop %4106 }
0x1932   :  { %v2580_v14 = vadd.f32 %v2576_v8, %v2543_v56  ;;  %v2600_v20 = vmul.f32 %v3497_v16, %v2595_v36  ;;  %v2605_v29 = vmul.f32 %v3498_v5, %v2595_v36  ;;  %v2610_v35 = vstv %s4101_s6  ;;  %s4109_s17 = spop %4108 }
0x1933   :  { %v2581_v30 = vadd.f32 %v2577_v54, %v2544_v61  ;;  %v2582_v46 = vadd.f32 %v2578_v43, %v2545_v24  ;;  %v2584_v27 = vadd.f32 %v2583_v13, %v2547_v7  ;;  %v2612_v48 = vmul.f32 %v3494_v58, %v2610_v35  ;;  %v3505_v61 = vld [vmem:[%s5328_s14 + $0xc8] sm:$0xff]  ;;  %v3506_v24 = vld [vmem:[%s5328_s14 + $0xd0] sm:$0xff]  ;;  %s4111_s19 = spop %4110  ;;  %v3507_v54 = vld [vmem:[%s5328_s14 + $0xd8] sm:$0xff] }
0x1934   :  { %v2601_v31 = vadd.f32 %v2597_v19, %v2564_v9  ;;  %v2613_v32 = vmul.f32 %v3495_v12, %v2610_v35  ;;  %v2614_v33 = vmul.f32 %v3496_v44, %v2610_v35  ;;  %v2615_v3 = vmul.f32 %v3497_v16, %v2610_v35  ;;  %v3508_v13 = vld [vmem:[%s5329_s15 + $0x30] sm:$0xff] }
0x1935   :  { %v2602_v37 = vadd.f32 %v2598_v62, %v2565_v17  ;;  %v2603_v38 = vadd.f32 %v2599_v26, %v2566_v28  ;;  %v2620_v47 = vmul.f32 %v3498_v5, %v2610_v35  ;;  %v2632_v39 = vstv %s4103_s2  ;;  %s4113_s2 = spop %4112  ;;  %v3509_v26 = vld [vmem:[%s5328_s14 + $0xe0] sm:$0xff] }
0x1936   :  { %v2604_v40 = vadd.f32 %v2600_v20, %v2567_v18  ;;  %v2606_v41 = vadd.f32 %v2605_v29, %v2569_v11  ;;  %v2634_v63 = vmul.f32 %v3499_v15, %v2632_v39  ;;  %v2635_v42 = vmul.f32 %v3500_v25, %v2632_v39 }
0x1937   :  { %v2616_v49 = vadd.f32 %v2612_v48, %v2579_v23  ;;  %v2636_v50 = vmul.f32 %v3501_v0, %v2632_v39  ;;  %v2637_v51 = vmul.f32 %v3502_v21, %v2632_v39  ;;  %v2642_v52 = vmul.f32 %v3503_v34, %v2632_v39 }
0x1938   :  { %v2617_v60 = vadd.f32 %v2613_v32, %v2580_v14  ;;  %v2618_v53 = vadd.f32 %v2614_v33, %v2581_v30  ;;  %v2619_v45 = vadd.f32 %v2615_v3, %v2582_v46  ;;  %v2647_v55 = vstv %s4105_s16  ;;  %v3510_v30 = vld [vmem:[%s5328_s14 + $0xe8] sm:$0xff]  ;;  %v3512_v32 = vld [vmem:[%s5328_s14 + $0xf8] sm:$0xff]  ;;  %s4115_s16 = spop %4114 }
0x1939   :  { %v2621_v56 = vadd.f32 %v2620_v47, %v2584_v27  ;;  %v2638_v22 = vadd.f32 %v2634_v63, %v2601_v31  ;;  %v2639_v57 = vadd.f32 %v2635_v42, %v2602_v37  ;;  %v2669_v1 = vstv %s4107_s5  ;;  %v3511_v31 = vld [vmem:[%s5328_s14 + $0xf0] sm:$0xff]  ;;  %s4117_s5 = spop %4116 }
0x193a   :  { %v2640_v6 = vadd.f32 %v2636_v50, %v2603_v38  ;;  %v2641_v58 = vadd.f32 %v2637_v51, %v2604_v40  ;;  %v2643_v7 = vadd.f32 %v2642_v52, %v2606_v41  ;;  %v2649_v9 = vmul.f32 %v3499_v15, %v2647_v55  ;;  %s4119_s1 = spop %4118 }
0x193b   :  { %v2650_v10 = vmul.f32 %v3500_v25, %v2647_v55  ;;  %v2651_v8 = vmul.f32 %v3501_v0, %v2647_v55  ;;  %v2652_v12 = vmul.f32 %v3502_v21, %v2647_v55  ;;  %v2657_v44 = vmul.f32 %v3503_v34, %v2647_v55  ;;  %v3513_v21 = vld [vmem:[%s5329_s15 + $0x38] sm:$0xff]  ;;  %s4121_s6 = spop %4120 }
0x193c   :  { %v2653_v43 = vadd.f32 %v2649_v9, %v2616_v49  ;;  %v2671_v16 = vmul.f32 %v3504_v59, %v2669_v1  ;;  %v2672_v5 = vmul.f32 %v3505_v61, %v2669_v1  ;;  %v2673_v36 = vmul.f32 %v3506_v24, %v2669_v1 }
0x193d   :  { %v2654_v17 = vadd.f32 %v2650_v10, %v2617_v60  ;;  %v2655_v28 = vadd.f32 %v2651_v8, %v2618_v53  ;;  %v2656_v18 = vadd.f32 %v2652_v12, %v2619_v45  ;;  %v2658_v19 = vadd.f32 %v2657_v44, %v2621_v56  ;;  %v3514_v56 = vld [vmem:[%s5328_s14 + $0x100] sm:$0xff] }
0x193e   :  { %v2674_v11 = vmul.f32 %v3507_v54, %v2669_v1  ;;  %v2675_v23 = vadd.f32 %v2671_v16, %v2638_v22  ;;  %v2684_v62 = vstv %s4109_s17  ;;  %v2706_v14 = vstv %s4111_s19  ;;  %v3515_v22 = vld [vmem:[%s5328_s14 + $0x108] sm:$0xff] }
0x193f   :  { %v2676_v20 = vadd.f32 %v2672_v5, %v2639_v57  ;;  %v2677_v29 = vadd.f32 %v2673_v36, %v2640_v6  ;;  %v2679_v35 = vmul.f32 %v3508_v13, %v2669_v1  ;;  %v2721_v46 = vstv %s4113_s2  ;;  %v3516_v57 = vld [vmem:[%s5328_s14 + $0x110] sm:$0xff]  ;;  %v3518_v1 = vld [vmem:[%s5329_s15 + $0x40] sm:$0xff]  ;;  %s4123_s2 = spop %4122 }
0x1940   :  { %v2678_v27 = vadd.f32 %v2674_v11, %v2641_v58  ;;  %v2686_v48 = vmul.f32 %v3504_v59, %v2684_v62  ;;  %v2687_v15 = vmul.f32 %v3505_v61, %v2684_v62  ;;  %v2688_v25 = vmul.f32 %v3506_v24, %v2684_v62  ;;  %v3517_v24 = vld [vmem:[%s5328_s14 + $0x118] sm:$0xff]  ;;  %s4125_s13 = spop %4124 }
0x1941   :  { %v2680_v33 = vadd.f32 %v2679_v35, %v2643_v7  ;;  %v2689_v3 = vmul.f32 %v3507_v54, %v2684_v62  ;;  %v2694_v0 = vmul.f32 %v3508_v13, %v2684_v62  ;;  %v2708_v34 = vmul.f32 %v3509_v26, %v2706_v14  ;;  %s4127_s9 = spop %4126 }
0x1942   :  { %v2690_v37 = vadd.f32 %v2686_v48, %v2653_v43  ;;  %v2691_v38 = vadd.f32 %v2687_v15, %v2654_v17  ;;  %v2692_v47 = vadd.f32 %v2688_v25, %v2655_v28  ;;  %v2709_v39 = vmul.f32 %v3510_v30, %v2706_v14 }
0x1943   :  { %v2693_v40 = vadd.f32 %v2689_v3, %v2656_v18  ;;  %v2695_v41 = vadd.f32 %v2694_v0, %v2658_v19  ;;  %v2710_v63 = vmul.f32 %v3511_v31, %v2706_v14  ;;  %v2711_v42 = vmul.f32 %v3512_v32, %v2706_v14 }
0x1944   :  { %v2712_v49 = vadd.f32 %v2708_v34, %v2675_v23  ;;  %v2713_v50 = vadd.f32 %v2709_v39, %v2676_v20  ;;  %v2716_v51 = vmul.f32 %v3513_v21, %v2706_v14  ;;  %v2723_v52 = vmul.f32 %v3509_v26, %v2721_v46  ;;  %v3519_v14 = vld [vmem:[%s5328_s14 + $0x120] sm:$0xff]  ;;  %v3520_v20 = vld [vmem:[%s5328_s14 + $0x128] sm:$0xff] }
0x1945   :  { %v2714_v60 = vadd.f32 %v2710_v63, %v2677_v29  ;;  %v2715_v53 = vadd.f32 %v2711_v42, %v2678_v27  ;;  %v2724_v45 = vmul.f32 %v3510_v30, %v2721_v46  ;;  %v2725_v55 = vmul.f32 %v3511_v31, %v2721_v46  ;;  %v3521_v29 = vld [vmem:[%s5328_s14 + $0x130] sm:$0xff]  ;;  %v3523_v27 = vld [vmem:[%s5329_s15 + $0x48] sm:$0xff] }
0x1946   :  { %v2726_v59 = vmul.f32 %v3512_v32, %v2721_v46  ;;  %v2731_v61 = vmul.f32 %v3513_v21, %v2721_v46  ;;  %v2743_v6 = vstv %s4115_s16  ;;  %v2758_v58 = vstv %s4117_s5  ;;  %v3522_v46 = vld [vmem:[%s5328_s14 + $0x138] sm:$0xff] }
0x1947   :  { %v2717_v7 = vadd.f32 %v2716_v51, %v2680_v33  ;;  %v2727_v9 = vadd.f32 %v2723_v52, %v2690_v37  ;;  %v2728_v10 = vadd.f32 %v2724_v45, %v2691_v38  ;;  %v2729_v8 = vadd.f32 %v2725_v55, %v2692_v47  ;;  %v3526_v51 = vld [vmem:[%s5328_s14 + $0x150] sm:$0xff]  ;;  %v3527_v52 = vld [vmem:[%s5328_s14 + $0x158] sm:$0xff] }
0x1948   :  { %v2730_v12 = vadd.f32 %v2726_v59, %v2693_v40  ;;  %v2732_v44 = vadd.f32 %v2731_v61, %v2695_v41  ;;  %v2745_v54 = vmul.f32 %v3514_v56, %v2743_v6  ;;  %v2746_v43 = vmul.f32 %v3515_v22, %v2743_v6  ;;  %v3524_v40 = vld [vmem:[%s5328_s14 + $0x140] sm:$0xff] }
0x1949   :  { %v2747_v13 = vmul.f32 %v3516_v57, %v2743_v6  ;;  %v2748_v16 = vmul.f32 %v3517_v24, %v2743_v6  ;;  %v2753_v5 = vmul.f32 %v3518_v1, %v2743_v6  ;;  %v2760_v36 = vmul.f32 %v3514_v56, %v2758_v58  ;;  %v3528_v56 = vld [vmem:[%s5329_s15 + $0x50] sm:$0xff] }
0x194a   :  { %v2749_v17 = vadd.f32 %v2745_v54, %v2712_v49  ;;  %v2750_v28 = vadd.f32 %v2746_v43, %v2713_v50  ;;  %v2761_v18 = vmul.f32 %v3515_v22, %v2758_v58  ;;  %v2762_v19 = vmul.f32 %v3516_v57, %v2758_v58  ;;  %v3525_v50 = vld [vmem:[%s5328_s14 + $0x148] sm:$0xff] }
0x194b   :  { %v2751_v11 = vadd.f32 %v2747_v13, %v2714_v60  ;;  %v2752_v23 = vadd.f32 %v2748_v16, %v2715_v53  ;;  %v2754_v62 = vadd.f32 %v2753_v5, %v2717_v7  ;;  %v2763_v26 = vmul.f32 %v3517_v24, %v2758_v58  ;;  %v3529_v13 = vld [vmem:[%s5328_s14 + $0x160] sm:$0xff] }
0x194c   :  { %v2764_v35 = vadd.f32 %v2760_v36, %v2727_v9  ;;  %v2768_v30 = vmul.f32 %v3518_v1, %v2758_v58  ;;  %v2780_v48 = vstv %s4119_s1  ;;  %v2795_v15 = vstv %s4121_s6  ;;  %s4129_s1 = spop %4128 }
0x194d   :  { %v2765_v25 = vadd.f32 %v2761_v18, %v2728_v10  ;;  %v2766_v31 = vadd.f32 %v2762_v19, %v2729_v8  ;;  %v2767_v32 = vadd.f32 %v2763_v26, %v2730_v12  ;;  %v2817_v33 = vstv %s4123_s2  ;;  %v3532_v18 = vld [vmem:[%s5328_s14 + $0x178] sm:$0xff]  ;;  %s4131_s4 = spop %4130 }
0x194e   :  { %v2769_v3 = vadd.f32 %v2768_v30, %v2732_v44  ;;  %v2782_v0 = vmul.f32 %v3519_v14, %v2780_v48  ;;  %v2783_v21 = vmul.f32 %v3520_v20, %v2780_v48  ;;  %v2784_v34 = vmul.f32 %v3521_v29, %v2780_v48  ;;  %v3533_v26 = vld [vmem:[%s5329_s15 + $0x58] sm:$0xff]  ;;  %s4133_s11 = spop %4132 }
0x194f   :  { %v2785_v37 = vmul.f32 %v3522_v46, %v2780_v48  ;;  %v2790_v38 = vmul.f32 %v3523_v27, %v2780_v48  ;;  %v2797_v47 = vmul.f32 %v3519_v14, %v2795_v15  ;;  %v2798_v39 = vmul.f32 %v3520_v20, %v2795_v15  ;;  %s4135_s10 = spop %4134 }
0x1950   :  { %v2786_v41 = vadd.f32 %v2782_v0, %v2749_v17  ;;  %v2787_v63 = vadd.f32 %v2783_v21, %v2750_v28  ;;  %v2788_v42 = vadd.f32 %v2784_v34, %v2751_v11  ;;  %v2799_v49 = vmul.f32 %v3521_v29, %v2795_v15  ;;  %v3530_v17 = vld [vmem:[%s5328_s14 + $0x168] sm:$0xff]  ;;  %v3531_v28 = vld [vmem:[%s5328_s14 + $0x170] sm:$0xff]  ;;  %s4137_s29 = spop %4136 }
0x1951   :  { %v2789_v60 = vadd.f32 %v2785_v37, %v2752_v23  ;;  %v2791_v53 = vadd.f32 %v2790_v38, %v2754_v62  ;;  %v2800_v45 = vmul.f32 %v3522_v46, %v2795_v15  ;;  %v2801_v55 = vadd.f32 %v2797_v47, %v2764_v35  ;;  %v3534_v37 = vld [vmem:[%s5328_s14 + $0x180] sm:$0xff]  ;;  %v3535_v38 = vld [vmem:[%s5328_s14 + $0x188] sm:$0xff]  ;;  %v3536_v47 = vld [vmem:[%s5328_s14 + $0x190] sm:$0xff]  ;;  %s4139_s8 = spop %4138 }
0x1952   :  { %v2802_v22 = vadd.f32 %v2798_v39, %v2765_v25  ;;  %v2803_v57 = vadd.f32 %v2799_v49, %v2766_v31  ;;  %v2805_v59 = vmul.f32 %v3523_v27, %v2795_v15  ;;  %v2819_v61 = vmul.f32 %v3524_v40, %v2817_v33  ;;  %s4141_s30 = spop %4140 }
0x1953   :  { %v2820_v24 = vmul.f32 %v3525_v50, %v2817_v33  ;;  %v2821_v1 = vmul.f32 %v3526_v51, %v2817_v33  ;;  %v2822_v6 = vmul.f32 %v3527_v52, %v2817_v33  ;;  %v2832_v58 = vstv %s4125_s13  ;;  %s4143_s19 = spop %4142 }
0x1954   :  { %v2804_v7 = vadd.f32 %v2800_v45, %v2767_v32  ;;  %v2806_v9 = vadd.f32 %v2805_v59, %v2769_v3  ;;  %v2823_v10 = vadd.f32 %v2819_v61, %v2786_v41  ;;  %v2827_v8 = vmul.f32 %v3528_v56, %v2817_v33  ;;  %v3537_v41 = vld [vmem:[%s5328_s14 + $0x198] sm:$0xff] }
0x1955   :  { %v2824_v12 = vadd.f32 %v2820_v24, %v2787_v63  ;;  %v2825_v44 = vadd.f32 %v2821_v1, %v2788_v42  ;;  %v2826_v54 = vadd.f32 %v2822_v6, %v2789_v60  ;;  %v2834_v43 = vmul.f32 %v3524_v40, %v2832_v58  ;;  %v3538_v63 = vld [vmem:[%s5329_s15 + $0x60] sm:$0xff]  ;;  %v3540_v1 = vld [vmem:[%s5328_s14 + $0x1a8] sm:$0xff] }
0x1956   :  { %v2835_v16 = vmul.f32 %v3525_v50, %v2832_v58  ;;  %v2836_v5 = vmul.f32 %v3526_v51, %v2832_v58  ;;  %v2837_v36 = vmul.f32 %v3527_v52, %v2832_v58  ;;  %v2854_v19 = vstv %s4127_s9  ;;  %v3539_v24 = vld [vmem:[%s5328_s14 + $0x1a0] sm:$0xff] }
0x1957   :  { %v2828_v11 = vadd.f32 %v2827_v8, %v2791_v53  ;;  %v2838_v23 = vadd.f32 %v2834_v43, %v2801_v55  ;;  %v2842_v62 = vmul.f32 %v3528_v56, %v2832_v58  ;;  %v2869_v14 = vstv %s4129_s1  ;;  %v3543_v43 = vld [vmem:[%s5329_s15 + $0x68] sm:$0xff]  ;;  %s4145_s1 = spop %4144 }
0x1958   :  { %v2839_v20 = vadd.f32 %v2835_v16, %v2802_v22  ;;  %v2840_v29 = vadd.f32 %v2836_v5, %v2803_v57  ;;  %v2841_v35 = vadd.f32 %v2837_v36, %v2804_v7  ;;  %v2856_v30 = vmul.f32 %v3529_v13, %v2854_v19 }
0x1959   :  { %v2843_v46 = vadd.f32 %v2842_v62, %v2806_v9  ;;  %v2857_v27 = vmul.f32 %v3530_v17, %v2854_v19  ;;  %v2858_v48 = vmul.f32 %v3531_v28, %v2854_v19  ;;  %v2859_v15 = vmul.f32 %v3532_v18, %v2854_v19 }
0x195a   :  { %v2860_v25 = vadd.f32 %v2856_v30, %v2823_v10  ;;  %v2864_v31 = vmul.f32 %v3533_v26, %v2854_v19  ;;  %v2871_v32 = vmul.f32 %v3529_v13, %v2869_v14  ;;  %v2872_v33 = vmul.f32 %v3530_v17, %v2869_v14  ;;  %v3541_v10 = vld [vmem:[%s5328_s14 + $0x1b0] sm:$0xff] }
0x195b   :  { %v2861_v3 = vadd.f32 %v2857_v27, %v2824_v12  ;;  %v2862_v0 = vadd.f32 %v2858_v48, %v2825_v44  ;;  %v2863_v21 = vadd.f32 %v2859_v15, %v2826_v54  ;;  %v2873_v34 = vmul.f32 %v3531_v28, %v2869_v14  ;;  %v3542_v54 = vld [vmem:[%s5328_s14 + $0x1b8] sm:$0xff] }
0x195c   :  { %v2865_v39 = vadd.f32 %v2864_v31, %v2828_v11  ;;  %v2874_v40 = vmul.f32 %v3532_v18, %v2869_v14  ;;  %v2891_v42 = vstv %s4131_s4  ;;  %v2906_v49 = vstv %s4133_s11 }
0x195d   :  { %v2875_v50 = vadd.f32 %v2871_v32, %v2838_v23  ;;  %v2876_v51 = vadd.f32 %v2872_v33, %v2839_v20  ;;  %v2877_v52 = vadd.f32 %v2873_v34, %v2840_v29  ;;  %v2879_v60 = vmul.f32 %v3533_v26, %v2869_v14  ;;  %v3544_v23 = vld [vmem:[%s5328_s14 + $0x1c0] sm:$0xff]  ;;  %v3545_v20 = vld [vmem:[%s5328_s14 + $0x1c8] sm:$0xff]  ;;  %v3546_v29 = vld [vmem:[%s5328_s14 + $0x1d0] sm:$0xff] }
0x195e   :  { %v2878_v53 = vadd.f32 %v2874_v40, %v2841_v35  ;;  %v2893_v45 = vmul.f32 %v3534_v37, %v2891_v42  ;;  %v2894_v55 = vmul.f32 %v3535_v38, %v2891_v42  ;;  %v2895_v56 = vmul.f32 %v3536_v47, %v2891_v42  ;;  %v3547_v33 = vld [vmem:[%s5328_s14 + $0x1d8] sm:$0xff] }
0x195f   :  { %v2880_v22 = vadd.f32 %v2879_v60, %v2843_v46  ;;  %v2896_v57 = vmul.f32 %v3537_v41, %v2891_v42  ;;  %v2901_v59 = vmul.f32 %v3538_v63, %v2891_v42  ;;  %v2908_v61 = vmul.f32 %v3534_v37, %v2906_v49 }
0x1960   :  { %v2897_v6 = vadd.f32 %v2893_v45, %v2860_v25  ;;  %v2898_v58 = vadd.f32 %v2894_v55, %v2861_v3  ;;  %v2899_v7 = vadd.f32 %v2895_v56, %v2862_v0  ;;  %v2909_v9 = vmul.f32 %v3535_v38, %v2906_v49  ;;  %v3548_v0 = vld [vmem:[%s5329_s15 + $0x70] sm:$0xff] }
0x1961   :  { %v2900_v8 = vadd.f32 %v2896_v57, %v2863_v21  ;;  %v2902_v12 = vadd.f32 %v2901_v59, %v2865_v39  ;;  %v2910_v44 = vmul.f32 %v3536_v47, %v2906_v49  ;;  %v2928_v13 = vstv %s4135_s10  ;;  %v3551_v59 = vld [vmem:[%s5328_s14 + $0x1f0] sm:$0xff] }
0x1962   :  { %v2911_v16 = vmul.f32 %v3537_v41, %v2906_v49  ;;  %v2912_v5 = vadd.f32 %v2908_v61, %v2875_v50  ;;  %v2930_v36 = vmul.f32 %v3539_v24, %v2928_v13  ;;  %v2931_v17 = vmul.f32 %v3540_v1, %v2928_v13  ;;  %v3549_v50 = vld [vmem:[%s5328_s14 + $0x1e0] sm:$0xff]  ;;  %v3552_v61 = vld [vmem:[%s5328_s14 + $0x1f8] sm:$0xff] }
0x1963   :  { %v2913_v28 = vadd.f32 %v2909_v9, %v2876_v51  ;;  %v2914_v18 = vadd.f32 %v2910_v44, %v2877_v52  ;;  %v2916_v19 = vmul.f32 %v3538_v63, %v2906_v49  ;;  %v2932_v11 = vmul.f32 %v3541_v10, %v2928_v13 }
0x1964   :  { %v2933_v62 = vmul.f32 %v3542_v54, %v2928_v13  ;;  %v2938_v26 = vmul.f32 %v3543_v43, %v2928_v13  ;;  %v2943_v14 = vstv %s4137_s29  ;;  %v2965_v35 = vstv %s4139_s8 }
0x1965   :  { %v2915_v30 = vadd.f32 %v2911_v16, %v2878_v53  ;;  %v2917_v46 = vadd.f32 %v2916_v19, %v2880_v22  ;;  %v2934_v27 = vadd.f32 %v2930_v36, %v2897_v6  ;;  %v2935_v48 = vadd.f32 %v2931_v17, %v2898_v58  ;;  %v3550_v53 = vld [vmem:[%s5328_s14 + $0x1e8] sm:$0xff]  ;;  %v3553_v6 = vld [vmem:[%s5329_s15 + $0x78] sm:$0xff] }
0x1966   :  { %v2936_v15 = vadd.f32 %v2932_v11, %v2899_v7  ;;  %v2945_v25 = vmul.f32 %v3539_v24, %v2943_v14  ;;  %v2946_v31 = vmul.f32 %v3540_v1, %v2943_v14  ;;  %v2947_v32 = vmul.f32 %v3541_v10, %v2943_v14 }
0x1967   :  { %v2948_v3 = vmul.f32 %v3542_v54, %v2943_v14  ;;  %v2967_v21 = vmul.f32 %v3544_v23, %v2965_v35  ;;  %v2968_v34 = vmul.f32 %v3545_v20, %v2965_v35  ;;  %v2969_v37 = vmul.f32 %v3546_v29, %v2965_v35 }
0x1968   :  { %v2937_v38 = vadd.f32 %v2933_v62, %v2900_v8  ;;  %v2939_v47 = vadd.f32 %v2938_v26, %v2902_v12  ;;  %v2949_v39 = vadd.f32 %v2945_v25, %v2912_v5  ;;  %v2953_v40 = vmul.f32 %v3543_v43, %v2943_v14  ;;  %v5253_v25 = vld [vmem:[%s5357_s0 + $0x8] sm:$0xff] }
0x1969   :  { %v2950_v41 = vadd.f32 %v2946_v31, %v2913_v28  ;;  %v2951_v63 = vadd.f32 %v2947_v32, %v2914_v18  ;;  %v2952_v42 = vadd.f32 %v2948_v3, %v2915_v30  ;;  %v2970_v49 = vmul.f32 %v3547_v33, %v2965_v35 }
0x196a   :  { %v2954_v51 = vadd.f32 %v2953_v40, %v2917_v46  ;;  %v2975_v52 = vmul.f32 %v3548_v0, %v2965_v35  ;;  %v2980_v60 = vstv %s4141_s30  ;;  %v3002_v45 = vstv %s4143_s19 }
0x196b   :  { %v2971_v55 = vadd.f32 %v2967_v21, %v2934_v27  ;;  %v2972_v56 = vadd.f32 %v2968_v34, %v2935_v48  ;;  %v2973_v22 = vadd.f32 %v2969_v37, %v2936_v15  ;;  %v2982_v57 = vmul.f32 %v3544_v23, %v2980_v60 }
0x196c   :  { %v2983_v24 = vmul.f32 %v3545_v20, %v2980_v60  ;;  %v2990_v1 = vmul.f32 %v3548_v0, %v2980_v60  ;;  %v3004_v58 = vmul.f32 %v3549_v50, %v3002_v45  ;;  %v3017_v7 = vstv %s4145_s1  ;;  %v5248_v20 = vld [vmem:[%s5357_s0] sm:$0xff]  ;;  %s4361_s0 = smov [#allocation4]  }
0x196d   :  { %v2974_v9 = vadd.f32 %v2970_v49, %v2937_v38  ;;  %v2976_v10 = vadd.f32 %v2975_v52, %v2939_v47  ;;  %v2984_v8 = vmul.f32 %v3546_v29, %v2980_v60  ;;  %v3005_v12 = vmul.f32 %v3550_v53, %v3002_v45  ;;  %s3407_s4 = sshll.u32 %s4361_s0, 4  ;;  %s3408_s4 = int_to_ptr.vmem [resolvable:$true] %s3407_s4 }
0x196e   :  { %v2985_v44 = vmul.f32 %v3547_v33, %v2980_v60  ;;  %v2986_v54 = vadd.f32 %v2982_v57, %v2949_v39  ;;  %v3006_v43 = vmul.f32 %v3551_v59, %v3002_v45  ;;  %v3007_v13 = vmul.f32 %v3552_v61, %v3002_v45  ;;  %s4271_s11 = scalar_lea.vmem %s3408_s4, 32  ;;  %p4276_p1 = scmp.lt.s32.totalorder %s3408_s4, %s3408_s4 }
0x196f   :  { %v3008_v16 = vadd.f32 %v3004_v58, %v2971_v55  ;;  %v3009_v5 = vadd.f32 %v3005_v12, %v2972_v56  ;;  %v3012_v36 = vmul.f32 %v3553_v6, %v3002_v45  ;;  %v3019_v17 = vmul.f32 %v3549_v50, %v3017_v7  ;;  %p4272_p0 = scmp.ne.s32.totalorder %s3408_s4, %s4271_s11  ;;  %p4277_p2 = scmp.lt.s32.totalorder %s4271_s11, %s4271_s11 }
0x1970   :  { %v2987_v28 = vadd.f32 %v2983_v24, %v2950_v41  ;;  %v2991_v18 = vadd.f32 %v2990_v1, %v2954_v51  ;;  %v3020_v19 = vmul.f32 %v3550_v53, %v3017_v7  ;;  %v3021_v11 = vmul.f32 %v3551_v59, %v3017_v7 }
0x1971   :  { %v3022_v23 = vmul.f32 %v3552_v61, %v3017_v7  ;;  %v3023_v62 = vadd.f32 %v3019_v17, %v2986_v54  ;;  %v3027_v26 = vmul.f32 %v3553_v6, %v3017_v7  ;;  %v3013_v14 = vadd.f32 %v3012_v36, %v2976_v10  ;;  %p4278_p3 = por %p4277_p2, %p4276_p1 }
0x1972   :  { %v2988_v29 = vadd.f32 %v2984_v8, %v2951_v63  ;;  %v3024_v35 = vadd.f32 %v3020_v19, %v2987_v28  ;;  %v4071_v30 = vpack.c.bf16 %v3009_v5, %v3008_v16  ;;  %v2989_v46 = vadd.f32 %v2985_v44, %v2952_v42 }
0x1973   :  { %v3010_v27 = vadd.f32 %v3006_v43, %v2973_v22  ;;  %v3011_v48 = vadd.f32 %v3007_v13, %v2974_v9  ;;  %3919 = vmatpush3.msra.mxu0 %v3013_v14  ;;  %v3028_v15 = vadd.f32 %v3027_v26, %v2991_v18  ;;  %p4279_p4 = pnand %p4278_p3, %p4272_p0 }
0x1974   :  { %3921 = vmatmul.mubr.msk.f32.vlgmr.msra.gmra.mrb[24].mxu0 %vm254_vm2, %v5248_v20  ;;  %4070 = vmatprep.subr.bf16.mxu0 %v4341_v2  ;;  %v4077_v31 = vpack.c.bf16 %v3024_v35, %v3023_v62  ;;  %v3025_v32 = vadd.f32 %v3021_v11, %v2988_v29  ;;  %v3026_v33 = vadd.f32 %v3022_v23, %v2989_v46 }
0x1975   :  { %3935 = vmatpush3.msra.mxu1 %v3028_v15  ;;  %4072 = vmatpush3.bf16.msra.mxu0 %v4071_v30  ;;  %v4074_v3 = vpack.c.bf16 %v3011_v48, %v3010_v27 }
0x1976   :  { %3937 = vmatmul.mubr.msk.f32.vlgmr.msra.gmra.mrb[24].mxu1 %vm254_vm2, %v5253_v25  ;;  %4076 = vmatprep.subr.bf16.mxu1 %v4341_v2  ;;  %v4080_v0 = vpack.c.bf16 %v3026_v33, %v3025_v32 }
0x1977   :  { %4078 = vmatpush3.bf16.msra.mxu1 %v4077_v31  ;;  %4073 = vmatprep.subr.bf16.mxu0 %v4341_v2 }
0x1978   :  { %4079 = vmatprep.subr.bf16.mxu1 %v4341_v2  ;;  %3931 = vmatprep.mubr.msk.f32.mxu0 %vm4342_vm0, %v4343_v4 }
0x1979   :  { %4075 = vmatpush3.bf16.msra.mxu0 %v4074_v3  ;;  %3947 = vmatprep.mubr.msk.f32.mxu1 %vm4342_vm0, %v4343_v4 }
0x197b   :  { %4081 = vmatpush3.bf16.msra.mxu1 %v4080_v0 }
0x1992   :  { %v3314_v21 = vpop.permute.xlu0 %3313  ;;  %v3138_v34 = vpop.permute.xlu1 %3137 }
0x1993   :  { %3932 = vmatmul.mubr.msk.f32.vlgmr.msra.gmra.mrb[26].mxu0 %vm418_vm4, %v3138_v34  ;;  %3948 = vmatmul.mubr.msk.f32.vlgmr.msra.gmra.mrb[26].mxu1 %vm418_vm4, %v3314_v21 }
0x1994   :  { %4282 = shalt.err (!%p4279_p4)
}
0x1995   :  { %s4283_s17 = scalar_lea.hbm %s5337_s23, 32 }
0x1996   :  { %p4284_p5 = scmp.ne.s32.totalorder %s5337_s23, %s4283_s17  ;;  %p4287_p6 = scmp.lt.u32.totalorder %s4283_s17, %s5337_s23 }
0x1998   :  { %p4289_p7 = pnand %p4287_p6, %p4284_p5 }
0x199a   :  { %4292 = shalt.err (!%p4289_p7)
}
0x199b   :  { %3410 = dma.vmem_to_hbm [thread:$0]  %s3408_s4, 32, %s5337_s23, [#allocation5]  }
0x199c   :  { %s4362_s19 = smov [#allocation6]  }
0x199d   :  { %s3417_s10 = sshll.u32 %s4362_s19, 4  ;;  %s3418_s10 = int_to_ptr.vmem [resolvable:$true] %s3417_s10 }
0x199e   :  { %s4293_s9 = scalar_lea.vmem %s3418_s10, 32  ;;  %p4298_p9 = scmp.lt.s32.totalorder %s3418_s10, %s3418_s10 }
0x199f   :  { %p4294_p8 = scmp.ne.s32.totalorder %s3418_s10, %s4293_s9  ;;  %p4299_p10 = scmp.lt.s32.totalorder %s4293_s9, %s4293_s9 }
0x19a1   :  { %p4300_p11 = por %p4299_p10, %p4298_p9 }
0x19a3   :  { %p4301_p12 = pnand %p4300_p11, %p4294_p8 }
0x19a5   :  { %4304 = shalt.err (!%p4301_p12)
}
0x19a6   :  { %s4305_s2 = scalar_lea.hbm %s5338_s24, 32 }
0x19a7   :  { %p4306_p13 = scmp.ne.s32.totalorder %s5338_s24, %s4305_s2  ;;  %p4309_p0 = scmp.lt.u32.totalorder %s4305_s2, %s5338_s24 }
0x19a9   :  { %p4311_p1 = pnand %p4309_p0, %p4306_p13 }
0x19ab   :  { %4314 = shalt.err (!%p4311_p1)
}
0x19ac   :  { %3420 = dma.vmem_to_hbm [thread:$0]  %s3418_s10, 32, %s5338_s24, [#allocation5]  }
0x19ad   :  { %s4363_s25 = smov 8   ;;  %s4364_s14 = smov [#allocation2]  }
0x19ae   :  { %s3394_s15 = sshll.u32 %s4364_s14, 4  ;;  %s3395_s15 = int_to_ptr.vmem [resolvable:$true] %s3394_s15 }
0x19af   :  { %s4315_s24 = scalar_lea.vmem %s3395_s15, 256  ;;  %p4320_p3 = scmp.lt.s32.totalorder %s3395_s15, %s3395_s15 }
0x19b0   :  { %p4316_p2 = scmp.ne.s32.totalorder %s3395_s15, %s4315_s24  ;;  %p4321_p4 = scmp.lt.s32.totalorder %s4315_s24, %s4315_s24 }
0x19b2   :  { %p4322_p5 = por %p4321_p4, %p4320_p3 }
0x19b4   :  { %p4323_p6 = pnand %p4322_p5, %p4316_p2 }
0x1a47   :  { %v3127_v2 = vpop.f32.mrb[24].mxu0 }
0x1a48   :  { %3132 = vrot.lane.b32.xlu1 %v3127_v2, %s4363_s25  ;;  %v3922_v4 = vpop.f32.mrb[25].mxu0 }
0x1a49   :  { %v3303_v37 = vpop.f32.mrb[24].mxu1 }
0x1a4a   :  { %3308 = vrot.lane.b32.xlu0 %v3303_v37, %s4363_s25  ;;  %v3938_v38 = vpop.f32.mrb[25].mxu1 }
0x1a66   :  { %v3207_v47 = vpop.f32.mrb[26].mxu0  ;;  %v3383_v39 = vpop.f32.mrb[26].mxu1 }
0x1a67   :  { %v3933_v40 = vpop.f32.mrb[27].mxu0  ;;  %v3949_v41 = vpop.f32.mrb[27].mxu1 }
0x1aba   :  { %v3133_v63 = vpop.permute.xlu1 %3132 }
0x1abb   :  { %v3135_v42 = vsel %vm254_vm2, %v5248_v20, %v3133_v63 }
0x1abc   :  { %v3309_v49 = vpop.permute.xlu0 %3308  ;;  %v3208_v50 = vadd.f32 %v3207_v47, %v3135_v42 }
0x1abd   :  { %v3311_v51 = vsel %vm254_vm2, %v5253_v25, %v3309_v49 }
0x1abe   :  { %v3384_v52 = vadd.f32 %v3383_v39, %v3311_v51  ;;  %3211 = vst.msk [vmem:[#allocation2] sm:$0xff] %vm98_vm1, %v3208_v50 }
0x1ac0   :  { %3388 = vst.msk [vmem:[#allocation2 + $0x8] sm:$0xff] %vm98_vm1, %v3384_v52 }
0x1ac1   :  { %4326 = shalt.err (!%p4323_p6)
}
0x1ac2   :  { %s4327_s0 = scalar_lea.hbm %s5336_s22, 256 }
0x1ac3   :  { %p4328_p7 = scmp.ne.s32.totalorder %s5336_s22, %s4327_s0  ;;  %p4331_p8 = scmp.lt.u32.totalorder %s4327_s0, %s5336_s22 }
0x1ac5   :  { %p4333_p9 = pnand %p4331_p8, %p4328_p7 }
0x1ac7   :  { %4336 = shalt.err (!%p4333_p9)
}
0x1ac8   :  { %s4365_s17 = smov 128  }
0x1ac9   :  { %3400 = dma.vmem_to_hbm [thread:$0]  %s3395_s15, 256, %s5336_s22, [#allocation3], %s4365_s17, %s4365_s17, %s4363_s25  }
0x1aca   :  { %4337 = dma.done.wait [#allocation3], 256  }
0x1acb   :  { %4338 = vsyncadd [#allocation3], 4294967040 }
0x1acc   :  { %4339 = dma.done.wait [#allocation5], 64  }
0x1acd   :  { %4340 = vsyncadd [#allocation5], 4294967232 }
0x1ace   :  { %3430 = vsyncpa [#allocation3], 1 }
0x1acf   :  { %3431 = vsyncpa [#allocation5], 1 }

</bundles_post_ra>
